<compile_context>
chip_gen: v6e
topology: v6e:2x2x1
jax: 0.10.0
libtpu: 0.0.40
codegen_flags: <defaults>
</compile_context>

<pallas_src>
import math

import numpy as np
import jax
import jax.numpy as jnp
from jax.experimental import pallas as pl
from jax.experimental.pallas import tpu as pltpu


# ----------------------------- configuration -------------------------------
NUM_RADIAL = 4
NUM_SPHERICAL = 3
CUTOFF = 8.0
NUM_FEATURES = NUM_SPHERICAL ** 2 * NUM_RADIAL   # 36
Y00 = math.sqrt(1.0 / (4.0 * math.pi))           # l = 0 real SH constant


# ------------------- host-side constants (numpy, float64) ------------------
def _np_sph_jn(l, x):
    """Spherical Bessel j_l(x) via upward recurrence (numpy scalars/arrays)."""
    j0 = np.sin(x) / x
    if l == 0:
        return j0
    j1 = np.sin(x) / (x * x) - np.cos(x) / x
    if l == 1:
        return j1
    jm2, jm1 = j0, j1
    for n in range(2, l + 1):
        jn = (2 * n - 1) / x * jm1 - jm2
        jm2, jm1 = jm1, jn
    return jm1


def _bessel_zeros(n, k):
    """First k zeros of j_l for l=0..n-1 (interlacing + bisection, like DimeNet)."""
    zerosj = np.zeros((n, k), dtype=np.float64)
    zerosj[0] = np.arange(1, k + 1) * np.pi
    points = np.arange(1, k + n) * np.pi
    racines = np.zeros(k + n - 1, dtype=np.float64)
    for i in range(1, n):
        for j in range(k + n - 1 - i):
            a, b = points[j], points[j + 1]
            fa = _np_sph_jn(i, a)
            for _ in range(200):
                m = 0.5 * (a + b)
                fm = _np_sph_jn(i, m)
                if fa * fm <= 0.0:
                    b = m
                else:
                    a, fa = m, fm
            racines[j] = 0.5 * (a + b)
        points = racines.copy()
        zerosj[i] = racines[:k]
    return zerosj


def _bessel_normalizers(zeros):
    n, k = zeros.shape
    norm = np.zeros_like(zeros)
    for l in range(n):
        for j in range(k):
            norm[l, j] = 1.0 / math.sqrt(0.5 * _np_sph_jn(l + 1, zeros[l, j]) ** 2)
    return norm


BESSEL_ZEROS = _bessel_zeros(NUM_SPHERICAL, NUM_RADIAL)
BESSEL_INV_ZEROS = 1.0 / BESSEL_ZEROS            # baked-in reciprocals
BESSEL_NORM = _bessel_normalizers(BESSEL_ZEROS)


# ------------------- shared closed-form math (jnp, any shape) --------------
def _sph_jn(l, a, inv_a):
    """Spherical Bessel j_l(a); no divides, uses precomputed inv_a."""
    sa = jnp.sin(a)
    j0 = sa * inv_a
    if l == 0:
        return j0
    ca = jnp.cos(a)
    j1 = (sa * inv_a - ca) * inv_a
    if l == 1:
        return j1
    jm2, jm1 = j0, j1
    for nn in range(2, l + 1):
        jn = float(2 * nn - 1) * inv_a * jm1 - jm2
        jm2, jm1 = jm1, jn
    return jm1


def _rbf_value(l, j, d, inv_d):
    a = float(BESSEL_ZEROS[l, j]) * d
    inv_a = float(BESSEL_INV_ZEROS[l, j]) * inv_d
    return float(BESSEL_NORM[l, j]) * _sph_jn(l, a, inv_a)


def _legendre_tables(cost):
    """Reduced associated Legendre P~_l^m(cos theta) (no (1-z^2)^{m/2} factor).

    Low-order entries stay Python scalars (P[0][0], P[m][m] for the fixed
    NUM_SPHERICAL=3 case) so no ones-like buffers are materialized.
    """
    n = NUM_SPHERICAL
    P = [[None] * (l + 1) for l in range(n)]
    P[0][0] = 1.0
    if n > 1:
        P[1][0] = cost
        for l in range(2, n):
            P[l][0] = (float(2 * l - 1) * cost * P[l - 1][0]
                       - float(l - 1) * P[l - 2][0]) * (1.0 / l)
        for m in range(1, n):
            P[m][m] = float(1 - 2 * m) * P[m - 1][m - 1]   # stays scalar
            if m + 1 < n:
                P[m + 1][m] = float(2 * m + 1) * cost * P[m][m]
            for l in range(m + 2, n):
                P[l][m] = (float(2 * l - 1) * cost * P[l - 1][m]
                           - float(l + m - 1) * P[l - 2][m]) * (1.0 / (l - m))
    return P


def _cs_powers(x, y):
    """C_m + i*S_m = (x + i*y)^m = sin^m(theta) * e^{i m phi}; m >= 1 only."""
    n = NUM_SPHERICAL
    C = [None, x]
    S = [None, y]
    for m in range(2, n):
        S.append(x * S[m - 1] + y * C[m - 1])
        C.append(x * C[m - 1] - y * S[m - 1])
    return C, S


def _sbf_rows(l, P, C, S):
    """Real SH for degree l, ordered [m=0, +1..+l, -l..-1] (DimeNet convention).

    Entries may be Python scalars (l = 0), which fold into the rbf multiply.
    """
    if l == 0:
        return [Y00]
    rows = [None] * (2 * l + 1)
    rows[0] = math.sqrt((2 * l + 1) / (4.0 * math.pi)) * P[l][0]
    for m in range(1, l + 1):
        norm = math.sqrt(2.0 * (2 * l + 1) / (4.0 * math.pi)
                         * math.factorial(l - m) / math.factorial(l + m))
        rows[m] = norm * C[m] * P[l][m]              # +m  (cos(m*phi) term)
        rows[2 * l + 1 - m] = norm * S[m] * P[l][m]  # -m  (sin(m*phi) term)
    return rows


# --------------------------------- kernel ----------------------------------
def torsion_kernel(d_ref, t_ref, p_ref, out_ref):
    # d_ref/t_ref/p_ref: (TR, 128);  out_ref: (36, TR, 128) feature-major.
    d = d_ref[...] * (1.0 / CUTOFF)
    inv_d = 1.0 / d                    # single divide per element (was 12)
    theta = t_ref[...]
    phi = p_ref[...]

    cost = jnp.cos(theta)
    sint = jnp.sin(theta)
    x = sint * jnp.cos(phi)
    y = sint * jnp.sin(phi)

    P = _legendre_tables(cost)
    C, S = _cs_powers(x, y)
    odt = out_ref.dtype

    # Stream each (l, m, j) feature straight into its feature-major output row.
    feat = 0
    for l in range(NUM_SPHERICAL):
        rbf_l = [_rbf_value(l, j, d, inv_d) for j in range(NUM_RADIAL)]
        for sb in _sbf_rows(l, P, C, S):
            for rb in rbf_l:
                out_ref[feat] = (rb * sb).astype(odt)
                feat += 1


# -------------------------------- wrapper ----------------------------------
def torsion_embedding(dist, theta, phi, *, tile_rows=256,
                      out_dtype=jnp.float32, feature_major=False):
    """Matches TorsionEmbedding.forward: returns (N, num_spherical**2*num_radial).

    feature_major=True returns the (36, N) layout instead, skipping the final
    XLA transpose (use when the downstream Linear can contract against it).
    """
    N = dist.shape[0]
    rows = -(-N // 128)                                   # ceil(N / 128)
    rows8 = ((rows + 7) // 8) * 8                         # sublane-aligned rows

    tr = max(8, (min(tile_rows, rows8) // 8) * 8)         # multiple of 8 sublanes
    if rows8 > 8 and rows8 // tr < 2:
        # Keep >= 2 grid steps so the "parallel" axis shards across 2 TCs (v7x).
        tr = max(8, ((rows8 // 2 + 7) // 8) * 8)
    rows_pad = ((rows + tr - 1) // tr) * tr
    n_pad = rows_pad * 128
    pad = n_pad - N

    def _prep(v, fill):
        v = v.astype(jnp.float32)
        if pad:
            v = jnp.pad(v, (0, pad), constant_values=fill)
        return v.reshape(rows_pad, 128)

    # Nonzero dist padding keeps sin(a)/a finite in padded lanes.
    d = _prep(dist, CUTOFF)
    t = _prep(theta, 0.0)
    p = _prep(phi, 0.0)

    lane_spec = pl.BlockSpec((tr, 128), lambda i: (i, 0))
    out = pl.pallas_call(
        torsion_kernel,
        out_shape=jax.ShapeDtypeStruct((NUM_FEATURES, rows_pad, 128), out_dtype),
        grid_spec=pltpu.PrefetchScalarGridSpec(
            num_scalar_prefetch=0,
            grid=(rows_pad // tr,),
            in_specs=[lane_spec, lane_spec, lane_spec],
            out_specs=pl.BlockSpec((NUM_FEATURES, tr, 128), lambda i: (0, i, 0)),
        ),
        compiler_params=pltpu.CompilerParams(
            dimension_semantics=("parallel",),
            vmem_limit_bytes=32 * 1024 * 1024),
    )(d, t, p)

    out = out.reshape(NUM_FEATURES, n_pad)[:, :N]
    if feature_major:
        return out
    # Torch layout (N, 36). Prefer feature_major=True downstream to avoid this
    # extra HBM pass.
    return out.T


# ------------------------ pure-JAX reference (same math) -------------------
def torsion_embedding_ref(dist, theta, phi):
    d = dist.astype(jnp.float32) * (1.0 / CUTOFF)
    inv_d = 1.0 / d
    theta = theta.astype(jnp.float32)
    phi = phi.astype(jnp.float32)
    cost = jnp.cos(theta)
    sint = jnp.sin(theta)
    x = sint * jnp.cos(phi)
    y = sint * jnp.sin(phi)
    P = _legendre_tables(cost)
    C, S = _cs_powers(x, y)
    cols = []
    for l in range(NUM_SPHERICAL):
        rbf_l = [_rbf_value(l, j, d, inv_d) for j in range(NUM_RADIAL)]
        for sb in _sbf_rows(l, P, C, S):
            for rb in rbf_l:
                cols.append(rb * sb)
    return jnp.stack(cols, axis=1)


# ---------------------------------- main -----------------------------------
if __name__ == "__main__":
    key = jax.random.PRNGKey(0)
    # N=1000 exercises padding within a single grid step; N=4096 exercises the
    # multi-step (megacore-splittable) grid path.
    for N in (1000, 4096):
        k1, k2, k3 = jax.random.split(jax.random.fold_in(key, N), 3)
        dist = jax.random.uniform(k1, (N,), jnp.float32, minval=0.5, maxval=CUTOFF)
        theta = jax.random.uniform(k2, (N,), jnp.float32, minval=0.0, maxval=math.pi)
        phi = jax.random.uniform(k3, (N,), jnp.float32, minval=-math.pi, maxval=math.pi)

        out = jax.block_until_ready(torsion_embedding(dist, theta, phi))
        assert out.shape == (N, NUM_FEATURES)
        assert bool(jnp.all(jnp.isfinite(out)))

        ref = torsion_embedding_ref(dist, theta, phi)
        np.testing.assert_allclose(np.asarray(out), np.asarray(ref),
                                   rtol=1e-2, atol=1e-2)

    print("KERNEL_OK")
</pallas_src>

<mosaic_0001>
module attributes {stable_mosaic.version = 11 : i64} {
  func.func @torsion_kernel(%arg0: i32, %arg1: memref<8x128xf32, #tpu.memory_space<vmem>>, %arg2: memref<8x128xf32, #tpu.memory_space<vmem>>, %arg3: memref<8x128xf32, #tpu.memory_space<vmem>>, %arg4: memref<36x8x128xf32, #tpu.memory_space<vmem>>) attributes {dimension_semantics = [#tpu.dimension_semantics<parallel>], iteration_bounds = array<i64: 1>, scalar_prefetch = 0 : i64, scratch_operands = 0 : i64, tpu.core_type = #tpu.core_type<tc>, window_params = [{transform_indices = @transform_0, window_bounds = array<i64: 8, 128>}, {transform_indices = @transform_1, window_bounds = array<i64: 8, 128>}, {transform_indices = @transform_2, window_bounds = array<i64: 8, 128>}, {transform_indices = @transform_3, window_bounds = array<i64: 36, 8, 128>}]} {
    %c0 = arith.constant 0 : index
    %c0_0 = arith.constant 0 : index
    %0 = vector.load %arg1[%c0, %c0_0] : memref<8x128xf32, #tpu.memory_space<vmem>>, vector<8x128xf32>
    %cst = arith.constant 1.250000e-01 : f32
    %1 = vector.broadcast %cst : f32 to vector<8x128xf32>
    %2 = arith.mulf %0, %1 : vector<8x128xf32>
    %cst_1 = arith.constant 1.000000e+00 : f32
    %3 = vector.broadcast %cst_1 : f32 to vector<8x128xf32>
    %4 = arith.divf %3, %2 : vector<8x128xf32>
    %c0_2 = arith.constant 0 : index
    %c0_3 = arith.constant 0 : index
    %5 = vector.load %arg2[%c0_2, %c0_3] : memref<8x128xf32, #tpu.memory_space<vmem>>, vector<8x128xf32>
    %c0_4 = arith.constant 0 : index
    %c0_5 = arith.constant 0 : index
    %6 = vector.load %arg3[%c0_4, %c0_5] : memref<8x128xf32, #tpu.memory_space<vmem>>, vector<8x128xf32>
    %7 = math.cos %5 : vector<8x128xf32>
    %8 = math.sin %5 : vector<8x128xf32>
    %9 = math.cos %6 : vector<8x128xf32>
    %10 = arith.mulf %8, %9 : vector<8x128xf32>
    %11 = math.sin %6 : vector<8x128xf32>
    %12 = arith.mulf %8, %11 : vector<8x128xf32>
    %cst_6 = arith.constant 3.000000e+00 : f32
    %13 = vector.broadcast %cst_6 : f32 to vector<8x128xf32>
    %14 = arith.mulf %13, %7 : vector<8x128xf32>
    %15 = arith.mulf %14, %7 : vector<8x128xf32>
    %cst_7 = arith.constant 1.000000e+00 : f32
    %16 = vector.broadcast %cst_7 : f32 to vector<8x128xf32>
    %17 = arith.subf %15, %16 : vector<8x128xf32>
    %cst_8 = arith.constant 5.000000e-01 : f32
    %18 = vector.broadcast %cst_8 : f32 to vector<8x128xf32>
    %19 = arith.mulf %17, %18 : vector<8x128xf32>
    %cst_9 = arith.constant 3.000000e+00 : f32
    %20 = vector.broadcast %cst_9 : f32 to vector<8x128xf32>
    %21 = arith.mulf %20, %7 : vector<8x128xf32>
    %cst_10 = arith.constant -1.000000e+00 : f32
    %22 = vector.broadcast %cst_10 : f32 to vector<8x128xf32>
    %23 = arith.mulf %21, %22 : vector<8x128xf32>
    %24 = arith.mulf %10, %12 : vector<8x128xf32>
    %25 = arith.mulf %12, %10 : vector<8x128xf32>
    %26 = arith.addf %24, %25 : vector<8x128xf32>
    %27 = arith.mulf %10, %10 : vector<8x128xf32>
    %28 = arith.mulf %12, %12 : vector<8x128xf32>
    %29 = arith.subf %27, %28 : vector<8x128xf32>
    %cst_11 = arith.constant 3.14159274 : f32
    %30 = vector.broadcast %cst_11 : f32 to vector<8x128xf32>
    %31 = arith.mulf %30, %2 : vector<8x128xf32>
    %cst_12 = arith.constant 0.318309873 : f32
    %32 = vector.broadcast %cst_12 : f32 to vector<8x128xf32>
    %33 = arith.mulf %32, %4 : vector<8x128xf32>
    %34 = math.sin %31 : vector<8x128xf32>
    %35 = arith.mulf %34, %33 : vector<8x128xf32>
    %cst_13 = arith.constant 4.44288301 : f32
    %36 = vector.broadcast %cst_13 : f32 to vector<8x128xf32>
    %37 = arith.mulf %36, %35 : vector<8x128xf32>
    %cst_14 = arith.constant 6.28318548 : f32
    %38 = vector.broadcast %cst_14 : f32 to vector<8x128xf32>
    %39 = arith.mulf %38, %2 : vector<8x128xf32>
    %cst_15 = arith.constant 0.159154937 : f32
    %40 = vector.broadcast %cst_15 : f32 to vector<8x128xf32>
    %41 = arith.mulf %40, %4 : vector<8x128xf32>
    %42 = math.sin %39 : vector<8x128xf32>
    %43 = arith.mulf %42, %41 : vector<8x128xf32>
    %cst_16 = arith.constant 8.88576602 : f32
    %44 = vector.broadcast %cst_16 : f32 to vector<8x128xf32>
    %45 = arith.mulf %44, %43 : vector<8x128xf32>
    %cst_17 = arith.constant 9.42477798 : f32
    %46 = vector.broadcast %cst_17 : f32 to vector<8x128xf32>
    %47 = arith.mulf %46, %2 : vector<8x128xf32>
    %cst_18 = arith.constant 0.106103294 : f32
    %48 = vector.broadcast %cst_18 : f32 to vector<8x128xf32>
    %49 = arith.mulf %48, %4 : vector<8x128xf32>
    %50 = math.sin %47 : vector<8x128xf32>
    %51 = arith.mulf %50, %49 : vector<8x128xf32>
    %cst_19 = arith.constant 13.3286486 : f32
    %52 = vector.broadcast %cst_19 : f32 to vector<8x128xf32>
    %53 = arith.mulf %52, %51 : vector<8x128xf32>
    %cst_20 = arith.constant 12.566371 : f32
    %54 = vector.broadcast %cst_20 : f32 to vector<8x128xf32>
    %55 = arith.mulf %54, %2 : vector<8x128xf32>
    %cst_21 = arith.constant 0.0795774683 : f32
    %56 = vector.broadcast %cst_21 : f32 to vector<8x128xf32>
    %57 = arith.mulf %56, %4 : vector<8x128xf32>
    %58 = math.sin %55 : vector<8x128xf32>
    %59 = arith.mulf %58, %57 : vector<8x128xf32>
    %cst_22 = arith.constant 17.7715321 : f32
    %60 = vector.broadcast %cst_22 : f32 to vector<8x128xf32>
    %61 = arith.mulf %60, %59 : vector<8x128xf32>
    %cst_23 = arith.constant 0.282094806 : f32
    %62 = vector.broadcast %cst_23 : f32 to vector<8x128xf32>
    %63 = arith.mulf %37, %62 : vector<8x128xf32>
    %c0_24 = arith.constant 0 : index
    %c0_25 = arith.constant 0 : index
    %c0_26 = arith.constant 0 : index
    %64 = vector.load %arg4[%c0_24, %c0_25, %c0_26] : memref<36x8x128xf32, #tpu.memory_space<vmem>>, vector<1x8x128xf32>
    %65 = vector.shape_cast %64 : vector<1x8x128xf32> to vector<8x128xf32>
    %66 = vector.shape_cast %63 : vector<8x128xf32> to vector<1x8x128xf32>
    tpu.vector_store %arg4[%c0_24, %c0_25, %c0_26], %66 {strides = array<i32>} : memref<36x8x128xf32, #tpu.memory_space<vmem>>, vector<1x8x128xf32>,
    %cst_27 = arith.constant 0.282094806 : f32
    %67 = vector.broadcast %cst_27 : f32 to vector<8x128xf32>
    %68 = arith.mulf %45, %67 : vector<8x128xf32>
    %c1 = arith.constant 1 : index
    %c0_28 = arith.constant 0 : index
    %c0_29 = arith.constant 0 : index
    %69 = vector.load %arg4[%c1, %c0_28, %c0_29] : memref<36x8x128xf32, #tpu.memory_space<vmem>>, vector<1x8x128xf32>
    %70 = vector.shape_cast %69 : vector<1x8x128xf32> to vector<8x128xf32>
    %71 = vector.shape_cast %68 : vector<8x128xf32> to vector<1x8x128xf32>
    tpu.vector_store %arg4[%c1, %c0_28, %c0_29], %71 {strides = array<i32>} : memref<36x8x128xf32, #tpu.memory_space<vmem>>, vector<1x8x128xf32>,
    %cst_30 = arith.constant 0.282094806 : f32
    %72 = vector.broadcast %cst_30 : f32 to vector<8x128xf32>
    %73 = arith.mulf %53, %72 : vector<8x128xf32>
    %c2 = arith.constant 2 : index
    %c0_31 = arith.constant 0 : index
    %c0_32 = arith.constant 0 : index
    %74 = vector.load %arg4[%c2, %c0_31, %c0_32] : memref<36x8x128xf32, #tpu.memory_space<vmem>>, vector<1x8x128xf32>
    %75 = vector.shape_cast %74 : vector<1x8x128xf32> to vector<8x128xf32>
    %76 = vector.shape_cast %73 : vector<8x128xf32> to vector<1x8x128xf32>
    tpu.vector_store %arg4[%c2, %c0_31, %c0_32], %76 {strides = array<i32>} : memref<36x8x128xf32, #tpu.memory_space<vmem>>, vector<1x8x128xf32>,
    %cst_33 = arith.constant 0.282094806 : f32
    %77 = vector.broadcast %cst_33 : f32 to vector<8x128xf32>
    %78 = arith.mulf %61, %77 : vector<8x128xf32>
    %c3 = arith.constant 3 : index
    %c0_34 = arith.constant 0 : index
    %c0_35 = arith.constant 0 : index
    %79 = vector.load %arg4[%c3, %c0_34, %c0_35] : memref<36x8x128xf32, #tpu.memory_space<vmem>>, vector<1x8x128xf32>
    %80 = vector.shape_cast %79 : vector<1x8x128xf32> to vector<8x128xf32>
    %81 = vector.shape_cast %78 : vector<8x128xf32> to vector<1x8x128xf32>
    tpu.vector_store %arg4[%c3, %c0_34, %c0_35], %81 {strides = array<i32>} : memref<36x8x128xf32, #tpu.memory_space<vmem>>, vector<1x8x128xf32>,
    %cst_36 = arith.constant 4.49340963 : f32
    %82 = vector.broadcast %cst_36 : f32 to vector<8x128xf32>
    %83 = arith.mulf %82, %2 : vector<8x128xf32>
    %cst_37 = arith.constant 0.222548157 : f32
    %84 = vector.broadcast %cst_37 : f32 to vector<8x128xf32>
    %85 = arith.mulf %84, %4 : vector<8x128xf32>
    %86 = math.sin %83 : vector<8x128xf32>
    %87 = math.cos %83 : vector<8x128xf32>
    %88 = arith.mulf %86, %85 : vector<8x128xf32>
    %89 = arith.subf %88, %87 : vector<8x128xf32>
    %90 = arith.mulf %89, %85 : vector<8x128xf32>
    %cst_38 = arith.constant 6.51010417 : f32
    %91 = vector.broadcast %cst_38 : f32 to vector<8x128xf32>
    %92 = arith.mulf %91, %90 : vector<8x128xf32>
    %cst_39 = arith.constant 7.72525167 : f32
    %93 = vector.broadcast %cst_39 : f32 to vector<8x128xf32>
    %94 = arith.mulf %93, %2 : vector<8x128xf32>
    %cst_40 = arith.constant 0.129445612 : f32
    %95 = vector.broadcast %cst_40 : f32 to vector<8x128xf32>
    %96 = arith.mulf %95, %4 : vector<8x128xf32>
    %97 = math.sin %94 : vector<8x128xf32>
    %98 = math.cos %94 : vector<8x128xf32>
    %99 = arith.mulf %97, %96 : vector<8x128xf32>
    %100 = arith.subf %99, %98 : vector<8x128xf32>
    %101 = arith.mulf %100, %96 : vector<8x128xf32>
    %cst_41 = arith.constant 11.0163078 : f32
    %102 = vector.broadcast %cst_41 : f32 to vector<8x128xf32>
    %103 = arith.mulf %102, %101 : vector<8x128xf32>
    %cst_42 = arith.constant 10.9041214 : f32
    %104 = vector.broadcast %cst_42 : f32 to vector<8x128xf32>
    %105 = arith.mulf %104, %2 : vector<8x128xf32>
    %cst_43 = arith.constant 0.091708444 : f32
    %106 = vector.broadcast %cst_43 : f32 to vector<8x128xf32>
    %107 = arith.mulf %106, %4 : vector<8x128xf32>
    %108 = math.sin %105 : vector<8x128xf32>
    %109 = math.cos %105 : vector<8x128xf32>
    %110 = arith.mulf %108, %107 : vector<8x128xf32>
    %111 = arith.subf %110, %109 : vector<8x128xf32>
    %112 = arith.mulf %111, %107 : vector<8x128xf32>
    %cst_44 = arith.constant 15.4854689 : f32
    %113 = vector.broadcast %cst_44 : f32 to vector<8x128xf32>
    %114 = arith.mulf %113, %112 : vector<8x128xf32>
    %cst_45 = arith.constant 14.0661936 : f32
    %115 = vector.broadcast %cst_45 : f32 to vector<8x128xf32>
    %116 = arith.mulf %115, %2 : vector<8x128xf32>
    %cst_46 = arith.constant 0.0710924342 : f32
    %117 = vector.broadcast %cst_46 : f32 to vector<8x128xf32>
    %118 = arith.mulf %117, %4 : vector<8x128xf32>
    %119 = math.sin %116 : vector<8x128xf32>
    %120 = math.cos %116 : vector<8x128xf32>
    %121 = arith.mulf %119, %118 : vector<8x128xf32>
    %122 = arith.subf %121, %120 : vector<8x128xf32>
    %123 = arith.mulf %122, %118 : vector<8x128xf32>
    %cst_47 = arith.constant 19.9428082 : f32
    %124 = vector.broadcast %cst_47 : f32 to vector<8x128xf32>
    %125 = arith.mulf %124, %123 : vector<8x128xf32>
    %cst_48 = arith.constant 0.488602519 : f32
    %126 = vector.broadcast %cst_48 : f32 to vector<8x128xf32>
    %127 = arith.mulf %126, %7 : vector<8x128xf32>
    %cst_49 = arith.constant 0.488602519 : f32
    %128 = vector.broadcast %cst_49 : f32 to vector<8x128xf32>
    %129 = arith.mulf %128, %10 : vector<8x128xf32>
    %cst_50 = arith.constant -1.000000e+00 : f32
    %130 = vector.broadcast %cst_50 : f32 to vector<8x128xf32>
    %131 = arith.mulf %129, %130 : vector<8x128xf32>
    %cst_51 = arith.constant 0.488602519 : f32
    %132 = vector.broadcast %cst_51 : f32 to vector<8x128xf32>
    %133 = arith.mulf %132, %12 : vector<8x128xf32>
    %cst_52 = arith.constant -1.000000e+00 : f32
    %134 = vector.broadcast %cst_52 : f32 to vector<8x128xf32>
    %135 = arith.mulf %133, %134 : vector<8x128xf32>
    %136 = arith.mulf %92, %127 : vector<8x128xf32>
    %c4 = arith.constant 4 : index
    %c0_53 = arith.constant 0 : index
    %c0_54 = arith.constant 0 : index
    %137 = vector.load %arg4[%c4, %c0_53, %c0_54] : memref<36x8x128xf32, #tpu.memory_space<vmem>>, vector<1x8x128xf32>
    %138 = vector.shape_cast %137 : vector<1x8x128xf32> to vector<8x128xf32>
    %139 = vector.shape_cast %136 : vector<8x128xf32> to vector<1x8x128xf32>
    tpu.vector_store %arg4[%c4, %c0_53, %c0_54], %139 {strides = array<i32>} : memref<36x8x128xf32, #tpu.memory_space<vmem>>, vector<1x8x128xf32>,
    %140 = arith.mulf %103, %127 : vector<8x128xf32>
    %c5 = arith.constant 5 : index
    %c0_55 = arith.constant 0 : index
    %c0_56 = arith.constant 0 : index
    %141 = vector.load %arg4[%c5, %c0_55, %c0_56] : memref<36x8x128xf32, #tpu.memory_space<vmem>>, vector<1x8x128xf32>
    %142 = vector.shape_cast %141 : vector<1x8x128xf32> to vector<8x128xf32>
    %143 = vector.shape_cast %140 : vector<8x128xf32> to vector<1x8x128xf32>
    tpu.vector_store %arg4[%c5, %c0_55, %c0_56], %143 {strides = array<i32>} : memref<36x8x128xf32, #tpu.memory_space<vmem>>, vector<1x8x128xf32>,
    %144 = arith.mulf %114, %127 : vector<8x128xf32>
    %c6 = arith.constant 6 : index
    %c0_57 = arith.constant 0 : index
    %c0_58 = arith.constant 0 : index
    %145 = vector.load %arg4[%c6, %c0_57, %c0_58] : memref<36x8x128xf32, #tpu.memory_space<vmem>>, vector<1x8x128xf32>
    %146 = vector.shape_cast %145 : vector<1x8x128xf32> to vector<8x128xf32>
    %147 = vector.shape_cast %144 : vector<8x128xf32> to vector<1x8x128xf32>
    tpu.vector_store %arg4[%c6, %c0_57, %c0_58], %147 {strides = array<i32>} : memref<36x8x128xf32, #tpu.memory_space<vmem>>, vector<1x8x128xf32>,
    %148 = arith.mulf %125, %127 : vector<8x128xf32>
    %c7 = arith.constant 7 : index
    %c0_59 = arith.constant 0 : index
    %c0_60 = arith.constant 0 : index
    %149 = vector.load %arg4[%c7, %c0_59, %c0_60] : memref<36x8x128xf32, #tpu.memory_space<vmem>>, vector<1x8x128xf32>
    %150 = vector.shape_cast %149 : vector<1x8x128xf32> to vector<8x128xf32>
    %151 = vector.shape_cast %148 : vector<8x128xf32> to vector<1x8x128xf32>
    tpu.vector_store %arg4[%c7, %c0_59, %c0_60], %151 {strides = array<i32>} : memref<36x8x128xf32, #tpu.memory_space<vmem>>, vector<1x8x128xf32>,
    %152 = arith.mulf %92, %131 : vector<8x128xf32>
    %c8 = arith.constant 8 : index
    %c0_61 = arith.constant 0 : index
    %c0_62 = arith.constant 0 : index
    %153 = vector.load %arg4[%c8, %c0_61, %c0_62] : memref<36x8x128xf32, #tpu.memory_space<vmem>>, vector<1x8x128xf32>
    %154 = vector.shape_cast %153 : vector<1x8x128xf32> to vector<8x128xf32>
    %155 = vector.shape_cast %152 : vector<8x128xf32> to vector<1x8x128xf32>
    tpu.vector_store %arg4[%c8, %c0_61, %c0_62], %155 {strides = array<i32>} : memref<36x8x128xf32, #tpu.memory_space<vmem>>, vector<1x8x128xf32>,
    %156 = arith.mulf %103, %131 : vector<8x128xf32>
    %c9 = arith.constant 9 : index
    %c0_63 = arith.constant 0 : index
    %c0_64 = arith.constant 0 : index
    %157 = vector.load %arg4[%c9, %c0_63, %c0_64] : memref<36x8x128xf32, #tpu.memory_space<vmem>>, vector<1x8x128xf32>
    %158 = vector.shape_cast %157 : vector<1x8x128xf32> to vector<8x128xf32>
    %159 = vector.shape_cast %156 : vector<8x128xf32> to vector<1x8x128xf32>
    tpu.vector_store %arg4[%c9, %c0_63, %c0_64], %159 {strides = array<i32>} : memref<36x8x128xf32, #tpu.memory_space<vmem>>, vector<1x8x128xf32>,
    %160 = arith.mulf %114, %131 : vector<8x128xf32>
    %c10 = arith.constant 10 : index
    %c0_65 = arith.constant 0 : index
    %c0_66 = arith.constant 0 : index
    %161 = vector.load %arg4[%c10, %c0_65, %c0_66] : memref<36x8x128xf32, #tpu.memory_space<vmem>>, vector<1x8x128xf32>
    %162 = vector.shape_cast %161 : vector<1x8x128xf32> to vector<8x128xf32>
    %163 = vector.shape_cast %160 : vector<8x128xf32> to vector<1x8x128xf32>
    tpu.vector_store %arg4[%c10, %c0_65, %c0_66], %163 {strides = array<i32>} : memref<36x8x128xf32, #tpu.memory_space<vmem>>, vector<1x8x128xf32>,
    %164 = arith.mulf %125, %131 : vector<8x128xf32>
    %c11 = arith.constant 11 : index
    %c0_67 = arith.constant 0 : index
    %c0_68 = arith.constant 0 : index
    %165 = vector.load %arg4[%c11, %c0_67, %c0_68] : memref<36x8x128xf32, #tpu.memory_space<vmem>>, vector<1x8x128xf32>
    %166 = vector.shape_cast %165 : vector<1x8x128xf32> to vector<8x128xf32>
    %167 = vector.shape_cast %164 : vector<8x128xf32> to vector<1x8x128xf32>
    tpu.vector_store %arg4[%c11, %c0_67, %c0_68], %167 {strides = array<i32>} : memref<36x8x128xf32, #tpu.memory_space<vmem>>, vector<1x8x128xf32>,
    %168 = arith.mulf %92, %135 : vector<8x128xf32>
    %c12 = arith.constant 12 : index
    %c0_69 = arith.constant 0 : index
    %c0_70 = arith.constant 0 : index
    %169 = vector.load %arg4[%c12, %c0_69, %c0_70] : memref<36x8x128xf32, #tpu.memory_space<vmem>>, vector<1x8x128xf32>
    %170 = vector.shape_cast %169 : vector<1x8x128xf32> to vector<8x128xf32>
    %171 = vector.shape_cast %168 : vector<8x128xf32> to vector<1x8x128xf32>
    tpu.vector_store %arg4[%c12, %c0_69, %c0_70], %171 {strides = array<i32>} : memref<36x8x128xf32, #tpu.memory_space<vmem>>, vector<1x8x128xf32>,
    %172 = arith.mulf %103, %135 : vector<8x128xf32>
    %c13 = arith.constant 13 : index
    %c0_71 = arith.constant 0 : index
    %c0_72 = arith.constant 0 : index
    %173 = vector.load %arg4[%c13, %c0_71, %c0_72] : memref<36x8x128xf32, #tpu.memory_space<vmem>>, vector<1x8x128xf32>
    %174 = vector.shape_cast %173 : vector<1x8x128xf32> to vector<8x128xf32>
    %175 = vector.shape_cast %172 : vector<8x128xf32> to vector<1x8x128xf32>
    tpu.vector_store %arg4[%c13, %c0_71, %c0_72], %175 {strides = array<i32>} : memref<36x8x128xf32, #tpu.memory_space<vmem>>, vector<1x8x128xf32>,
    %176 = arith.mulf %114, %135 : vector<8x128xf32>
    %c14 = arith.constant 14 : index
    %c0_73 = arith.constant 0 : index
    %c0_74 = arith.constant 0 : index
    %177 = vector.load %arg4[%c14, %c0_73, %c0_74] : memref<36x8x128xf32, #tpu.memory_space<vmem>>, vector<1x8x128xf32>
    %178 = vector.shape_cast %177 : vector<1x8x128xf32> to vector<8x128xf32>
    %179 = vector.shape_cast %176 : vector<8x128xf32> to vector<1x8x128xf32>
    tpu.vector_store %arg4[%c14, %c0_73, %c0_74], %179 {strides = array<i32>} : memref<36x8x128xf32, #tpu.memory_space<vmem>>, vector<1x8x128xf32>,
    %180 = arith.mulf %125, %135 : vector<8x128xf32>
    %c15 = arith.constant 15 : index
    %c0_75 = arith.constant 0 : index
    %c0_76 = arith.constant 0 : index
    %181 = vector.load %arg4[%c15, %c0_75, %c0_76] : memref<36x8x128xf32, #tpu.memory_space<vmem>>, vector<1x8x128xf32>
    %182 = vector.shape_cast %181 : vector<1x8x128xf32> to vector<8x128xf32>
    %183 = vector.shape_cast %180 : vector<8x128xf32> to vector<1x8x128xf32>
    tpu.vector_store %arg4[%c15, %c0_75, %c0_76], %183 {strides = array<i32>} : memref<36x8x128xf32, #tpu.memory_space<vmem>>, vector<1x8x128xf32>,
    %cst_77 = arith.constant 5.76345921 : f32
    %184 = vector.broadcast %cst_77 : f32 to vector<8x128xf32>
    %185 = arith.mulf %184, %2 : vector<8x128xf32>
    %cst_78 = arith.constant 0.173506916 : f32
    %186 = vector.broadcast %cst_78 : f32 to vector<8x128xf32>
    %187 = arith.mulf %186, %4 : vector<8x128xf32>
    %188 = math.sin %185 : vector<8x128xf32>
    %189 = arith.mulf %188, %187 : vector<8x128xf32>
    %190 = math.cos %185 : vector<8x128xf32>
    %191 = arith.mulf %188, %187 : vector<8x128xf32>
    %192 = arith.subf %191, %190 : vector<8x128xf32>
    %193 = arith.mulf %192, %187 : vector<8x128xf32>
    %cst_79 = arith.constant 3.000000e+00 : f32
    %194 = vector.broadcast %cst_79 : f32 to vector<8x128xf32>
    %195 = arith.mulf %194, %187 : vector<8x128xf32>
    %196 = arith.mulf %195, %193 : vector<8x128xf32>
    %197 = arith.subf %196, %189 : vector<8x128xf32>
    %cst_80 = arith.constant 8.5426464 : f32
    %198 = vector.broadcast %cst_80 : f32 to vector<8x128xf32>
    %199 = arith.mulf %198, %197 : vector<8x128xf32>
    %cst_81 = arith.constant 9.09501171 : f32
    %200 = vector.broadcast %cst_81 : f32 to vector<8x128xf32>
    %201 = arith.mulf %200, %2 : vector<8x128xf32>
    %cst_82 = arith.constant 0.109950386 : f32
    %202 = vector.broadcast %cst_82 : f32 to vector<8x128xf32>
    %203 = arith.mulf %202, %4 : vector<8x128xf32>
    %204 = math.sin %201 : vector<8x128xf32>
    %205 = arith.mulf %204, %203 : vector<8x128xf32>
    %206 = math.cos %201 : vector<8x128xf32>
    %207 = arith.mulf %204, %203 : vector<8x128xf32>
    %208 = arith.subf %207, %206 : vector<8x128xf32>
    %209 = arith.mulf %208, %203 : vector<8x128xf32>
    %cst_83 = arith.constant 3.000000e+00 : f32
    %210 = vector.broadcast %cst_83 : f32 to vector<8x128xf32>
    %211 = arith.mulf %210, %203 : vector<8x128xf32>
    %212 = arith.mulf %211, %209 : vector<8x128xf32>
    %213 = arith.subf %212, %205 : vector<8x128xf32>
    %cst_84 = arith.constant 13.101758 : f32
    %214 = vector.broadcast %cst_84 : f32 to vector<8x128xf32>
    %215 = arith.mulf %214, %213 : vector<8x128xf32>
    %cst_85 = arith.constant 12.3229408 : f32
    %216 = vector.broadcast %cst_85 : f32 to vector<8x128xf32>
    %217 = arith.mulf %216, %2 : vector<8x128xf32>
    %cst_86 = arith.constant 0.0811494589 : f32
    %218 = vector.broadcast %cst_86 : f32 to vector<8x128xf32>
    %219 = arith.mulf %218, %4 : vector<8x128xf32>
    %220 = math.sin %217 : vector<8x128xf32>
    %221 = arith.mulf %220, %219 : vector<8x128xf32>
    %222 = math.cos %217 : vector<8x128xf32>
    %223 = arith.mulf %220, %219 : vector<8x128xf32>
    %224 = arith.subf %223, %222 : vector<8x128xf32>
    %225 = arith.mulf %224, %219 : vector<8x128xf32>
    %cst_87 = arith.constant 3.000000e+00 : f32
    %226 = vector.broadcast %cst_87 : f32 to vector<8x128xf32>
    %227 = arith.mulf %226, %219 : vector<8x128xf32>
    %228 = arith.mulf %227, %225 : vector<8x128xf32>
    %229 = arith.subf %228, %221 : vector<8x128xf32>
    %cst_88 = arith.constant 17.6019402 : f32
    %230 = vector.broadcast %cst_88 : f32 to vector<8x128xf32>
    %231 = arith.mulf %230, %229 : vector<8x128xf32>
    %cst_89 = arith.constant 15.5146027 : f32
    %232 = vector.broadcast %cst_89 : f32 to vector<8x128xf32>
    %233 = arith.mulf %232, %2 : vector<8x128xf32>
    %cst_90 = arith.constant 0.0644554049 : f32
    %234 = vector.broadcast %cst_90 : f32 to vector<8x128xf32>
    %235 = arith.mulf %234, %4 : vector<8x128xf32>
    %236 = math.sin %233 : vector<8x128xf32>
    %237 = arith.mulf %236, %235 : vector<8x128xf32>
    %238 = math.cos %233 : vector<8x128xf32>
    %239 = arith.mulf %236, %235 : vector<8x128xf32>
    %240 = arith.subf %239, %238 : vector<8x128xf32>
    %241 = arith.mulf %240, %235 : vector<8x128xf32>
    %cst_91 = arith.constant 3.000000e+00 : f32
    %242 = vector.broadcast %cst_91 : f32 to vector<8x128xf32>
    %243 = arith.mulf %242, %235 : vector<8x128xf32>
    %244 = arith.mulf %243, %241 : vector<8x128xf32>
    %245 = arith.subf %244, %237 : vector<8x128xf32>
    %cst_92 = arith.constant 22.0789623 : f32
    %246 = vector.broadcast %cst_92 : f32 to vector<8x128xf32>
    %247 = arith.mulf %246, %245 : vector<8x128xf32>
    %cst_93 = arith.constant 0.63078314 : f32
    %248 = vector.broadcast %cst_93 : f32 to vector<8x128xf32>
    %249 = arith.mulf %248, %19 : vector<8x128xf32>
    %cst_94 = arith.constant 0.3641828 : f32
    %250 = vector.broadcast %cst_94 : f32 to vector<8x128xf32>
    %251 = arith.mulf %250, %10 : vector<8x128xf32>
    %252 = arith.mulf %251, %23 : vector<8x128xf32>
    %cst_95 = arith.constant 0.3641828 : f32
    %253 = vector.broadcast %cst_95 : f32 to vector<8x128xf32>
    %254 = arith.mulf %253, %12 : vector<8x128xf32>
    %255 = arith.mulf %254, %23 : vector<8x128xf32>
    %cst_96 = arith.constant 0.1820914 : f32
    %256 = vector.broadcast %cst_96 : f32 to vector<8x128xf32>
    %257 = arith.mulf %256, %29 : vector<8x128xf32>
    %cst_97 = arith.constant 3.000000e+00 : f32
    %258 = vector.broadcast %cst_97 : f32 to vector<8x128xf32>
    %259 = arith.mulf %257, %258 : vector<8x128xf32>
    %cst_98 = arith.constant 0.1820914 : f32
    %260 = vector.broadcast %cst_98 : f32 to vector<8x128xf32>
    %261 = arith.mulf %260, %26 : vector<8x128xf32>
    %cst_99 = arith.constant 3.000000e+00 : f32
    %262 = vector.broadcast %cst_99 : f32 to vector<8x128xf32>
    %263 = arith.mulf %261, %262 : vector<8x128xf32>
    %264 = arith.mulf %199, %249 : vector<8x128xf32>
    %c16 = arith.constant 16 : index
    %c0_100 = arith.constant 0 : index
    %c0_101 = arith.constant 0 : index
    %265 = vector.load %arg4[%c16, %c0_100, %c0_101] : memref<36x8x128xf32, #tpu.memory_space<vmem>>, vector<1x8x128xf32>
    %266 = vector.shape_cast %265 : vector<1x8x128xf32> to vector<8x128xf32>
    %267 = vector.shape_cast %264 : vector<8x128xf32> to vector<1x8x128xf32>
    tpu.vector_store %arg4[%c16, %c0_100, %c0_101], %267 {strides = array<i32>} : memref<36x8x128xf32, #tpu.memory_space<vmem>>, vector<1x8x128xf32>,
    %268 = arith.mulf %215, %249 : vector<8x128xf32>
    %c17 = arith.constant 17 : index
    %c0_102 = arith.constant 0 : index
    %c0_103 = arith.constant 0 : index
    %269 = vector.load %arg4[%c17, %c0_102, %c0_103] : memref<36x8x128xf32, #tpu.memory_space<vmem>>, vector<1x8x128xf32>
    %270 = vector.shape_cast %269 : vector<1x8x128xf32> to vector<8x128xf32>
    %271 = vector.shape_cast %268 : vector<8x128xf32> to vector<1x8x128xf32>
    tpu.vector_store %arg4[%c17, %c0_102, %c0_103], %271 {strides = array<i32>} : memref<36x8x128xf32, #tpu.memory_space<vmem>>, vector<1x8x128xf32>,
    %272 = arith.mulf %231, %249 : vector<8x128xf32>
    %c18 = arith.constant 18 : index
    %c0_104 = arith.constant 0 : index
    %c0_105 = arith.constant 0 : index
    %273 = vector.load %arg4[%c18, %c0_104, %c0_105] : memref<36x8x128xf32, #tpu.memory_space<vmem>>, vector<1x8x128xf32>
    %274 = vector.shape_cast %273 : vector<1x8x128xf32> to vector<8x128xf32>
    %275 = vector.shape_cast %272 : vector<8x128xf32> to vector<1x8x128xf32>
    tpu.vector_store %arg4[%c18, %c0_104, %c0_105], %275 {strides = array<i32>} : memref<36x8x128xf32, #tpu.memory_space<vmem>>, vector<1x8x128xf32>,
    %276 = arith.mulf %247, %249 : vector<8x128xf32>
    %c19 = arith.constant 19 : index
    %c0_106 = arith.constant 0 : index
    %c0_107 = arith.constant 0 : index
    %277 = vector.load %arg4[%c19, %c0_106, %c0_107] : memref<36x8x128xf32, #tpu.memory_space<vmem>>, vector<1x8x128xf32>
    %278 = vector.shape_cast %277 : vector<1x8x128xf32> to vector<8x128xf32>
    %279 = vector.shape_cast %276 : vector<8x128xf32> to vector<1x8x128xf32>
    tpu.vector_store %arg4[%c19, %c0_106, %c0_107], %279 {strides = array<i32>} : memref<36x8x128xf32, #tpu.memory_space<vmem>>, vector<1x8x128xf32>,
    %280 = arith.mulf %199, %252 : vector<8x128xf32>
    %c20 = arith.constant 20 : index
    %c0_108 = arith.constant 0 : index
    %c0_109 = arith.constant 0 : index
    %281 = vector.load %arg4[%c20, %c0_108, %c0_109] : memref<36x8x128xf32, #tpu.memory_space<vmem>>, vector<1x8x128xf32>
    %282 = vector.shape_cast %281 : vector<1x8x128xf32> to vector<8x128xf32>
    %283 = vector.shape_cast %280 : vector<8x128xf32> to vector<1x8x128xf32>
    tpu.vector_store %arg4[%c20, %c0_108, %c0_109], %283 {strides = array<i32>} : memref<36x8x128xf32, #tpu.memory_space<vmem>>, vector<1x8x128xf32>,
    %284 = arith.mulf %215, %252 : vector<8x128xf32>
    %c21 = arith.constant 21 : index
    %c0_110 = arith.constant 0 : index
    %c0_111 = arith.constant 0 : index
    %285 = vector.load %arg4[%c21, %c0_110, %c0_111] : memref<36x8x128xf32, #tpu.memory_space<vmem>>, vector<1x8x128xf32>
    %286 = vector.shape_cast %285 : vector<1x8x128xf32> to vector<8x128xf32>
    %287 = vector.shape_cast %284 : vector<8x128xf32> to vector<1x8x128xf32>
    tpu.vector_store %arg4[%c21, %c0_110, %c0_111], %287 {strides = array<i32>} : memref<36x8x128xf32, #tpu.memory_space<vmem>>, vector<1x8x128xf32>,
    %288 = arith.mulf %231, %252 : vector<8x128xf32>
    %c22 = arith.constant 22 : index
    %c0_112 = arith.constant 0 : index
    %c0_113 = arith.constant 0 : index
    %289 = vector.load %arg4[%c22, %c0_112, %c0_113] : memref<36x8x128xf32, #tpu.memory_space<vmem>>, vector<1x8x128xf32>
    %290 = vector.shape_cast %289 : vector<1x8x128xf32> to vector<8x128xf32>
    %291 = vector.shape_cast %288 : vector<8x128xf32> to vector<1x8x128xf32>
    tpu.vector_store %arg4[%c22, %c0_112, %c0_113], %291 {strides = array<i32>} : memref<36x8x128xf32, #tpu.memory_space<vmem>>, vector<1x8x128xf32>,
    %292 = arith.mulf %247, %252 : vector<8x128xf32>
    %c23 = arith.constant 23 : index
    %c0_114 = arith.constant 0 : index
    %c0_115 = arith.constant 0 : index
    %293 = vector.load %arg4[%c23, %c0_114, %c0_115] : memref<36x8x128xf32, #tpu.memory_space<vmem>>, vector<1x8x128xf32>
    %294 = vector.shape_cast %293 : vector<1x8x128xf32> to vector<8x128xf32>
    %295 = vector.shape_cast %292 : vector<8x128xf32> to vector<1x8x128xf32>
    tpu.vector_store %arg4[%c23, %c0_114, %c0_115], %295 {strides = array<i32>} : memref<36x8x128xf32, #tpu.memory_space<vmem>>, vector<1x8x128xf32>,
    %296 = arith.mulf %199, %259 : vector<8x128xf32>
    %c24 = arith.constant 24 : index
    %c0_116 = arith.constant 0 : index
    %c0_117 = arith.constant 0 : index
    %297 = vector.load %arg4[%c24, %c0_116, %c0_117] : memref<36x8x128xf32, #tpu.memory_space<vmem>>, vector<1x8x128xf32>
    %298 = vector.shape_cast %297 : vector<1x8x128xf32> to vector<8x128xf32>
    %299 = vector.shape_cast %296 : vector<8x128xf32> to vector<1x8x128xf32>
    tpu.vector_store %arg4[%c24, %c0_116, %c0_117], %299 {strides = array<i32>} : memref<36x8x128xf32, #tpu.memory_space<vmem>>, vector<1x8x128xf32>,
    %300 = arith.mulf %215, %259 : vector<8x128xf32>
    %c25 = arith.constant 25 : index
    %c0_118 = arith.constant 0 : index
    %c0_119 = arith.constant 0 : index
    %301 = vector.load %arg4[%c25, %c0_118, %c0_119] : memref<36x8x128xf32, #tpu.memory_space<vmem>>, vector<1x8x128xf32>
    %302 = vector.shape_cast %301 : vector<1x8x128xf32> to vector<8x128xf32>
    %303 = vector.shape_cast %300 : vector<8x128xf32> to vector<1x8x128xf32>
    tpu.vector_store %arg4[%c25, %c0_118, %c0_119], %303 {strides = array<i32>} : memref<36x8x128xf32, #tpu.memory_space<vmem>>, vector<1x8x128xf32>,
    %304 = arith.mulf %231, %259 : vector<8x128xf32>
    %c26 = arith.constant 26 : index
    %c0_120 = arith.constant 0 : index
    %c0_121 = arith.constant 0 : index
    %305 = vector.load %arg4[%c26, %c0_120, %c0_121] : memref<36x8x128xf32, #tpu.memory_space<vmem>>, vector<1x8x128xf32>
    %306 = vector.shape_cast %305 : vector<1x8x128xf32> to vector<8x128xf32>
    %307 = vector.shape_cast %304 : vector<8x128xf32> to vector<1x8x128xf32>
    tpu.vector_store %arg4[%c26, %c0_120, %c0_121], %307 {strides = array<i32>} : memref<36x8x128xf32, #tpu.memory_space<vmem>>, vector<1x8x128xf32>,
    %308 = arith.mulf %247, %259 : vector<8x128xf32>
    %c27 = arith.constant 27 : index
    %c0_122 = arith.constant 0 : index
    %c0_123 = arith.constant 0 : index
    %309 = vector.load %arg4[%c27, %c0_122, %c0_123] : memref<36x8x128xf32, #tpu.memory_space<vmem>>, vector<1x8x128xf32>
    %310 = vector.shape_cast %309 : vector<1x8x128xf32> to vector<8x128xf32>
    %311 = vector.shape_cast %308 : vector<8x128xf32> to vector<1x8x128xf32>
    tpu.vector_store %arg4[%c27, %c0_122, %c0_123], %311 {strides = array<i32>} : memref<36x8x128xf32, #tpu.memory_space<vmem>>, vector<1x8x128xf32>,
    %312 = arith.mulf %199, %263 : vector<8x128xf32>
    %c28 = arith.constant 28 : index
    %c0_124 = arith.constant 0 : index
    %c0_125 = arith.constant 0 : index
    %313 = vector.load %arg4[%c28, %c0_124, %c0_125] : memref<36x8x128xf32, #tpu.memory_space<vmem>>, vector<1x8x128xf32>
    %314 = vector.shape_cast %313 : vector<1x8x128xf32> to vector<8x128xf32>
    %315 = vector.shape_cast %312 : vector<8x128xf32> to vector<1x8x128xf32>
    tpu.vector_store %arg4[%c28, %c0_124, %c0_125], %315 {strides = array<i32>} : memref<36x8x128xf32, #tpu.memory_space<vmem>>, vector<1x8x128xf32>,
    %316 = arith.mulf %215, %263 : vector<8x128xf32>
    %c29 = arith.constant 29 : index
    %c0_126 = arith.constant 0 : index
    %c0_127 = arith.constant 0 : index
    %317 = vector.load %arg4[%c29, %c0_126, %c0_127] : memref<36x8x128xf32, #tpu.memory_space<vmem>>, vector<1x8x128xf32>
    %318 = vector.shape_cast %317 : vector<1x8x128xf32> to vector<8x128xf32>
    %319 = vector.shape_cast %316 : vector<8x128xf32> to vector<1x8x128xf32>
    tpu.vector_store %arg4[%c29, %c0_126, %c0_127], %319 {strides = array<i32>} : memref<36x8x128xf32, #tpu.memory_space<vmem>>, vector<1x8x128xf32>,
    %320 = arith.mulf %231, %263 : vector<8x128xf32>
    %c30 = arith.constant 30 : index
    %c0_128 = arith.constant 0 : index
    %c0_129 = arith.constant 0 : index
    %321 = vector.load %arg4[%c30, %c0_128, %c0_129] : memref<36x8x128xf32, #tpu.memory_space<vmem>>, vector<1x8x128xf32>
    %322 = vector.shape_cast %321 : vector<1x8x128xf32> to vector<8x128xf32>
    %323 = vector.shape_cast %320 : vector<8x128xf32> to vector<1x8x128xf32>
    tpu.vector_store %arg4[%c30, %c0_128, %c0_129], %323 {strides = array<i32>} : memref<36x8x128xf32, #tpu.memory_space<vmem>>, vector<1x8x128xf32>,
    %324 = arith.mulf %247, %263 : vector<8x128xf32>
    %c31 = arith.constant 31 : index
    %c0_130 = arith.constant 0 : index
    %c0_131 = arith.constant 0 : index
    %325 = vector.load %arg4[%c31, %c0_130, %c0_131] : memref<36x8x128xf32, #tpu.memory_space<vmem>>, vector<1x8x128xf32>
    %326 = vector.shape_cast %325 : vector<1x8x128xf32> to vector<8x128xf32>
    %327 = vector.shape_cast %324 : vector<8x128xf32> to vector<1x8x128xf32>
    tpu.vector_store %arg4[%c31, %c0_130, %c0_131], %327 {strides = array<i32>} : memref<36x8x128xf32, #tpu.memory_space<vmem>>, vector<1x8x128xf32>,
    %328 = arith.mulf %199, %255 : vector<8x128xf32>
    %c32 = arith.constant 32 : index
    %c0_132 = arith.constant 0 : index
    %c0_133 = arith.constant 0 : index
    %329 = vector.load %arg4[%c32, %c0_132, %c0_133] : memref<36x8x128xf32, #tpu.memory_space<vmem>>, vector<1x8x128xf32>
    %330 = vector.shape_cast %329 : vector<1x8x128xf32> to vector<8x128xf32>
    %331 = vector.shape_cast %328 : vector<8x128xf32> to vector<1x8x128xf32>
    tpu.vector_store %arg4[%c32, %c0_132, %c0_133], %331 {strides = array<i32>} : memref<36x8x128xf32, #tpu.memory_space<vmem>>, vector<1x8x128xf32>,
    %332 = arith.mulf %215, %255 : vector<8x128xf32>
    %c33 = arith.constant 33 : index
    %c0_134 = arith.constant 0 : index
    %c0_135 = arith.constant 0 : index
    %333 = vector.load %arg4[%c33, %c0_134, %c0_135] : memref<36x8x128xf32, #tpu.memory_space<vmem>>, vector<1x8x128xf32>
    %334 = vector.shape_cast %333 : vector<1x8x128xf32> to vector<8x128xf32>
    %335 = vector.shape_cast %332 : vector<8x128xf32> to vector<1x8x128xf32>
    tpu.vector_store %arg4[%c33, %c0_134, %c0_135], %335 {strides = array<i32>} : memref<36x8x128xf32, #tpu.memory_space<vmem>>, vector<1x8x128xf32>,
    %336 = arith.mulf %231, %255 : vector<8x128xf32>
    %c34 = arith.constant 34 : index
    %c0_136 = arith.constant 0 : index
    %c0_137 = arith.constant 0 : index
    %337 = vector.load %arg4[%c34, %c0_136, %c0_137] : memref<36x8x128xf32, #tpu.memory_space<vmem>>, vector<1x8x128xf32>
    %338 = vector.shape_cast %337 : vector<1x8x128xf32> to vector<8x128xf32>
    %339 = vector.shape_cast %336 : vector<8x128xf32> to vector<1x8x128xf32>
    tpu.vector_store %arg4[%c34, %c0_136, %c0_137], %339 {strides = array<i32>} : memref<36x8x128xf32, #tpu.memory_space<vmem>>, vector<1x8x128xf32>,
    %340 = arith.mulf %247, %255 : vector<8x128xf32>
    %c35 = arith.constant 35 : index
    %c0_138 = arith.constant 0 : index
    %c0_139 = arith.constant 0 : index
    %341 = vector.load %arg4[%c35, %c0_138, %c0_139] : memref<36x8x128xf32, #tpu.memory_space<vmem>>, vector<1x8x128xf32>
    %342 = vector.shape_cast %341 : vector<1x8x128xf32> to vector<8x128xf32>
    %343 = vector.shape_cast %340 : vector<8x128xf32> to vector<1x8x128xf32>
    tpu.vector_store %arg4[%c35, %c0_138, %c0_139], %343 {strides = array<i32>} : memref<36x8x128xf32, #tpu.memory_space<vmem>>, vector<1x8x128xf32>,
    return
  }
  func.func @transform_0(%arg0: i32) -> (i32, i32) {
    %c0_i32 = arith.constant 0 : i32
    %c0_i32_0 = arith.constant 0 : i32
    return %arg0, %c0_i32 : i32, i32
  }
  func.func @transform_1(%arg0: i32) -> (i32, i32) {
    %c0_i32 = arith.constant 0 : i32
    %c0_i32_0 = arith.constant 0 : i32
    return %arg0, %c0_i32 : i32, i32
  }
  func.func @transform_2(%arg0: i32) -> (i32, i32) {
    %c0_i32 = arith.constant 0 : i32
    %c0_i32_0 = arith.constant 0 : i32
    return %arg0, %c0_i32 : i32, i32
  }
  func.func @transform_3(%arg0: i32) -> (i32, i32, i32) {
    %c0_i32 = arith.constant 0 : i32
    %c0_i32_0 = arith.constant 0 : i32
    %c0_i32_1 = arith.constant 0 : i32
    return %c0_i32, %arg0, %c0_i32_0 : i32, i32, i32
  }
}

</mosaic_0001>

<bundles_post_ra>
// kernel: tpu_custom_call.1
= control target key start
LH: loop header
LB: loop body
LE: loop exit
PB: predicated region body
PF: predicated region fallthrough
CT: control target
= control target key end

     0   :  { %8 = vsyncpa [#allocation3], 0  ;;  %s4614_s0 = inlined_call_operand.hbm [shape: f32[8,128], index: 0, kind: input, shape index: {}]   ;;  %s4615_s1 = inlined_call_operand.hbm [shape: f32[8,128], index: 1, kind: input, shape index: {}]   ;;  %s4616_s2 = inlined_call_operand.hbm [shape: f32[8,128], index: 2, kind: input, shape index: {}]   ;;  %s4617_s3 = inlined_call_operand.hbm [shape: f32[36,8,128], index: 3, kind: output, shape index: {}]  }
   0x1   :  { %9 = vsyncpa [#allocation6], 0 }
   0x2   :  { %10 = vsyncpa [#allocation4], 0  ;;  %s3080_s12 = smov [#allocation5]   ;;  %s3081_s14 = smov [#allocation2]  }
   0x3   :  { %s27_s13 = sshll.u32 %s3080_s12, 4  ;;  %s17_s15 = sshll.u32 %s3081_s14, 4  ;;  %s28_s13 = int_to_ptr.vmem [resolvable:$true] %s27_s13  ;;  %s18_s15 = int_to_ptr.vmem [resolvable:$true] %s17_s15 }
   0x4   :  { %s3002_s16 = scalar_lea.vmem %s28_s13, 128  ;;  %p3007_p1 = scmp.lt.s32.totalorder %s28_s13, %s28_s13 }
   0x5   :  { %p3003_p0 = scmp.ne.s32.totalorder %s28_s13, %s3002_s16  ;;  %p3008_p2 = scmp.lt.s32.totalorder %s3002_s16, %s3002_s16 }
   0x7   :  { %p3009_p3 = por %p3008_p2, %p3007_p1 }
   0x9   :  { %p3010_p4 = pnand %p3009_p3, %p3003_p0 }
   0xb   :  { %3013 = shalt.err (!%p3010_p4)
}
   0xc   :  { %30 = dma.hbm_to_vmem [thread:$0]  %s4615_s1, 128, %s28_s13, [#allocation6]  }
   0xd   :  { %s3022_s19 = scalar_lea.vmem %s18_s15, 128  ;;  %p3027_p6 = scmp.lt.s32.totalorder %s18_s15, %s18_s15 }
   0xe   :  { %p3023_p5 = scmp.ne.s32.totalorder %s18_s15, %s3022_s19  ;;  %p3028_p7 = scmp.lt.s32.totalorder %s3022_s19, %s3022_s19 }
  0x10   :  { %p3029_p8 = por %p3028_p7, %p3027_p6 }
  0x12   :  { %p3030_p9 = pnand %p3029_p8, %p3023_p5 }
  0x14   :  { %3033 = shalt.err (!%p3030_p9)
}
  0x15   :  { %20 = dma.hbm_to_vmem [thread:$0]  %s4614_s0, 128, %s18_s15, [#allocation3]  }
  0x16   :  { %s3082_s22 = smov [#allocation7]  }
  0x17   :  { %s37_s23 = sshll.u32 %s3082_s22, 4  ;;  %s38_s23 = int_to_ptr.vmem [resolvable:$true] %s37_s23 }
  0x18   :  { %s3042_s24 = scalar_lea.vmem %s38_s23, 128  ;;  %p3047_p11 = scmp.lt.s32.totalorder %s38_s23, %s38_s23 }
  0x19   :  { %p3043_p10 = scmp.ne.s32.totalorder %s38_s23, %s3042_s24  ;;  %p3048_p12 = scmp.lt.s32.totalorder %s3042_s24, %s3042_s24 }
  0x1b   :  { %p3049_p13 = por %p3048_p12, %p3047_p11 }
  0x1d   :  { %p3050_p0 = pnand %p3049_p13, %p3043_p10 }
  0x1f   :  { %3053 = shalt.err (!%p3050_p0)
}
  0x20   :  { %40 = dma.hbm_to_vmem [thread:$0]  %s4616_s2, 128, %s38_s23, [#allocation6]  }
  0x21   :  { %3074 = dma.done.wait [#allocation3], 128  }
  0x22   :  { %3075 = vsyncadd [#allocation3], 4294967168 }
  0x23   :  { %3076 = dma.done.wait [#allocation6], 256  }
  0x24   :  { %3077 = vsyncadd [#allocation6], 4294967040  ;;  %v50_v0 = vld [vmem:[#allocation2] sm:$0xff]  ;;  %v3083_v30 = vmov 683565275   ;;  %s3089_s0 = smov [#allocation8]  }
  0x25   :  { %v3121_v1 = vmul.f32 0.125, %v50_v0  ;;  %v3084_v32 = vmov 2475754826   ;;  %v3085_v35 = vmov 2131351028   ;;  %s2756_s2 = sshll.u32 %s3089_s0, 4  ;;  %s2757_s2 = int_to_ptr.vmem [resolvable:$true] %s2756_s2 }
  0x26   :  { %v3086_v37 = vmov 2102212464   ;;  %v3087_v39 = vmov 920167782   ;;  %v3088_v47 = vmov 1326507024   ;;  %p3059_p2 = scmp.lt.s32.totalorder %s2757_s2, %s2757_s2 }
  0x27   :  { %v3124_v2 = vmul.f32 3.1415927, %v3121_v1  ;;  %v3127_v3 = vmul.f32 6.2831855, %v3121_v1  ;;  %v3130_v4 = vmul.f32 9.424778, %v3121_v1  ;;  %2934 = vrcp.f32 %v3121_v1 }
  0x28   :  { %s3054_s26 = scalar_lea.vmem %s2757_s2, 4608 }
  0x29   :  { %v484_v5 = vand.u32 2147483647, %v3124_v2  ;;  %v487_v6 = vand.u32 2139095040, %v3124_v2  ;;  %v592_v7 = vand.u32 2147483647, %v3127_v3  ;;  %v595_v8 = vand.u32 2139095040, %v3127_v3  ;;  %p3055_p1 = scmp.ne.s32.totalorder %s2757_s2, %s3054_s26  ;;  %p3060_p3 = scmp.lt.s32.totalorder %s3054_s26, %s3054_s26 }
  0x2a   :  { %v703_v13 = vand.u32 2139095040, %v3130_v4  ;;  %v700_v28 = vand.u32 2147483647, %v3130_v4  ;;  %vm486_vm13 = vcmp.lt.s32.totalorder %v3124_v2, 0 }
  0x2b   :  { %v488_v9 = vshrl.u32 %v487_v6, 23  ;;  %v491_v10 = vand.u32 8388607, %v484_v5  ;;  %v596_v11 = vshrl.u32 %v595_v8, 23  ;;  %v599_v12 = vand.u32 8388607, %v592_v7  ;;  %p3061_p4 = por %p3060_p3, %p3059_p2 }
  0x2c   :  { %v704_v16 = vshrl.u32 %v703_v13, 23  ;;  %vm3262_vm15 = vcmp.le.f32.partialorder %v484_v5, 0.7853982 }
  0x2d   :  { %v2786_v14 = vadd.s32 4294967169, %v488_v9  ;;  %v2790_v15 = vadd.s32 4294967169, %v596_v11  ;;  %v492_v18 = vor.u32 8388608, %v491_v10  ;;  %v600_v19 = vor.u32 8388608, %v599_v12  ;;  %p3062_p5 = pnand %p3061_p4, %p3055_p1 }
  0x2e   :  { %v2794_v21 = vadd.s32 4294967169, %v704_v16 }
  0x2f   :  { %v494_v17 = vadd.s32 1, %v2786_v14  ;;  %v602_v20 = vadd.s32 1, %v2790_v15  ;;  %v3141_v26 = vshll.u32 %v492_v18, 8  ;;  %v3143_v27 = vshll.u32 %v600_v19, 8 }
  0x30   :  { %v3148_v34 = vadd.s32 1, %v2794_v21 }
  0x31   :  { %vm495_vm0 = vcmp.gt.s32.totalorder %v494_v17, 0  ;;  %vm603_vm1 = vcmp.gt.s32.totalorder %v602_v20, 0 }
  0x32   :  { %v496_v22 = vsel %vm495_vm0, %v494_v17, 0  ;;  %v604_v24 = vsel %vm603_vm1, %v602_v20, 0  ;;  %vm711_vm6 = vcmp.gt.s32.totalorder %v3148_v34, 0 }
  0x33   :  { %v498_v23 = vand.u32 31, %v496_v22  ;;  %v497_v25 = vshrl.u32 %v496_v22, 5  ;;  %v606_v41 = vand.u32 31, %v604_v24  ;;  %v605_v62 = vshrl.u32 %v604_v24, 5 }
  0x35   :  { %v499_v29 = vsub.s32 32, %v498_v23  ;;  %v501_v31 = vshll.u32 %v3083_v30, %v498_v23  ;;  %v504_v33 = vshll.u32 %v3084_v32, %v498_v23  ;;  %v507_v36 = vshll.u32 %v3085_v35, %v498_v23 }
  0x36   :  { %v510_v38 = vshll.u32 %v3086_v37, %v498_v23  ;;  %v513_v40 = vshll.u32 %v3087_v39, %v498_v23  ;;  %vm516_vm2 = vcmp.lt.s32.totalorder %v497_v25, 1  ;;  %vm517_vm3 = vcmp.lt.s32.totalorder %v497_v25, 2 }
  0x37   :  { %v500_v42 = vshrl.u32 %v3083_v30, %v499_v29  ;;  %v502_v43 = vshrl.u32 %v3084_v32, %v499_v29  ;;  %v505_v44 = vshrl.u32 %v3085_v35, %v499_v29  ;;  %v508_v45 = vshrl.u32 %v3086_v37, %v499_v29 }
  0x38   :  { %v511_v46 = vshrl.u32 %v3087_v39, %v499_v29  ;;  %v514_v48 = vshrl.u32 %v3088_v47, %v499_v29  ;;  %vm519_vm4 = vcmp.lt.s32.totalorder %v497_v25, 4  ;;  %vm518_vm5 = vcmp.lt.s32.totalorder %v497_v25, 3 }
  0x39   :  { %v503_v49 = vor.u32 %v502_v43, %v501_v31  ;;  %v506_v50 = vor.u32 %v505_v44, %v504_v33  ;;  %v509_v51 = vor.u32 %v508_v45, %v507_v36  ;;  %v607_v54 = vsub.s32 32, %v606_v41 }
  0x3a   :  { %v512_v52 = vor.u32 %v511_v46, %v510_v38  ;;  %v515_v53 = vor.u32 %v514_v48, %v513_v40  ;;  %v609_v8 = vshll.u32 %v3083_v30, %v606_v41  ;;  %v612_v18 = vshll.u32 %v3084_v32, %v606_v41 }
  0x3b   :  { %v520_v55 = vsel %vm516_vm2, %v500_v42, %v503_v49  ;;  %v521_v56 = vsel %vm519_vm4, %v509_v51, 2102212464  ;;  %v524_v57 = vsel %vm516_vm2, %v503_v49, %v506_v50  ;;  %v528_v58 = vsel %vm516_vm2, %v506_v50, %v509_v51  ;;  %v3187_v42 = vld [vmem:[#allocation5] sm:$0xff] }
  0x3c   :  { %v522_v59 = vsel %vm518_vm5, %v506_v50, %v521_v56  ;;  %v525_v60 = vsel %vm519_vm4, %v512_v52, 920167782  ;;  %v529_v61 = vsel %vm519_vm4, %v515_v53, 1326507024  ;;  %v608_v6 = vshrl.u32 %v3083_v30, %v607_v54 }
  0x3d   :  { %v526_v63 = vsel %vm518_vm5, %v509_v51, %v525_v60  ;;  %v530_v0 = vsel %vm518_vm5, %v512_v52, %v529_v61  ;;  %v523_v9 = vsel %vm517_vm3, %v520_v55, %v522_v59  ;;  %v610_v12 = vshrl.u32 %v3084_v32, %v607_v54 }
  0x3e   :  { %v527_v10 = vsel %vm517_vm3, %v524_v57, %v526_v63  ;;  %v531_v11 = vsel %vm517_vm3, %v528_v58, %v530_v0  ;;  %v613_v19 = vshrl.u32 %v3085_v35, %v607_v54  ;;  %v615_v20 = vshll.u32 %v3085_v35, %v606_v41 }
  0x3f   :  { %v3167_v13 = vmul.u32.u64.low %v3141_v26, %v531_v11  ;;  %v3168_v14 = vmul.u32.u64.high %v3141_v26, %v531_v11, %v3167_v13  ;;  %v3171_v15 = vmul.u32.u64.low %v3141_v26, %v527_v10  ;;  %v3172_v16 = vmul.u32.u64.high %v3141_v26, %v527_v10, %v3171_v15 }
  0x40   :  { %v611_v17 = vor.u32 %v610_v12, %v609_v8  ;;  %v616_v21 = vshrl.u32 %v3086_v37, %v607_v54  ;;  %v618_v22 = vshll.u32 %v3086_v37, %v606_v41  ;;  %v619_v23 = vshrl.u32 %v3087_v39, %v607_v54 }
  0x41   :  { %v621_v24 = vshll.u32 %v3087_v39, %v606_v41  ;;  %v539_v25 = vmul.u32 %v3141_v26, %v523_v9  ;;  %v614_v29 = vor.u32 %v613_v19, %v612_v18  ;;  %v622_v31 = vshrl.u32 %v3088_v47, %v607_v54  ;;  %v3189_v41 = vld [vmem:[#allocation7] sm:$0xff] }
  0x42   :  { %vm624_vm7 = vcmp.lt.s32.totalorder %v605_v62, 1  ;;  %vm541_vm8 = vc.u32 %v3168_v14, %v3171_v15  ;;  %v542_v33 = vadd.s32 1, %v3172_v16  ;;  %v617_v36 = vor.u32 %v616_v21, %v615_v20 }
  0x43   :  { %vm625_vm9 = vcmp.lt.s32.totalorder %v605_v62, 2  ;;  %v620_v38 = vor.u32 %v619_v23, %v618_v22  ;;  %v623_v40 = vor.u32 %v622_v31, %v621_v24  ;;  %vm626_vm10 = vcmp.lt.s32.totalorder %v605_v62, 3 }
  0x44   :  { %vm627_vm11 = vcmp.lt.s32.totalorder %v605_v62, 4  ;;  %v543_v26 = vsel %vm541_vm8, %v542_v33, %v3172_v16  ;;  %v628_v43 = vsel %vm624_vm7, %v608_v6, %v611_v17  ;;  %v632_v45 = vsel %vm624_vm7, %v611_v17, %v614_v29 }
  0x45   :  { %v629_v44 = vsel %vm627_vm11, %v617_v36, 2102212464  ;;  %v544_v46 = vadd.s32 %v543_v26, %v539_v25  ;;  %v633_v49 = vsel %vm627_vm11, %v620_v38, 920167782  ;;  %v636_v50 = vsel %vm624_vm7, %v614_v29, %v617_v36 }
  0x46   :  { %v630_v48 = vsel %vm626_vm10, %v614_v29, %v629_v44  ;;  %v634_v51 = vsel %vm626_vm10, %v617_v36, %v633_v49  ;;  %v637_v52 = vsel %vm627_vm11, %v623_v40, 1326507024  ;;  %v59_v53 = vand.u32 2139095040, %v3187_v42 }
  0x47   :  { %v266_v54 = vand.u32 2139095040, %v3189_v41  ;;  %v545_v55 = vadd.s32 536870912, %v544_v46  ;;  %v631_v56 = vsel %vm625_vm9, %v628_v43, %v630_v48  ;;  %v635_v57 = vsel %vm625_vm9, %v632_v45, %v634_v51 }
  0x48   :  { %v638_v58 = vsel %vm626_vm10, %v620_v38, %v637_v52  ;;  %v3204_v60 = vmul.u32.u64.low %v3143_v27, %v635_v57  ;;  %v3205_v61 = vmul.u32.u64.high %v3143_v27, %v635_v57, %v3204_v60  ;;  %v712_v63 = vsel %vm711_vm6, %v3148_v34, 0 }
  0x49   :  { %v639_v59 = vsel %vm625_vm9, %v636_v50, %v638_v58  ;;  %v3211_v0 = vshrl.u32 %v545_v55, 30  ;;  %v707_v9 = vand.u32 8388607, %v700_v28  ;;  %v714_v62 = vand.u32 31, %v712_v63 }
  0x4a   :  { %v3214_v6 = vmul.u32.u64.low %v3143_v27, %v639_v59  ;;  %v3215_v8 = vmul.u32.u64.high %v3143_v27, %v639_v59, %v3214_v6  ;;  %v3220_v10 = vmul.f32 12.566371, %v3121_v1  ;;  %v647_v12 = vmul.u32 %v3143_v27, %v631_v56 }
  0x4b   :  { %v547_v11 = vshll.u32 %v3211_v0, 30  ;;  %v56_v13 = vand.u32 2147483647, %v3187_v42  ;;  %v650_v34 = vadd.s32 1, %v3205_v61  ;;  %v715_v16 = vsub.s32 32, %v714_v62 }
  0x4c   :  { %v3227_v17 = vshrl.u32 %v59_v53, 23  ;;  %vm649_vm12 = vc.u32 %v3215_v8, %v3204_v60  ;;  %v708_v19 = vor.u32 8388608, %v707_v9  ;;  %v3233_v20 = vshrl.u32 %v266_v54, 23 }
  0x4d   :  { %v3229_v18 = vsub.s32 %v544_v46, %v547_v11  ;;  %v651_v21 = vsel %vm649_vm12, %v650_v34, %v3205_v61  ;;  %v717_v27 = vshll.u32 %v3083_v30, %v714_v62  ;;  %v720_v22 = vshll.u32 %v3084_v32, %v714_v62 }
  0x4e   :  { %v811_v23 = vand.u32 2139095040, %v3220_v10  ;;  %v652_v25 = vadd.s32 %v651_v21, %v647_v12  ;;  %v718_v29 = vshrl.u32 %v3084_v32, %v715_v16  ;;  %v721_v31 = vshrl.u32 %v3085_v35, %v715_v16 }
  0x4f   :  { %v550_v24 = vsub.s32 0, %v3229_v18  ;;  %v3242_v33 = vshrl.u32 %v712_v63, 5  ;;  %v723_v36 = vshll.u32 %v3085_v35, %v714_v62  ;;  %v724_v38 = vshrl.u32 %v3086_v37, %v715_v16 }
  0x50   :  { %v726_v40 = vshll.u32 %v3086_v37, %v714_v62  ;;  %v653_v43 = vadd.s32 536870912, %v652_v25  ;;  %v3249_v44 = vshll.u32 %v708_v19, 8  ;;  %v808_v45 = vand.u32 2147483647, %v3220_v10 }
  0x51   :  { %v2787_v26 = vmin.u32 %v550_v24, %v3229_v18  ;;  %v727_v46 = vshrl.u32 %v3087_v39, %v715_v16  ;;  %v729_v48 = vshll.u32 %v3087_v39, %v714_v62  ;;  %v730_v49 = vshrl.u32 %v3088_v47, %v715_v16 }
  0x52   :  { %v812_v50 = vshrl.u32 %v811_v23, 23  ;;  %v540_v51 = vadd.s32 %v3171_v15, %v3168_v14  ;;  %v719_v53 = vor.u32 %v718_v29, %v717_v27  ;;  %v722_v54 = vor.u32 %v721_v31, %v720_v22 }
  0x53   :  { %v552_v52 = vclz %v2787_v26  ;;  %v3257_v55 = vshrl.u32 %v653_v43, 30  ;;  %v725_v56 = vor.u32 %v724_v38, %v723_v36  ;;  %v728_v57 = vor.u32 %v727_v46, %v726_v40 }
  0x54   :  { %vm732_vm14 = vcmp.lt.s32.totalorder %v3242_v33, 1  ;;  %v570_v61 = vsub.s32 4, %v3211_v0  ;;  %vm734_vm0 = vcmp.lt.s32.totalorder %v3242_v33, 3  ;;  %vm735_vm1 = vcmp.lt.s32.totalorder %v3242_v33, 4 }
  0x55   :  { %v2788_v59 = vadd.s32 4294967294, %v552_v52  ;;  %v655_v14 = vshll.u32 %v3257_v55, 30  ;;  %v716_v15 = vshrl.u32 %v3083_v30, %v715_v16  ;;  %v731_v63 = vor.u32 %v730_v49, %v729_v48  ;;  %v3282_v16 = vpop.eup %2934 }
  0x56   :  { %v741_v6 = vsel %vm735_vm1, %v728_v57, 920167782  ;;  %vm733_vm3 = vcmp.lt.s32.totalorder %v3242_v33, 2  ;;  %v740_v5 = vsel %vm732_vm14, %v719_v53, %v722_v54  ;;  %v2798_v9 = vadd.s32 4294967169, %v812_v50 }
  0x57   :  { %vm2789_vm2 = vcmp.lt.s32.totalorder %v2788_v59, 0  ;;  %v3276_v11 = vsub.s32 %v652_v25, %v655_v14  ;;  %v737_v12 = vsel %vm735_vm1, %v725_v56, 2102212464  ;;  %v742_v34 = vsel %vm734_vm0, %v725_v56, %v741_v6 }
  0x58   :  { %v555_v62 = vsel %vm2789_vm2, 0, %v2788_v59  ;;  %v744_v22 = vsel %vm732_vm14, %v722_v54, %v725_v56  ;;  %v571_v23 = vsel %vm486_vm13, %v570_v61, %v3211_v0  ;;  %v736_v25 = vsel %vm732_vm14, %v716_v15, %v719_v53 }
  0x59   :  { %v556_v19 = vsub.s32 32, %v555_v62  ;;  %v557_v21 = vshll.u32 %v3229_v18, %v555_v62  ;;  %v560_v27 = vsub.s32 4294967266, %v555_v62  ;;  %v658_v24 = vsub.s32 0, %v3276_v11 }
  0x5a   :  { %v745_v29 = vsel %vm735_vm1, %v731_v63, 1326507024  ;;  %v738_v18 = vsel %vm734_vm0, %v722_v54, %v737_v12  ;;  %v743_v0 = vsel %vm733_vm3, %v740_v5, %v742_v34  ;;  %v818_v43 = vadd.s32 1, %v2798_v9 }
  0x5b   :  { %v558_v31 = vshrl.u32 %v540_v51, %v556_v19  ;;  %v561_v36 = vadd.s32 127, %v560_v27  ;;  %v746_v38 = vsel %vm734_vm0, %v728_v57, %v745_v29  ;;  %v2791_v40 = vmin.u32 %v658_v24, %v3276_v11 }
  0x5c   :  { %v747_v26 = vsel %vm733_vm3, %v744_v22, %v746_v38  ;;  %v573_v51 = vsel %vm3262_vm15, 0, %v571_v23  ;;  %vm594_vm4 = vcmp.lt.s32.totalorder %v3127_v3, 0  ;;  %v739_v53 = vsel %vm733_vm3, %v736_v25, %v738_v18 }
  0x5d   :  { %v559_v46 = vor.u32 %v558_v31, %v557_v21  ;;  %v562_v48 = vshll.u32 %v561_v36, 23  ;;  %v3305_v49 = vmul.u32.u64.low %v3249_v44, %v747_v26  ;;  %v3306_v50 = vmul.u32.u64.high %v3249_v44, %v747_v26, %v3305_v49 }
  0x5e   :  { %v660_v52 = vclz %v2791_v40  ;;  %v3314_v57 = vmul.u32.u64.low %v3249_v44, %v743_v0  ;;  %v3315_v59 = vmul.u32.u64.high %v3249_v44, %v743_v0, %v3314_v57  ;;  %v648_v61 = vadd.s32 %v3204_v60, %v3215_v8 }
  0x5f   :  { %v563_v54 = vor.u32 4788187, %v562_v48  ;;  %v566_v56 = vcvt.s32.f32 %v559_v46  ;;  %v3322_v15 = vand.u32 8388607, %v808_v45  ;;  %vm819_vm5 = vcmp.gt.s32.totalorder %v818_v43, 0 }
  0x60   :  { %v2792_v14 = vadd.s32 4294967294, %v660_v52  ;;  %v577_v6 = vadd.s32 3, %v573_v51  ;;  %v678_v33 = vsub.s32 4, %v3257_v55  ;;  %v820_v5 = vsel %vm819_vm5, %v818_v43, 0 }
  0x61   :  { %v564_v63 = vand.u32 2147483647, %v563_v54  ;;  %v755_v9 = vmul.u32 %v3249_v44, %v739_v53  ;;  %vm757_vm7 = vc.u32 %v3306_v50, %v3314_v57  ;;  %v822_v62 = vand.u32 31, %v820_v5 }
  0x62   :  { %vm2793_vm6 = vcmp.lt.s32.totalorder %v2792_v14, 0  ;;  %v3329_v60 = vmul.f32 0.31830987, %v3282_v16  ;;  %vm3333_vm8 = vcmp.le.f32.partialorder %v592_v7, 0.7853982  ;;  %v758_v19 = vadd.s32 1, %v3315_v59 }
  0x63   :  { %v567_v8 = vmul.f32 %v566_v56, %v564_v63  ;;  %v663_v34 = vsel %vm2793_vm6, 0, %v2792_v14  ;;  %v823_v22 = vsub.s32 32, %v822_v62  ;;  %v3339_v24 = vand.u32 3, %v577_v6 }
  0x64   :  { %v664_v21 = vsub.s32 32, %v663_v34  ;;  %v665_v44 = vshll.u32 %v3276_v11, %v663_v34  ;;  %v668_v27 = vsub.s32 4294967266, %v663_v34  ;;  %v759_v25 = vsel %vm757_vm7, %v758_v19, %v3315_v59 }
  0x65   :  { %v568_v23 = vxor.u32 2147483648, %v567_v8  ;;  %v816_v29 = vor.u32 8388608, %v3322_v15  ;;  %v679_v36 = vsel %vm594_vm4, %v678_v33, %v3257_v55  ;;  %v760_v18 = vadd.s32 %v759_v25, %v755_v9 }
  0x66   :  { %v666_v31 = vshrl.u32 %v648_v61, %v664_v21  ;;  %v669_v7 = vadd.s32 127, %v668_v27  ;;  %v825_v11 = vshll.u32 %v3083_v30, %v822_v62  ;;  %v826_v40 = vshrl.u32 %v3084_v32, %v823_v22 }
  0x67   :  { %v569_v38 = vsel %vm486_vm13, %v568_v23, %v567_v8  ;;  %v828_v0 = vshll.u32 %v3084_v32, %v822_v62  ;;  %v761_v48 = vadd.s32 536870912, %v760_v18  ;;  %v829_v55 = vshrl.u32 %v3085_v35, %v823_v22 }
  0x68   :  { %v572_v26 = vsel %vm3262_vm15, %v3124_v2, %v569_v38  ;;  %v667_v43 = vor.u32 %v666_v31, %v665_v44  ;;  %v670_v46 = vshll.u32 %v669_v7, 23  ;;  %v831_v49 = vshll.u32 %v3085_v35, %v822_v62 }
  0x69   :  { %2936 = vcosq.f32 %v572_v26  ;;  %v832_v51 = vshrl.u32 %v3086_v37, %v823_v22  ;;  %v3357_v54 = vshrl.u32 %v761_v48, 30  ;;  %v821_v56 = vshrl.u32 %v820_v5, 5 }
  0x6a   :  { %2938 = vsinq.f32 %v572_v26  ;;  %v671_v52 = vor.u32 4788187, %v670_v46  ;;  %v674_v53 = vcvt.s32.f32 %v667_v43  ;;  %v834_v59 = vshll.u32 %v3086_v37, %v822_v62 }
  0x6b   :  { %v835_v58 = vshrl.u32 %v3087_v39, %v823_v22  ;;  %v837_v61 = vshll.u32 %v3087_v39, %v822_v62  ;;  %v681_v15 = vsel %vm3333_vm8, 0, %v679_v36  ;;  %v763_v63 = vshll.u32 %v3357_v54, 30 }
  0x6c   :  { %v672_v14 = vand.u32 2147483647, %v671_v52  ;;  %v838_v6 = vshrl.u32 %v3088_v47, %v823_v22  ;;  %v824_v33 = vshrl.u32 %v3083_v30, %v823_v22  ;;  %v827_v9 = vor.u32 %v826_v40, %v825_v11 }
  0x6d   :  { %v830_v8 = vor.u32 %v829_v55, %v828_v0  ;;  %v836_v34 = vor.u32 %v835_v58, %v834_v59  ;;  %v3367_v19 = vsub.s32 %v760_v18, %v763_v63  ;;  %v833_v21 = vor.u32 %v832_v51, %v831_v49 }
  0x6e   :  { %v675_v5 = vmul.f32 %v674_v53, %v672_v14  ;;  %v839_v44 = vor.u32 %v838_v6, %v837_v61  ;;  %vm580_vm9 = vcmp.eq.s32.totalorder %v3339_v24, 0  ;;  %vm840_vm10 = vcmp.lt.s32.totalorder %v821_v56, 1 }
  0x6f   :  { %vm843_vm11 = vcmp.lt.s32.totalorder %v821_v56, 4  ;;  %v3370_v62 = vshll.u32 %v816_v29, 8  ;;  %v2769_v27 = vadd.s32 4294967169, %v3227_v17  ;;  %vm579_vm12 = vcmp.lt.s32.totalorder %v3339_v24, 2 }
  0x70   :  { %v676_v23 = vxor.u32 2147483648, %v675_v5  ;;  %v766_v22 = vsub.s32 0, %v3367_v19  ;;  %vm842_vm13 = vcmp.lt.s32.totalorder %v821_v56, 3  ;;  %v845_v25 = vsel %vm843_vm11, %v833_v21, 2102212464 }
  0x71   :  { %vm576_vm14 = vweird.f32 %v3124_v2  ;;  %vm841_vm15 = vcmp.lt.s32.totalorder %v821_v56, 2  ;;  %v844_v31 = vsel %vm840_vm10, %v824_v33, %v827_v9  ;;  %v849_v7 = vsel %vm843_vm11, %v836_v34, 920167782 }
  0x72   :  { %v853_v36 = vsel %vm843_vm11, %v839_v44, 1326507024  ;;  %v677_v29 = vsel %vm594_vm4, %v676_v23, %v675_v5  ;;  %vm702_vm0 = vcmp.lt.s32.totalorder %v3130_v4, 0  ;;  %v2795_v17 = vmin.u32 %v766_v22, %v3367_v19 }
  0x73   :  { %v848_v18 = vsel %vm840_vm10, %v827_v9, %v830_v8  ;;  %v852_v38 = vsel %vm840_vm10, %v830_v8, %v833_v21  ;;  %v680_v11 = vsel %vm3333_vm8, %v3127_v3, %v677_v29  ;;  %v846_v40 = vsel %vm842_vm13, %v830_v8, %v845_v25 }
  0x74   :  { %v850_v0 = vsel %vm842_vm13, %v833_v21, %v849_v7  ;;  %v854_v26 = vsel %vm842_vm13, %v836_v34, %v853_v36  ;;  %vm583_vm1 = vcmp.eq.s32.totalorder %v3339_v24, 2  ;;  %2940 = vcosq.f32 %v680_v11 }
  0x75   :  { %v685_v43 = vadd.s32 3, %v681_v15  ;;  %v768_v46 = vclz %v2795_v17  ;;  %2942 = vsinq.f32 %v680_v11  ;;  %vm3389_vm2 = vcmp.le.f32.partialorder %v700_v28, 0.7853982 }
  0x76   :  { %v786_v55 = vsub.s32 4, %v3357_v54  ;;  %v851_v12 = vsel %vm841_vm15, %v848_v18, %v850_v0  ;;  %v855_v49 = vsel %vm841_vm15, %v852_v38, %v854_v26  ;;  %v2937_v51 = vpop.eup %2936  ;;  %v847_v53 = vsel %vm841_vm15, %v844_v31, %v846_v40 }
  0x77   :  { %v2796_v52 = vadd.s32 4294967294, %v768_v46  ;;  %v3398_v59 = vmul.u32.u64.low %v3370_v62, %v855_v49  ;;  %v3399_v58 = vmul.u32.u64.high %v3370_v62, %v855_v49, %v3398_v59  ;;  %v2939_v61 = vpop.eup %2938  ;;  %v584_v14 = vxor.u32 2147483648, %v2937_v51 }
  0x78   :  { %v3402_v28 = vmul.u32.u64.low %v3370_v62, %v851_v12  ;;  %v3403_v15 = vmul.u32.u64.high %v3370_v62, %v851_v12, %v3402_v28  ;;  %v66_v63 = vadd.s32 1, %v2769_v27  ;;  %v581_v6 = vxor.u32 2147483648, %v2939_v61 }
  0x79   :  { %v3406_v33 = vand.u32 3, %v685_v43  ;;  %v756_v9 = vadd.s32 %v3314_v57, %v3306_v50  ;;  %vm2797_vm3 = vcmp.lt.s32.totalorder %v2796_v52, 0  ;;  %v585_v56 = vsel %vm583_vm1, %v584_v14, %v2939_v61 }
  0x7a   :  { %v771_v8 = vsel %vm2797_vm3, 0, %v2796_v52  ;;  %v863_v34 = vmul.u32 %v3370_v62, %v847_v53  ;;  %vm67_vm4 = vcmp.gt.s32.totalorder %v66_v63, 0  ;;  %v582_v5 = vsel %vm580_vm9, %v2937_v51, %v581_v6 }
  0x7b   :  { %v772_v21 = vsub.s32 32, %v771_v8  ;;  %v773_v44 = vshll.u32 %v3367_v19, %v771_v8  ;;  %v776_v27 = vsub.s32 4294967266, %v771_v8  ;;  %v586_v23 = vsel %vm579_vm12, %v582_v5, %v585_v56 }
  0x7c   :  { %v787_v50 = vsel %vm702_vm0, %v786_v55, %v3357_v54  ;;  %vm865_vm5 = vc.u32 %v3399_v58, %v3402_v28  ;;  %v866_v57 = vadd.s32 1, %v3403_v15  ;;  %v587_v62 = vsel %vm576_vm14, nan, %v586_v23 }
  0x7d   :  { %vm684_vm6 = vweird.f32 %v3127_v3  ;;  %v774_v22 = vshrl.u32 %v756_v9, %v772_v21  ;;  %v777_v19 = vadd.s32 127, %v776_v27  ;;  %v68_v25 = vsel %vm67_vm4, %v66_v63, 0 }
  0x7e   :  { %v588_v24 = vmul.f32 %v587_v62, %v3329_v60  ;;  %v867_v31 = vsel %vm865_vm5, %v866_v57, %v3403_v15  ;;  %v3431_v54 = vand.u32 8388607, %v56_v13  ;;  %v70_v7 = vand.u32 31, %v68_v25 }
  0x7f   :  { %v775_v36 = vor.u32 %v774_v22, %v773_v44  ;;  %v778_v29 = vshll.u32 %v777_v19, 23  ;;  %v789_v2 = vsel %vm3389_vm2, 0, %v787_v50  ;;  %v868_v17 = vadd.s32 %v867_v31, %v863_v34 }
  0x80   :  { %v589_v18 = vmul.f32 4.442883, %v588_v24  ;;  %v591_v38 = vmul.f32 0.15915494, %v3282_v16  ;;  %vm687_vm7 = vcmp.lt.s32.totalorder %v3406_v33, 2  ;;  %v71_v11 = vsub.s32 32, %v70_v7 }
  0x81   :  { %vm688_vm8 = vcmp.eq.s32.totalorder %v3406_v33, 0  ;;  %v779_v60 = vor.u32 4788187, %v778_v29  ;;  %v782_v40 = vcvt.s32.f32 %v775_v36  ;;  %v869_v0 = vadd.s32 536870912, %v868_v17  ;;  %v2941_v26 = vpop.eup %2940 }
  0x82   :  { %v914_v43 = vmul.f32 0.2820948, %v589_v18  ;;  %vm691_vm9 = vcmp.eq.s32.totalorder %v3406_v33, 2  ;;  %v3439_v46 = vadd.s32 3, %v789_v2  ;;  %v64_v55 = vor.u32 8388608, %v3431_v54  ;;  %v2943_v12 = vpop.eup %2942 }
  0x83   :  { %v692_v49 = vxor.u32 2147483648, %v2941_v26  ;;  %v780_v51 = vand.u32 2147483647, %v779_v60  ;;  %v3442_v52 = vshrl.u32 %v869_v0, 30  ;;  %v73_v53 = vshll.u32 %v3083_v30, %v70_v7 }
  0x84   :  { %915 = vst [vmem:[#allocation8] sm:$0xff] %v914_v43  ;;  %v689_v59 = vxor.u32 2147483648, %v2943_v12  ;;  %v74_v61 = vshrl.u32 %v3084_v32, %v71_v11  ;;  %v76_v14 = vshll.u32 %v3084_v32, %v70_v7  ;;  %v79_v15 = vshll.u32 %v3085_v35, %v70_v7 }
  0x85   :  { %v693_v63 = vsel %vm691_vm9, %v692_v49, %v2943_v12  ;;  %v783_v6 = vmul.f32 %v782_v40, %v780_v51  ;;  %v871_v9 = vshll.u32 %v3442_v52, 30  ;;  %v77_v56 = vshrl.u32 %v3085_v35, %v71_v11 }
  0x86   :  { %v690_v8 = vsel %vm688_vm8, %v2941_v26, %v689_v59  ;;  %v80_v34 = vshrl.u32 %v3086_v37, %v71_v11  ;;  %v82_v5 = vshll.u32 %v3086_v37, %v70_v7  ;;  %v83_v21 = vshrl.u32 %v3087_v39, %v71_v11 }
  0x87   :  { %v694_v44 = vsel %vm687_vm7, %v690_v8, %v693_v63  ;;  %v784_v27 = vxor.u32 2147483648, %v783_v6  ;;  %v3457_v23 = vsub.s32 %v868_v17, %v871_v9  ;;  %v69_v50 = vshrl.u32 %v68_v25, 5 }
  0x88   :  { %v695_v57 = vsel %vm684_vm6, nan, %v694_v44  ;;  %v72_v62 = vshrl.u32 %v3083_v30, %v71_v11  ;;  %v85_v22 = vshll.u32 %v3087_v39, %v70_v7  ;;  %v86_v19 = vshrl.u32 %v3088_v47, %v71_v11 }
  0x89   :  { %v696_v24 = vmul.f32 %v695_v57, %v591_v38  ;;  %v785_v31 = vsel %vm702_vm0, %v784_v27, %v783_v6  ;;  %v874_v33 = vsub.s32 0, %v3457_v23  ;;  %v75_v54 = vor.u32 %v74_v61, %v73_v53 }
  0x8a   :  { %v788_v25 = vsel %vm3389_vm2, %v3130_v4, %v785_v31  ;;  %v78_v36 = vor.u32 %v77_v56, %v76_v14  ;;  %v81_v3 = vor.u32 %v80_v34, %v79_v15  ;;  %v84_v29 = vor.u32 %v83_v21, %v82_v5 }
  0x8b   :  { %v697_v2 = vmul.f32 8.885766, %v696_v24  ;;  %2944 = vcosq.f32 %v788_v25  ;;  %v2799_v7 = vmin.u32 %v874_v33, %v3457_v23  ;;  %vm88_vm10 = vcmp.lt.s32.totalorder %v69_v50, 1 }
  0x8c   :  { %2946 = vsinq.f32 %v788_v25  ;;  %v87_v17 = vor.u32 %v86_v19, %v85_v22  ;;  %vm90_vm11 = vcmp.lt.s32.totalorder %v69_v50, 3  ;;  %vm91_vm12 = vcmp.lt.s32.totalorder %v69_v50, 4 }
  0x8d   :  { %v916_v18 = vmul.f32 0.2820948, %v697_v2  ;;  %v876_v38 = vclz %v2799_v7  ;;  %vm89_vm13 = vcmp.lt.s32.totalorder %v69_v50, 2  ;;  %v104_v11 = vshll.u32 %v64_v55, 8 }
  0x8e   :  { %v92_v60 = vsel %vm88_vm10, %v72_v62, %v75_v54  ;;  %v93_v48 = vsel %vm91_vm12, %v81_v3, 2102212464  ;;  %v96_v40 = vsel %vm88_vm10, %v75_v54, %v78_v36  ;;  %v97_v0 = vsel %vm91_vm12, %v84_v29, 920167782 }
  0x8f   :  { %918 = vst [vmem:[#allocation8 + $0x8] sm:$0xff] %v916_v18  ;;  %v2800_v26 = vadd.s32 4294967294, %v876_v38  ;;  %v94_v43 = vsel %vm90_vm11, %v78_v36, %v93_v48  ;;  %v98_v12 = vsel %vm90_vm11, %v81_v3, %v97_v0  ;;  %v100_v49 = vsel %vm88_vm10, %v78_v36, %v81_v3 }
  0x90   :  { %v864_v51 = vadd.s32 %v3402_v28, %v3399_v58  ;;  %v99_v55 = vsel %vm89_vm13, %v96_v40, %v98_v12  ;;  %v101_v53 = vsel %vm91_vm12, %v87_v17, 1326507024  ;;  %v2777_v59 = vadd.s32 4294967169, %v3233_v20 }
  0x91   :  { %vm2801_vm14 = vcmp.lt.s32.totalorder %v2800_v26, 0  ;;  %v102_v61 = vsel %vm90_vm11, %v84_v29, %v101_v53  ;;  %v3484_v14 = vmul.u32.u64.low %v104_v11, %v99_v55  ;;  %v3485_v15 = vmul.u32.u64.high %v104_v11, %v99_v55, %v3484_v14 }
  0x92   :  { %v879_v63 = vsel %vm2801_vm14, 0, %v2800_v26  ;;  %v95_v6 = vsel %vm89_vm13, %v92_v60, %v94_v43  ;;  %v103_v9 = vsel %vm89_vm13, %v100_v49, %v102_v61  ;;  %v273_v8 = vadd.s32 1, %v2777_v59 }
  0x93   :  { %v880_v56 = vsub.s32 32, %v879_v63  ;;  %v881_v58 = vshll.u32 %v3457_v23, %v879_v63  ;;  %v884_v28 = vsub.s32 4294967266, %v879_v63  ;;  %v794_v34 = vand.u32 3, %v3439_v46 }
  0x94   :  { %v894_v20 = vsub.s32 4, %v3442_v52  ;;  %v3493_v5 = vmul.u32.u64.low %v104_v11, %v103_v9  ;;  %v3494_v21 = vmul.u32.u64.high %v104_v11, %v103_v9, %v3493_v5  ;;  %v114_v57 = vadd.s32 1, %v3485_v15 }
  0x95   :  { %v882_v44 = vshrl.u32 %v864_v51, %v880_v56  ;;  %v885_v27 = vadd.s32 127, %v884_v28  ;;  %vm274_vm15 = vcmp.gt.s32.totalorder %v273_v8, 0  ;;  %vm792_vm0 = vweird.f32 %v3130_v4 }
  0x96   :  { %v111_v50 = vmul.u32 %v104_v11, %v95_v6  ;;  %v263_v62 = vand.u32 2147483647, %v3189_v41  ;;  %v275_v23 = vsel %vm274_vm15, %v273_v8, 0  ;;  %vm810_vm1 = vcmp.lt.s32.totalorder %v3220_v10, 0 }
  0x97   :  { %v883_v22 = vor.u32 %v882_v44, %v881_v58  ;;  %v886_v46 = vshll.u32 %v885_v27, 23  ;;  %v277_v19 = vand.u32 31, %v275_v23  ;;  %vm796_vm2 = vcmp.eq.s32.totalorder %v794_v34, 0 }
  0x98   :  { %v2945_v24 = vpop.eup %2944  ;;  %vm799_vm3 = vcmp.eq.s32.totalorder %v794_v34, 2  ;;  %v895_v31 = vsel %vm810_vm1, %v894_v20, %v3442_v52  ;;  %vm113_vm4 = vc.u32 %v3494_v21, %v3484_v14  ;;  %vm795_vm5 = vcmp.lt.s32.totalorder %v794_v34, 2 }
  0x99   :  { %v2947_v33 = vpop.eup %2946  ;;  %v800_v54 = vxor.u32 2147483648, %v2945_v24  ;;  %v887_v25 = vor.u32 4788187, %v886_v46  ;;  %v890_v36 = vcvt.s32.f32 %v883_v22  ;;  %v115_v3 = vsel %vm113_vm4, %v114_v57, %v3485_v15 }
  0x9a   :  { %v797_v29 = vxor.u32 2147483648, %v2947_v33  ;;  %v116_v2 = vadd.s32 %v115_v3, %v111_v50  ;;  %v278_v7 = vsub.s32 32, %v277_v19  ;;  %v699_v17 = vmul.f32 0.10610329, %v3282_v16 }
  0x9b   :  { %v801_v18 = vsel %vm799_vm3, %v800_v54, %v2947_v33  ;;  %vm3509_vm6 = vcmp.le.f32.partialorder %v808_v45, 0.7853982  ;;  %v888_v38 = vand.u32 2147483647, %v887_v25  ;;  %v270_v40 = vand.u32 8388607, %v263_v62 }
  0x9c   :  { %v798_v11 = vsel %vm796_vm2, %v2945_v24, %v797_v29  ;;  %v897_v60 = vsel %vm3509_vm6, 0, %v895_v31  ;;  %v117_v48 = vadd.s32 536870912, %v116_v2  ;;  %v280_v43 = vshll.u32 %v3083_v30, %v277_v19 }
  0x9d   :  { %v802_v0 = vsel %vm795_vm5, %v798_v11, %v801_v18  ;;  %v891_v26 = vmul.f32 %v890_v36, %v888_v38  ;;  %v281_v12 = vshrl.u32 %v3084_v32, %v278_v7  ;;  %v276_v51 = vshrl.u32 %v275_v23, 5 }
  0x9e   :  { %v803_v45 = vsel %vm792_vm0, nan, %v802_v0  ;;  %v3522_v49 = vshrl.u32 %v117_v48, 30  ;;  %v283_v55 = vshll.u32 %v3084_v32, %v277_v19  ;;  %v284_v61 = vshrl.u32 %v3085_v35, %v278_v7 }
  0x9f   :  { %v804_v53 = vmul.f32 %v803_v45, %v699_v17  ;;  %v892_v59 = vxor.u32 2147483648, %v891_v26  ;;  %v289_v15 = vshll.u32 %v3086_v37, %v277_v19  ;;  %v286_v6 = vshll.u32 %v3085_v35, %v277_v19 }
  0xa0   :  { %v119_v63 = vshll.u32 %v3522_v49, 30  ;;  %v287_v9 = vshrl.u32 %v3086_v37, %v278_v7  ;;  %v290_v4 = vshrl.u32 %v3087_v39, %v278_v7  ;;  %v271_v28 = vor.u32 8388608, %v270_v40 }
  0xa1   :  { %v805_v56 = vmul.f32 13.328649, %v804_v53  ;;  %v893_v58 = vsel %vm810_vm1, %v892_v59, %v891_v26  ;;  %v282_v8 = vor.u32 %v281_v12, %v280_v43  ;;  %v292_v5 = vshll.u32 %v3087_v39, %v277_v19 }
  0xa2   :  { %v896_v34 = vsel %vm3509_vm6, %v3220_v10, %v893_v58  ;;  %v3536_v20 = vsub.s32 %v116_v2, %v119_v63  ;;  %v293_v44 = vshrl.u32 %v3088_v47, %v278_v7  ;;  %v285_v57 = vor.u32 %v284_v61, %v283_v55 }
  0xa3   :  { %v919_v27 = vmul.f32 0.2820948, %v805_v56  ;;  %2948 = vcosq.f32 %v896_v34  ;;  %v291_v50 = vor.u32 %v290_v4, %v289_v15  ;;  %v288_v22 = vor.u32 %v287_v9, %v286_v6 }
  0xa4   :  { %2950 = vsinq.f32 %v896_v34  ;;  %v122_v23 = vsub.s32 0, %v3536_v20  ;;  %vm295_vm7 = vcmp.lt.s32.totalorder %v276_v51, 1  ;;  %v279_v46 = vshrl.u32 %v3083_v30, %v278_v7 }
  0xa5   :  { %921 = vst [vmem:[#allocation8 + $0x10] sm:$0xff] %v919_v27  ;;  %vm297_vm8 = vcmp.lt.s32.totalorder %v276_v51, 3  ;;  %vm298_vm9 = vcmp.lt.s32.totalorder %v276_v51, 4  ;;  %v901_v24 = vadd.s32 3, %v897_v60  ;;  %v294_v19 = vor.u32 %v293_v44, %v292_v5 }
  0xa6   :  { %v2770_v31 = vmin.u32 %v122_v23, %v3536_v20  ;;  %v311_v33 = vshll.u32 %v271_v28, 8  ;;  %vm296_vm10 = vcmp.lt.s32.totalorder %v276_v51, 2  ;;  %v300_v54 = vsel %vm298_vm9, %v288_v22, 2102212464 }
  0xa7   :  { %v303_v25 = vsel %vm295_vm7, %v282_v8, %v285_v57  ;;  %v304_v36 = vsel %vm298_vm9, %v291_v50, 920167782  ;;  %v3548_v2 = vmul.f32 4.4934096, %v3121_v1  ;;  %v299_v7 = vsel %vm295_vm7, %v279_v46, %v282_v8 }
  0xa8   :  { %v124_v3 = vclz %v2770_v31  ;;  %v305_v29 = vsel %vm297_vm8, %v288_v22, %v304_v36  ;;  %v301_v17 = vsel %vm297_vm8, %v285_v57, %v300_v54  ;;  %v307_v18 = vsel %vm295_vm7, %v285_v57, %v288_v22 }
  0xa9   :  { %v306_v38 = vsel %vm296_vm10, %v303_v25, %v305_v29  ;;  %v308_v11 = vsel %vm298_vm9, %v294_v19, 1326507024  ;;  %v902_v60 = vand.u32 3, %v901_v24  ;;  %v302_v26 = vsel %vm296_vm10, %v299_v7, %v301_v17 }
  0xaa   :  { %v2771_v52 = vadd.s32 4294967294, %v124_v3  ;;  %v309_v48 = vsel %vm297_vm8, %v291_v50, %v308_v11  ;;  %v3556_v40 = vmul.u32.u64.low %v311_v33, %v306_v38  ;;  %v3557_v0 = vmul.u32.u64.high %v311_v33, %v306_v38, %v3556_v40 }
  0xab   :  { %v310_v43 = vsel %vm296_vm10, %v307_v18, %v309_v48  ;;  %v930_v12 = vand.u32 2139095040, %v3548_v2  ;;  %v112_v59 = vadd.s32 %v3484_v14, %v3494_v21  ;;  %v807_v6 = vmul.f32 0.07957747, %v3282_v16 }
  0xac   :  { %vm2772_vm11 = vcmp.lt.s32.totalorder %v2771_v52, 0  ;;  %v3563_v55 = vmul.u32.u64.low %v311_v33, %v310_v43  ;;  %v3564_v53 = vmul.u32.u64.high %v311_v33, %v310_v43, %v3563_v55  ;;  %v318_v9 = vmul.u32 %v311_v33, %v302_v26 }
  0xad   :  { %v127_v45 = vsel %vm2772_vm11, 0, %v2771_v52  ;;  %v931_v63 = vshrl.u32 %v930_v12, 23  ;;  %v321_v4 = vadd.s32 1, %v3557_v0  ;;  %vm900_vm12 = vweird.f32 %v3220_v10 }
  0xae   :  { %v128_v61 = vsub.s32 32, %v127_v45  ;;  %v132_v15 = vsub.s32 4294967266, %v127_v45  ;;  %vm907_vm13 = vcmp.eq.s32.totalorder %v902_v60, 2  ;;  %vm903_vm14 = vcmp.lt.s32.totalorder %v902_v60, 2 }
  0xaf   :  { %v2802_v58 = vadd.s32 4294967169, %v931_v63  ;;  %vm904_vm15 = vcmp.eq.s32.totalorder %v902_v60, 0  ;;  %vm320_vm0 = vc.u32 %v3564_v53, %v3556_v40  ;;  %v129_v21 = vshll.u32 %v3536_v20, %v127_v45 }
  0xb0   :  { %v2949_v56 = vpop.eup %2948  ;;  %v133_v51 = vadd.s32 127, %v132_v15  ;;  %v130_v34 = vshrl.u32 %v112_v59, %v128_v61  ;;  %v322_v5 = vsel %vm320_vm0, %v321_v4, %v3557_v0  ;;  %v927_v24 = vand.u32 2147483647, %v3548_v2 }
  0xb1   :  { %v2951_v28 = vpop.eup %2950  ;;  %v908_v8 = vxor.u32 2147483648, %v2949_v56  ;;  %v323_v57 = vadd.s32 %v322_v5, %v318_v9  ;;  %v937_v50 = vadd.s32 1, %v2802_v58  ;;  %v3584_v18 = vmul.f32 7.7252517, %v3121_v1 }
  0xb2   :  { %v905_v14 = vxor.u32 2147483648, %v2951_v28  ;;  %v134_v27 = vshll.u32 %v133_v51, 23  ;;  %v131_v19 = vor.u32 %v130_v34, %v129_v21  ;;  %v934_v7 = vand.u32 8388607, %v927_v24 }
  0xb3   :  { %v909_v44 = vsel %vm907_vm13, %v908_v8, %v2951_v28  ;;  %v324_v46 = vadd.s32 536870912, %v323_v57  ;;  %vm938_vm1 = vcmp.gt.s32.totalorder %v937_v50, 0  ;;  %v1143_v61 = vand.u32 2139095040, %v3584_v18 }
  0xb4   :  { %v906_v23 = vsel %vm904_vm15, %v2949_v56, %v905_v14  ;;  %v939_v33 = vsel %vm938_vm1, %v937_v50, 0  ;;  %v135_v20 = vor.u32 4788187, %v134_v27  ;;  %v138_v38 = vcvt.s32.f32 %v131_v19 }
  0xb5   :  { %v910_v22 = vsel %vm903_vm14, %v906_v23, %v909_v44  ;;  %v3578_v25 = vshrl.u32 %v324_v46, 30  ;;  %v941_v36 = vand.u32 31, %v939_v33  ;;  %v935_v12 = vor.u32 8388608, %v934_v7 }
  0xb6   :  { %v911_v31 = vsel %vm900_vm12, nan, %v910_v22  ;;  %v136_v10 = vand.u32 2147483647, %v135_v20  ;;  %v940_v45 = vshrl.u32 %v939_v33, 5  ;;  %vm58_vm2 = vcmp.lt.s32.totalorder %v3187_v42, 0 }
  0xb7   :  { %v912_v54 = vmul.f32 %v911_v31, %v807_v6  ;;  %v326_v29 = vshll.u32 %v3578_v25, 30  ;;  %v942_v17 = vsub.s32 32, %v941_v36  ;;  %v944_v60 = vshll.u32 %v3083_v30, %v941_v36 }
  0xb8   :  { %v947_v0 = vshll.u32 %v3084_v32, %v941_v36  ;;  %v950_v55 = vshll.u32 %v3085_v35, %v941_v36  ;;  %v142_v15 = vsub.s32 4, %v3522_v49  ;;  %v319_v63 = vadd.s32 %v3556_v40, %v3564_v53 }
  0xb9   :  { %v913_v3 = vmul.f32 17.771532, %v912_v54  ;;  %v327_v11 = vsub.s32 %v323_v57, %v326_v29  ;;  %v945_v48 = vshrl.u32 %v3084_v32, %v942_v17  ;;  %v948_v26 = vshrl.u32 %v3085_v35, %v942_v17 }
  0xba   :  { %v951_v59 = vshrl.u32 %v3086_v37, %v942_v17  ;;  %v139_v9 = vmul.f32 %v138_v38, %v136_v10  ;;  %v953_v51 = vshll.u32 %v3086_v37, %v941_v36  ;;  %vm3600_vm3 = vcmp.le.f32.partialorder %v56_v13, 0.7853982 }
  0xbb   :  { %v922_v52 = vmul.f32 0.2820948, %v913_v3  ;;  %v329_v43 = vsub.s32 0, %v327_v11  ;;  %v946_v4 = vor.u32 %v945_v48, %v944_v60  ;;  %v949_v56 = vor.u32 %v948_v26, %v947_v0 }
  0xbc   :  { %v954_v8 = vshrl.u32 %v3087_v39, %v942_v17  ;;  %v956_v14 = vshll.u32 %v3087_v39, %v941_v36  ;;  %v957_v21 = vshrl.u32 %v3088_v47, %v942_v17  ;;  %v952_v40 = vor.u32 %v951_v59, %v950_v55 }
  0xbd   :  { %924 = vst [vmem:[#allocation8 + $0x18] sm:$0xff] %v922_v52  ;;  %v2778_v6 = vmin.u32 %v329_v43, %v327_v11  ;;  %vm959_vm4 = vcmp.lt.s32.totalorder %v940_v45, 1  ;;  %v975_v53 = vshll.u32 %v935_v12, 8  ;;  %v1144_v34 = vshrl.u32 %v1143_v61, 23 }
  0xbe   :  { %v943_v44 = vshrl.u32 %v3083_v30, %v942_v17  ;;  %v955_v27 = vor.u32 %v954_v8, %v953_v51  ;;  %v958_v57 = vor.u32 %v957_v21, %v956_v14  ;;  %v140_v13 = vxor.u32 2147483648, %v139_v9 }
  0xbf   :  { %v331_v28 = vclz %v2778_v6  ;;  %vm960_vm5 = vcmp.lt.s32.totalorder %v940_v45, 2  ;;  %vm961_vm6 = vcmp.lt.s32.totalorder %v940_v45, 3  ;;  %vm962_vm7 = vcmp.lt.s32.totalorder %v940_v45, 4  ;;  %v3637_v45 = vld [vmem:[#allocation7] sm:$0xff] }
  0xc0   :  { %v964_v50 = vsel %vm962_vm7, %v952_v40, 2102212464  ;;  %v967_v23 = vsel %vm959_vm4, %v946_v4, %v949_v56  ;;  %v968_v22 = vsel %vm962_vm7, %v955_v27, 920167782  ;;  %v971_v19 = vsel %vm959_vm4, %v949_v56, %v952_v40 }
  0xc1   :  { %v2779_v5 = vadd.s32 4294967294, %v331_v28  ;;  %v969_v31 = vsel %vm961_vm6, %v952_v40, %v968_v22  ;;  %v972_v33 = vsel %vm962_vm7, %v958_v57, 1326507024  ;;  %v963_v3 = vsel %vm959_vm4, %v943_v44, %v946_v4 }
  0xc2   :  { %v965_v29 = vsel %vm961_vm6, %v949_v56, %v964_v50  ;;  %v970_v7 = vsel %vm960_vm5, %v967_v23, %v969_v31  ;;  %v973_v17 = vsel %vm961_vm6, %v955_v27, %v972_v33  ;;  %v2810_v52 = vadd.s32 4294967169, %v1144_v34 }
  0xc3   :  { %vm2780_vm8 = vcmp.lt.s32.totalorder %v2779_v5, 0  ;;  %v141_v10 = vsel %vm58_vm2, %v140_v13, %v139_v9  ;;  %v974_v48 = vsel %vm960_vm5, %v971_v19, %v973_v17  ;;  %v966_v59 = vsel %vm960_vm5, %v963_v3, %v965_v29 }
  0xc4   :  { %v334_v46 = vsel %vm2780_vm8, 0, %v2779_v5  ;;  %v3618_v0 = vmul.u32.u64.low %v975_v53, %v974_v48  ;;  %v3619_v26 = vmul.u32.u64.high %v975_v53, %v974_v48, %v3618_v0  ;;  %v1150_v61 = vadd.s32 1, %v2810_v52 }
  0xc5   :  { %v335_v54 = vsub.s32 32, %v334_v46  ;;  %v336_v20 = vshll.u32 %v327_v11, %v334_v46  ;;  %v339_v36 = vsub.s32 4294967266, %v334_v46  ;;  %v143_v6 = vsel %vm58_vm2, %v142_v15, %v3522_v49 }
  0xc6   :  { %v3621_v11 = vmul.u32.u64.low %v975_v53, %v970_v7  ;;  %v3622_v43 = vmul.u32.u64.high %v975_v53, %v970_v7, %v3621_v11  ;;  %v349_v51 = vsub.s32 4, %v3578_v25  ;;  %vm1151_vm9 = vcmp.gt.s32.totalorder %v1150_v61, 0 }
  0xc7   :  { %v337_v38 = vshrl.u32 %v319_v63, %v335_v54  ;;  %v340_v60 = vadd.s32 127, %v339_v36  ;;  %v3629_v63 = vld [vmem:[#allocation5] sm:$0xff]  ;;  %v982_v28 = vmul.u32 %v975_v53, %v966_v59  ;;  %vm265_vm11 = vcmp.lt.s32.totalorder %v3637_v45, 0 }
  0xc8   :  { %v144_v9 = vsel %vm3600_vm3, %v3629_v63, %v141_v10  ;;  %vm984_vm10 = vc.u32 %v3619_v26, %v3621_v11  ;;  %v985_v49 = vadd.s32 1, %v3622_v43  ;;  %v145_v15 = vsel %vm3600_vm3, 0, %v143_v6 }
  0xc9   :  { %v338_v12 = vor.u32 %v337_v38, %v336_v20  ;;  %v341_v55 = vshll.u32 %v340_v60, 23  ;;  %2952 = vcosq.f32 %v144_v9  ;;  %v1140_v8 = vand.u32 2147483647, %v3584_v18 }
  0xca   :  { %2954 = vsinq.f32 %v144_v9  ;;  %v1152_v14 = vsel %vm1151_vm9, %v1150_v61, 0  ;;  %v350_v40 = vsel %vm265_vm11, %v349_v51, %v3578_v25  ;;  %v986_v53 = vsel %vm984_vm10, %v985_v49, %v3622_v43 }
  0xcb   :  { %v342_v4 = vor.u32 4788187, %v341_v55  ;;  %v345_v56 = vcvt.s32.f32 %v338_v12  ;;  %v987_v34 = vadd.s32 %v986_v53, %v982_v28  ;;  %v1154_v5 = vand.u32 31, %v1152_v14 }
  0xcc   :  { %v252_v44 = vadd.s32 3, %v145_v15  ;;  %vm3650_vm12 = vcmp.le.f32.partialorder %v263_v62, 0.7853982  ;;  %v3655_v57 = vmul.f32 0.22254816, %v3282_v16  ;;  %v3663_v22 = vshrl.u32 %v1152_v14, 5 }
  0xcd   :  { %v343_v42 = vand.u32 2147483647, %v342_v4  ;;  %v3659_v13 = vsel %vm3650_vm12, 0, %v350_v40  ;;  %v988_v25 = vadd.s32 536870912, %v987_v34  ;;  %v1147_v50 = vand.u32 8388607, %v1140_v8 }
  0xce   :  { %v1155_v23 = vsub.s32 32, %v1154_v5  ;;  %v1157_v41 = vshll.u32 %v3083_v30, %v1154_v5  ;;  %v1160_v62 = vshll.u32 %v3084_v32, %v1154_v5  ;;  %v1166_v46 = vshll.u32 %v3086_v37, %v1154_v5 }
  0xcf   :  { %v346_v21 = vmul.f32 %v345_v56, %v343_v42  ;;  %v989_v19 = vshrl.u32 %v988_v25, 30  ;;  %v1163_v54 = vshll.u32 %v3085_v35, %v1154_v5  ;;  %v1169_v29 = vshll.u32 %v3087_v39, %v1154_v5 }
  0xd0   :  { %v1158_v33 = vshrl.u32 %v3084_v32, %v1155_v23  ;;  %v1161_v20 = vshrl.u32 %v3085_v35, %v1155_v23  ;;  %v1164_v36 = vshrl.u32 %v3086_v37, %v1155_v23  ;;  %v1167_v3 = vshrl.u32 %v3087_v39, %v1155_v23 }
  0xd1   :  { %v347_v58 = vxor.u32 2147483648, %v346_v21  ;;  %v3676_v7 = vand.u32 3, %v145_v15  ;;  %v3678_v17 = vand.u32 3, %v252_v44  ;;  %v990_v52 = vshll.u32 %v989_v19, 30 }
  0xd2   :  { %v3681_v10 = vmul.f32 10.904121, %v3121_v1  ;;  %v1148_v60 = vor.u32 8388608, %v1147_v50  ;;  %v1168_v48 = vor.u32 %v1167_v3, %v1166_v46  ;;  %v1170_v0 = vshrl.u32 %v3088_v47, %v1155_v23 }
  0xd3   :  { %v348_v31 = vsel %vm265_vm11, %v347_v58, %v346_v21  ;;  %v3688_v43 = vadd.s32 3, %v3659_v13  ;;  %vm929_vm13 = vcmp.lt.s32.totalorder %v3548_v2, 0  ;;  %v3691_v12 = vsub.s32 %v987_v34, %v990_v52 }
  0xd4   :  { %v351_v38 = vsel %vm3650_vm12, %v3637_v45, %v348_v31  ;;  %v1159_v55 = vor.u32 %v1158_v33, %v1157_v41  ;;  %v1162_v59 = vor.u32 %v1161_v20, %v1160_v62  ;;  %v1165_v61 = vor.u32 %v1164_v36, %v1163_v54 }
  0xd5   :  { %v1171_v6 = vor.u32 %v1170_v0, %v1169_v29  ;;  %vm1172_vm14 = vcmp.lt.s32.totalorder %v3663_v22, 1  ;;  %vm1175_vm15 = vcmp.lt.s32.totalorder %v3663_v22, 4  ;;  %vm154_vm0 = vcmp.eq.s32.totalorder %v3676_v7, 2 }
  0xd6   :  { %v3695_v9 = vpop.eup %2952  ;;  %vm255_vm1 = vcmp.eq.s32.totalorder %v3678_v17, 0  ;;  %vm258_vm2 = vcmp.eq.s32.totalorder %v3678_v17, 2  ;;  %2956 = vcosq.f32 %v351_v38  ;;  %v993_v4 = vsub.s32 0, %v3691_v12 }
  0xd7   :  { %v1156_v56 = vshrl.u32 %v3083_v30, %v1155_v23  ;;  %vm1174_vm3 = vcmp.lt.s32.totalorder %v3663_v22, 3  ;;  %v2955_v51 = vpop.eup %2954  ;;  %2958 = vsinq.f32 %v351_v38  ;;  %v1181_v28 = vsel %vm1175_vm15, %v1168_v48, 920167782 }
  0xd8   :  { %v3705_v42 = vshll.u32 %v1148_v60, 8  ;;  %v1356_v49 = vand.u32 2139095040, %v3681_v10  ;;  %vm151_vm4 = vcmp.eq.s32.totalorder %v3676_v7, 0  ;;  %v2803_v15 = vmin.u32 %v993_v4, %v3691_v12 }
  0xd9   :  { %vm1173_vm5 = vcmp.lt.s32.totalorder %v3663_v22, 2  ;;  %v1177_v14 = vsel %vm1175_vm15, %v1165_v61, 2102212464  ;;  %v1180_v21 = vsel %vm1172_vm14, %v1159_v55, %v1162_v59  ;;  %vm254_vm6 = vcmp.lt.s32.totalorder %v3678_v17, 2 }
  0xda   :  { %v1013_v40 = vsub.s32 4, %v989_v19  ;;  %v1182_v53 = vsel %vm1174_vm3, %v1165_v61, %v1181_v28  ;;  %v1184_v34 = vsel %vm1172_vm14, %v1162_v59, %v1165_v61  ;;  %v1185_v5 = vsel %vm1175_vm15, %v1171_v6, 1326507024 }
  0xdb   :  { %v152_v44 = vxor.u32 2147483648, %v2955_v51  ;;  %v155_v27 = vxor.u32 2147483648, %v3695_v9  ;;  %v995_v58 = vclz %v2803_v15  ;;  %v1176_v25 = vsel %vm1172_vm14, %v1156_v56, %v1159_v55 }
  0xdc   :  { %vm150_vm7 = vcmp.lt.s32.totalorder %v3676_v7, 2  ;;  %v1178_v50 = vsel %vm1174_vm3, %v1162_v59, %v1177_v14  ;;  %v1183_v23 = vsel %vm1173_vm5, %v1180_v21, %v1182_v53  ;;  %v1186_v41 = vsel %vm1174_vm3, %v1168_v48, %v1185_v5 }
  0xdd   :  { %v1357_v62 = vshrl.u32 %v1356_v49, 23  ;;  %vm148_vm8 = vweird.f32 %v3629_v63  ;;  %v2804_v46 = vadd.s32 4294967294, %v995_v58  ;;  %v1187_v31 = vsel %vm1173_vm5, %v1184_v34, %v1186_v41 }
  0xde   :  { %v3736_v33 = vmul.u32.u64.low %v3705_v42, %v1183_v23  ;;  %v3737_v54 = vmul.u32.u64.high %v3705_v42, %v1183_v23, %v3736_v33  ;;  %v1014_v20 = vsel %vm929_vm13, %v1013_v40, %v989_v19  ;;  %v3747_v52 = vand.u32 3, %v3659_v13 }
  0xdf   :  { %v3743_v36 = vmul.u32.u64.low %v3705_v42, %v1187_v31  ;;  %v3744_v3 = vmul.u32.u64.high %v3705_v42, %v1187_v31, %v3743_v36  ;;  %v2818_v29 = vadd.s32 4294967169, %v1357_v62  ;;  %vm3751_vm9 = vcmp.le.f32.partialorder %v927_v24, 0.7853982 }
  0xe0   :  { %v983_v60 = vadd.s32 %v3621_v11, %v3619_v26  ;;  %vm2805_vm10 = vcmp.lt.s32.totalorder %v2804_v46, 0  ;;  %v1179_v19 = vsel %vm1173_vm5, %v1176_v25, %v1178_v50  ;;  %v1353_v0 = vand.u32 2147483647, %v3681_v10 }
  0xe1   :  { %v998_v48 = vsel %vm2805_vm10, 0, %v2804_v46  ;;  %v1363_v55 = vadd.s32 1, %v2818_v29  ;;  %v1016_v24 = vsel %vm3751_vm9, 0, %v1014_v20  ;;  %v156_v6 = vsel %vm154_vm0, %v155_v27, %v2955_v51 }
  0xe2   :  { %v999_v59 = vsub.s32 32, %v998_v48  ;;  %v1000_v13 = vshll.u32 %v3691_v12, %v998_v48  ;;  %v1003_v61 = vsub.s32 4294967266, %v998_v48  ;;  %v257_v26 = vsel %vm255_vm1, %v3695_v9, %v152_v44 }
  0xe3   :  { %v260_v11 = vsel %vm258_vm2, %v155_v27, %v2955_v51  ;;  %v3771_v22 = vand.u32 3, %v3688_v43  ;;  %v1195_v12 = vmul.u32 %v3705_v42, %v1179_v19  ;;  %vm1197_vm11 = vc.u32 %v3744_v3, %v3736_v33  ;;  %v3776_v28 = vpop.eup %2956 }
  0xe4   :  { %v1001_v4 = vshrl.u32 %v983_v60, %v999_v59  ;;  %v1004_v56 = vadd.s32 127, %v1003_v61  ;;  %v153_v49 = vsel %vm151_vm4, %v3695_v9, %v152_v44  ;;  %v1020_v15 = vadd.s32 3, %v1016_v24  ;;  %v3782_v51 = vpop.eup %2958 }
  0xe5   :  { %v1198_v14 = vadd.s32 1, %v3737_v54  ;;  %vm1364_vm12 = vcmp.gt.s32.totalorder %v1363_v55, 0  ;;  %v261_v43 = vsel %vm254_vm6, %v257_v26, %v260_v11  ;;  %v1360_v40 = vand.u32 8388607, %v1353_v0 }
  0xe6   :  { %v1002_v21 = vor.u32 %v1001_v4, %v1000_v13  ;;  %v1005_v42 = vshll.u32 %v1004_v56, 23  ;;  %vm361_vm14 = vcmp.eq.s32.totalorder %v3747_v52, 2  ;;  %vm466_vm15 = vcmp.eq.s32.totalorder %v3771_v22, 2 }
  0xe7   :  { %v1199_v9 = vsel %vm1197_vm11, %v1198_v14, %v3737_v54  ;;  %v1365_v53 = vsel %vm1364_vm12, %v1363_v55, 0  ;;  %v3793_v34 = vsel %vm150_vm7, %v153_v49, %v156_v6  ;;  %vm358_vm0 = vcmp.eq.s32.totalorder %v3747_v52, 0 }
  0xe8   :  { %v1006_v17 = vor.u32 4788187, %v1005_v42  ;;  %v1009_v5 = vcvt.s32.f32 %v1002_v21  ;;  %v1200_v44 = vadd.s32 %v1199_v9, %v1195_v12  ;;  %v3798_v27 = vsel %vm148_vm8, nan, %v261_v43 }
  0xe9   :  { %v3800_v58 = vand.u32 3, %v1020_v15  ;;  %v3802_v25 = vand.u32 3, %v1016_v24  ;;  %v1367_v50 = vand.u32 31, %v1365_v53  ;;  %v1361_v62 = vor.u32 8388608, %v1360_v40 }
  0xea   :  { %v1007_v23 = vand.u32 2147483647, %v1006_v17  ;;  %v1201_v41 = vadd.s32 536870912, %v1200_v44  ;;  %v3805_v7 = vmul.f32 14.066194, %v3121_v1  ;;  %vm357_vm1 = vcmp.lt.s32.totalorder %v3747_v52, 2 }
  0xeb   :  { %v359_v46 = vxor.u32 2147483648, %v3782_v51  ;;  %v362_v31 = vxor.u32 2147483648, %v3776_v28  ;;  %vm463_vm2 = vcmp.eq.s32.totalorder %v3771_v22, 0  ;;  %v3811_v54 = vshrl.u32 %v1365_v53, 5 }
  0xec   :  { %v1368_v20 = vsub.s32 32, %v1367_v50  ;;  %v1010_v36 = vmul.f32 %v1009_v5, %v1007_v23  ;;  %v3813_v29 = vshrl.u32 %v1201_v41, 30  ;;  %v1370_v60 = vshll.u32 %v3083_v30, %v1367_v50 }
  0xed   :  { %v1373_v48 = vshll.u32 %v3084_v32, %v1367_v50  ;;  %v1376_v59 = vshll.u32 %v3085_v35, %v1367_v50  ;;  %v1379_v13 = vshll.u32 %v3086_v37, %v1367_v50  ;;  %vm462_vm3 = vcmp.lt.s32.totalorder %v3771_v22, 2 }
  0xee   :  { %v1371_v19 = vshrl.u32 %v3084_v32, %v1368_v20  ;;  %v1374_v55 = vshrl.u32 %v3085_v35, %v1368_v20  ;;  %v1011_v61 = vxor.u32 2147483648, %v1010_v36  ;;  %v1203_v24 = vshll.u32 %v3813_v29, 30 }
  0xef   :  { %v1377_v6 = vshrl.u32 %v3086_v37, %v1368_v20  ;;  %v1380_v26 = vshrl.u32 %v3087_v39, %v1368_v20  ;;  %v363_v11 = vsel %vm361_vm14, %v362_v31, %v3782_v51  ;;  %v468_v4 = vsel %vm466_vm15, %v362_v31, %v3782_v51 }
  0xf0   :  { %v1382_v56 = vshll.u32 %v3087_v39, %v1367_v50  ;;  %v1383_v12 = vshrl.u32 %v3088_v47, %v1368_v20  ;;  %vm355_vm4 = vweird.f32 %v3637_v45  ;;  %v1012_v49 = vsel %vm929_vm13, %v1011_v61, %v1010_v36 }
  0xf1   :  { %v1196_v15 = vadd.s32 %v3736_v33, %v3744_v3  ;;  %v3838_v14 = vsub.s32 %v1200_v44, %v1203_v24  ;;  %v1369_v43 = vshrl.u32 %v3083_v30, %v1368_v20  ;;  %v1015_v51 = vsel %vm3751_vm9, %v3548_v2, %v1012_v49 }
  0xf2   :  { %v1372_v21 = vor.u32 %v1371_v19, %v1370_v60  ;;  %v1375_v42 = vor.u32 %v1374_v55, %v1373_v48  ;;  %v1381_v40 = vor.u32 %v1380_v26, %v1379_v13  ;;  %2960 = vcosq.f32 %v1015_v51 }
  0xf3   :  { %vm1142_vm5 = vcmp.lt.s32.totalorder %v3584_v18, 0  ;;  %v1206_v9 = vsub.s32 0, %v3838_v14  ;;  %v1378_v53 = vor.u32 %v1377_v6, %v1376_v59  ;;  %vm1385_vm13 = vcmp.lt.s32.totalorder %v3811_v54, 1 }
  0xf4   :  { %v360_v33 = vsel %vm358_vm0, %v3776_v28, %v359_v46  ;;  %2962 = vsinq.f32 %v1015_v51  ;;  %v1384_v3 = vor.u32 %v1383_v12, %v1382_v56  ;;  %vm1388_vm6 = vcmp.lt.s32.totalorder %v3811_v54, 4 }
  0xf5   :  { %v2811_v38 = vmin.u32 %v1206_v9, %v3838_v14  ;;  %vm1386_vm7 = vcmp.lt.s32.totalorder %v3811_v54, 2  ;;  %vm1387_vm9 = vcmp.lt.s32.totalorder %v3811_v54, 3  ;;  %v1401_v17 = vshll.u32 %v1361_v62, 8 }
  0xf6   :  { %vm3856_vm10 = vcmp.le.f32.partialorder %v1140_v8, 0.7853982  ;;  %v1389_v44 = vsel %vm1385_vm13, %v1369_v43, %v1372_v21  ;;  %v1390_v50 = vsel %vm1388_vm6, %v1378_v53, 2102212464  ;;  %v1393_v23 = vsel %vm1385_vm13, %v1372_v21, %v1375_v42 }
  0xf7   :  { %v1394_v41 = vsel %vm1388_vm6, %v1381_v40, 920167782  ;;  %v364_v62 = vsel %vm357_vm1, %v360_v33, %v363_v11  ;;  %v465_v8 = vsel %vm463_vm2, %v3776_v28, %v359_v46  ;;  %v1208_v31 = vclz %v2811_v38 }
  0xf8   :  { %v1397_v20 = vsel %vm1385_vm13, %v1375_v42, %v1378_v53  ;;  %vm1129_vm11 = vcmp.eq.s32.totalorder %v3802_v25, 2  ;;  %v1226_v36 = vsub.s32 4, %v3813_v29  ;;  %v1391_v60 = vsel %vm1387_vm9, %v1375_v42, %v1390_v50 }
  0xf9   :  { %v1395_v48 = vsel %vm1387_vm9, %v1378_v53, %v1394_v41  ;;  %v1398_v52 = vsel %vm1388_vm6, %v1384_v3, 1326507024  ;;  %vm1126_vm12 = vcmp.eq.s32.totalorder %v3802_v25, 0  ;;  %v2812_v28 = vadd.s32 4294967294, %v1208_v31 }
  0xfa   :  { %v1392_v46 = vsel %vm1386_vm7, %v1389_v44, %v1391_v60  ;;  %v1396_v19 = vsel %vm1386_vm7, %v1393_v23, %v1395_v48  ;;  %v1399_v55 = vsel %vm1387_vm9, %v1381_v40, %v1398_v52  ;;  %v469_v59 = vsel %vm462_vm3, %v465_v8, %v468_v4 }
  0xfb   :  { %vm1022_vm14 = vcmp.lt.s32.totalorder %v3800_v58, 2  ;;  %vm1125_vm15 = vcmp.lt.s32.totalorder %v3802_v25, 2  ;;  %v1400_v13 = vsel %vm1386_vm7, %v1397_v20, %v1399_v55  ;;  %vm1019_vm0 = vweird.f32 %v3548_v2 }
  0xfc   :  { %v3896_v61 = vmul.u32.u64.low %v1401_v17, %v1396_v19  ;;  %v3897_v24 = vmul.u32.u64.high %v1401_v17, %v1396_v19, %v3896_v61  ;;  %vm2813_vm1 = vcmp.lt.s32.totalorder %v2812_v28, 0  ;;  %v1569_v22 = vand.u32 2139095040, %v3805_v7 }
  0xfd   :  { %v3901_v6 = vmul.u32.u64.low %v1401_v17, %v1400_v13  ;;  %v3902_v26 = vmul.u32.u64.high %v1401_v17, %v1400_v13, %v3901_v6  ;;  %v365_v11 = vsel %vm355_vm4, nan, %v364_v62  ;;  %v1211_v4 = vsel %vm2813_vm1, 0, %v2812_v28 }
  0xfe   :  { %v1227_v54 = vsel %vm1142_vm5, %v1226_v36, %v3813_v29  ;;  %v1408_v56 = vmul.u32 %v1401_v17, %v1392_v46  ;;  %v1212_v12 = vsub.s32 32, %v1211_v4  ;;  %v1213_v49 = vshll.u32 %v3838_v14, %v1211_v4 }
  0xff   :  { %v1216_v43 = vsub.s32 4294967266, %v1211_v4  ;;  %v1570_v51 = vshrl.u32 %v1569_v22, 23  ;;  %vm1023_vm2 = vcmp.eq.s32.totalorder %v3800_v58, 0  ;;  %vm1026_vm3 = vcmp.eq.s32.totalorder %v3800_v58, 2  ;;  %v2961_v29 = vpop.eup %2960 }
 0x100   :  { %v1411_v21 = vadd.s32 1, %v3897_v24  ;;  %v1566_v42 = vand.u32 2147483647, %v3805_v7  ;;  %v1214_v40 = vshrl.u32 %v1196_v15, %v1212_v12  ;;  %v1229_v53 = vsel %vm3856_vm10, 0, %v1227_v54 }
 0x101   :  { %v1217_v9 = vadd.s32 127, %v1216_v43  ;;  %vm1410_vm13 = vc.u32 %v3902_v26, %v3896_v61  ;;  %v3920_v14 = vmul.f32 %v365_v11, %v3798_v27  ;;  %v470_v33 = vsel %vm355_vm4, nan, %v469_v59  ;;  %v2963_v17 = vpop.eup %2962 }
 0x102   :  { %v1412_v3 = vsel %vm1410_vm13, %v1411_v21, %v3897_v24  ;;  %v2826_v38 = vadd.s32 4294967169, %v1570_v51  ;;  %v1027_v44 = vxor.u32 2147483648, %v2961_v29  ;;  %v1215_v15 = vor.u32 %v1214_v40, %v1213_v49 }
 0x103   :  { %v1218_v50 = vshll.u32 %v1217_v9, 23  ;;  %v1413_v23 = vadd.s32 %v1412_v3, %v1408_v56  ;;  %v1024_v41 = vxor.u32 2147483648, %v2963_v17  ;;  %v1233_v62 = vadd.s32 3, %v1229_v53 }
 0x104   :  { %v1573_v8 = vand.u32 8388607, %v1566_v42  ;;  %v1576_v31 = vadd.s32 1, %v2826_v38  ;;  %v1028_v20 = vsel %vm1026_vm3, %v1027_v44, %v2963_v17  ;;  %v1131_v45 = vsel %vm1129_vm11, %v1027_v44, %v2963_v17 }
 0x105   :  { %v1219_v36 = vor.u32 4788187, %v1218_v50  ;;  %v1222_v60 = vcvt.s32.f32 %v1215_v15  ;;  %v1025_v48 = vsel %vm1023_vm2, %v2961_v29, %v1024_v41  ;;  %v1128_v52 = vsel %vm1126_vm12, %v2961_v29, %v1024_v41 }
 0x106   :  { %v1414_v28 = vadd.s32 536870912, %v1413_v23  ;;  %vm1577_vm4 = vcmp.gt.s32.totalorder %v1576_v31, 0  ;;  %v1029_v46 = vsel %vm1022_vm14, %v1025_v48, %v1028_v20  ;;  %v1132_v19 = vsel %vm1125_vm15, %v1128_v52, %v1131_v45 }
 0x107   :  { %v1220_v55 = vand.u32 2147483647, %v1219_v36  ;;  %v1578_v59 = vsel %vm1577_vm4, %v1576_v31, 0  ;;  %v1030_v13 = vsel %vm1019_vm0, nan, %v1029_v46  ;;  %v1133_v24 = vsel %vm1019_vm0, nan, %v1132_v19 }
 0x108   :  { %v3943_v6 = vshrl.u32 %v1414_v28, 30  ;;  %v1778_v22 = vmul.f32 0.48860252, %v3920_v14  ;;  %v3949_v58 = vsel %vm148_vm8, nan, %v3793_v34  ;;  %v1134_v25 = vmul.f32 %v1030_v13, %v3655_v57 }
 0x109   :  { %v1223_v11 = vmul.f32 %v1222_v60, %v1220_v55  ;;  %v1580_v4 = vand.u32 31, %v1578_v59  ;;  %v3953_v54 = vmul.f32 %v470_v33, %v3798_v27  ;;  %v3956_v56 = vmul.f32 0.48860252, %v3949_v58 }
 0x10a   :  { %v3959_v2 = vmul.f32 0.12944561, %v3282_v16  ;;  %v1416_v12 = vshll.u32 %v3943_v6, 30  ;;  %v1135_v49 = vsub.f32 %v1134_v25, %v1133_v24  ;;  %v3962_v63 = vand.u32 3, %v1229_v53 }
 0x10b   :  { %v1224_v43 = vxor.u32 2147483648, %v1223_v11  ;;  %v1581_v34 = vsub.s32 32, %v1580_v4  ;;  %v3964_v51 = vand.u32 3, %v1233_v62  ;;  %v1574_v40 = vor.u32 8388608, %v1573_v8 }
 0x10c   :  { %v3966_v21 = vsub.s32 %v1413_v23, %v1416_v12  ;;  %v3968_v27 = vmul.f32 -1.0, %v1778_v22  ;;  %v1136_v9 = vmul.f32 %v1135_v49, %v3655_v57  ;;  %v3973_v33 = vshrl.u32 %v1578_v59, 5 }
 0x10d   :  { %v1225_v29 = vsel %vm1142_vm5, %v1224_v43, %v1223_v11  ;;  %v1780_v3 = vmul.f32 0.48860252, %v3953_v54  ;;  %v1583_v17 = vshll.u32 %v3083_v30, %v1580_v4  ;;  %v1586_v44 = vshll.u32 %v3084_v32, %v1580_v4 }
 0x10e   :  { %v1228_v53 = vsel %vm3856_vm10, %v3584_v18, %v1225_v29  ;;  %v1419_v38 = vsub.s32 0, %v3966_v21  ;;  %v1137_v15 = vmul.f32 6.510104, %v1136_v9  ;;  %v1584_v57 = vshrl.u32 %v3084_v32, %v1581_v34 }
 0x10f   :  { %2964 = vcosq.f32 %v1228_v53  ;;  %v1587_v50 = vshrl.u32 %v3085_v35, %v1581_v34  ;;  %v1409_v23 = vadd.s32 %v3896_v61, %v3902_v26  ;;  %v3987_v5 = vshll.u32 %v1574_v40, 8 }
 0x110   :  { %2966 = vsinq.f32 %v1228_v53  ;;  %v2819_v41 = vmin.u32 %v1419_v38, %v3966_v21  ;;  %v1782_v62 = vmul.f32 %v3956_v56, %v1137_v15  ;;  %v1582_v8 = vshrl.u32 %v3083_v30, %v1581_v34 }
 0x111   :  { %v1589_v31 = vshll.u32 %v3085_v35, %v1580_v4  ;;  %v3992_v20 = vmul.f32 -1.0, %v1780_v3  ;;  %v1585_v36 = vor.u32 %v1584_v57, %v1583_v17  ;;  %vm1598_vm8 = vcmp.lt.s32.totalorder %v3973_v33, 1 }
 0x112   :  { %v1421_v45 = vclz %v2819_v41  ;;  %vm1599_vm5 = vcmp.lt.s32.totalorder %v3973_v33, 2  ;;  %1784 = vst [vmem:[#allocation8 + $0x20] sm:$0xff] %v1782_v62  ;;  %v1588_v61 = vor.u32 %v1587_v50, %v1586_v44  ;;  %v1590_v26 = vshrl.u32 %v3086_v37, %v1581_v34 }
 0x113   :  { %v1592_v60 = vshll.u32 %v3086_v37, %v1580_v4  ;;  %v1593_v48 = vshrl.u32 %v3087_v39, %v1581_v34  ;;  %vm1239_vm6 = vcmp.eq.s32.totalorder %v3964_v51, 2  ;;  %vm1342_vm7 = vcmp.eq.s32.totalorder %v3962_v63, 2 }
 0x114   :  { %v2820_v52 = vadd.s32 4294967294, %v1421_v45  ;;  %v1595_v28 = vshll.u32 %v3087_v39, %v1580_v4  ;;  %v1596_v46 = vshrl.u32 %v3088_v47, %v1581_v34  ;;  %vm1600_vm9 = vcmp.lt.s32.totalorder %v3973_v33, 3 }
 0x115   :  { %v1591_v19 = vor.u32 %v1590_v26, %v1589_v31  ;;  %v1594_v55 = vor.u32 %v1593_v48, %v1592_v60  ;;  %vm1601_vm10 = vcmp.lt.s32.totalorder %v3973_v33, 4  ;;  %v1602_v59 = vsel %vm1598_vm8, %v1582_v8, %v1585_v36 }
 0x116   :  { %vm1338_vm11 = vcmp.lt.s32.totalorder %v3962_v63, 2  ;;  %vm2821_vm12 = vcmp.lt.s32.totalorder %v2820_v52, 0  ;;  %v1597_v13 = vor.u32 %v1596_v46, %v1595_v28  ;;  %v1606_v24 = vsel %vm1598_vm8, %v1585_v36, %v1588_v61 }
 0x117   :  { %v1794_v22 = vmul.f32 %v3968_v27, %v1137_v15  ;;  %vm1232_vm14 = vweird.f32 %v3584_v18  ;;  %vm1355_vm15 = vcmp.lt.s32.totalorder %v3681_v10, 0  ;;  %v1424_v25 = vsel %vm2821_vm12, 0, %v2820_v52 }
 0x118   :  { %v1603_v11 = vsel %vm1601_vm10, %v1591_v19, 2102212464  ;;  %v1607_v4 = vsel %vm1601_vm10, %v1594_v55, 920167782  ;;  %v1610_v12 = vsel %vm1598_vm8, %v1588_v61, %v1591_v19  ;;  %v1425_v49 = vsub.s32 32, %v1424_v25 }
 0x119   :  { %v1426_v43 = vshll.u32 %v3966_v21, %v1424_v25  ;;  %v1429_v34 = vsub.s32 4294967266, %v1424_v25  ;;  %v1604_v40 = vsel %vm1600_vm9, %v1588_v61, %v1603_v11  ;;  %1796 = vst [vmem:[#allocation8 + $0x40] sm:$0xff] %v1794_v22  ;;  %v1439_v9 = vsub.s32 4, %v3943_v6 }
 0x11a   :  { %v1608_v29 = vsel %vm1600_vm9, %v1591_v19, %v1607_v4  ;;  %v1611_v3 = vsel %vm1601_vm10, %v1597_v13, 1326507024  ;;  %v1806_v53 = vmul.f32 %v3992_v20, %v1137_v15  ;;  %vm4030_vm0 = vcmp.le.f32.partialorder %v1353_v0, 0.7853982 }
 0x11b   :  { %v1427_v21 = vshrl.u32 %v1409_v23, %v1425_v49  ;;  %v1430_v17 = vadd.s32 127, %v1429_v34  ;;  %v1609_v44 = vsel %vm1599_vm5, %v1606_v24, %v1608_v29  ;;  %v1612_v57 = vsel %vm1600_vm9, %v1594_v55, %v1611_v3 }
 0x11c   :  { %v1605_v50 = vsel %vm1599_vm5, %v1602_v59, %v1604_v40  ;;  %v1613_v15 = vsel %vm1599_vm5, %v1610_v12, %v1612_v57  ;;  %v4043_v41 = vmul.u32.u64.low %v3987_v5, %v1609_v44  ;;  %v4044_v0 = vmul.u32.u64.high %v3987_v5, %v1609_v44, %v4043_v41  ;;  %1808 = vst [vmem:[#allocation8 + $0x60] sm:$0xff] %v1806_v53  ;;  %v2965_v23 = vpop.eup %2964 }
 0x11d   :  { %v1428_v62 = vor.u32 %v1427_v21, %v1426_v43  ;;  %v1431_v8 = vshll.u32 %v1430_v17, 23  ;;  %v4048_v31 = vmul.u32.u64.low %v3987_v5, %v1613_v15  ;;  %v4049_v45 = vmul.u32.u64.high %v3987_v5, %v1613_v15, %v4048_v31  ;;  %v2967_v36 = vpop.eup %2966 }
 0x11e   :  { %vm1236_vm1 = vcmp.eq.s32.totalorder %v3964_v51, 0  ;;  %v1240_v61 = vxor.u32 2147483648, %v2965_v23  ;;  %vm1339_vm2 = vcmp.eq.s32.totalorder %v3962_v63, 0  ;;  %v4054_v33 = vmul.f32 5.763459, %v3121_v1 }
 0x11f   :  { %vm1235_vm3 = vcmp.lt.s32.totalorder %v3964_v51, 2  ;;  %v1237_v26 = vxor.u32 2147483648, %v2967_v36  ;;  %v1432_v60 = vor.u32 4788187, %v1431_v8  ;;  %v1435_v48 = vcvt.s32.f32 %v1428_v62 }
 0x120   :  { %v1241_v52 = vsel %vm1239_vm6, %v1240_v61, %v2967_v36  ;;  %v1344_v28 = vsel %vm1342_vm7, %v1240_v61, %v2967_v36  ;;  %v1621_v46 = vmul.u32 %v3987_v5, %v1605_v50  ;;  %v1624_v19 = vadd.s32 1, %v4044_v0 }
 0x121   :  { %v1238_v55 = vsel %vm1236_vm1, %v2965_v23, %v1237_v26  ;;  %v1341_v59 = vsel %vm1339_vm2, %v2965_v23, %v1237_v26  ;;  %v1433_v13 = vand.u32 2147483647, %v1432_v60  ;;  %v1440_v24 = vsel %vm1355_vm15, %v1439_v9, %v3943_v6 }
 0x122   :  { %v1242_v22 = vsel %vm1235_vm3, %v1238_v55, %v1241_v52  ;;  %v1345_v25 = vsel %vm1338_vm11, %v1341_v59, %v1344_v28  ;;  %vm1623_vm13 = vc.u32 %v4049_v45, %v4043_v41  ;;  %v1823_v51 = vand.u32 2139095040, %v4054_v33 }
 0x123   :  { %v1243_v5 = vsel %vm1232_vm14, nan, %v1242_v22  ;;  %v1346_v11 = vsel %vm1232_vm14, nan, %v1345_v25  ;;  %v1436_v4 = vmul.f32 %v1435_v48, %v1433_v13  ;;  %v1625_v12 = vsel %vm1623_vm13, %v1624_v19, %v4044_v0 }
 0x124   :  { %v1347_v6 = vmul.f32 %v1243_v5, %v3959_v2  ;;  %v1442_v63 = vsel %vm4030_vm0, 0, %v1440_v24  ;;  %v1626_v49 = vadd.s32 %v1625_v12, %v1621_v46  ;;  %v1824_v43 = vshrl.u32 %v1823_v51, 23 }
 0x125   :  { %v1437_v34 = vxor.u32 2147483648, %v1436_v4  ;;  %v1820_v40 = vand.u32 2147483647, %v4054_v33  ;;  %v1446_v53 = vadd.s32 3, %v1442_v63  ;;  %v4083_v21 = vmul.f32 9.095012, %v3121_v1 }
 0x126   :  { %v1348_v9 = vsub.f32 %v1347_v6, %v1346_v11  ;;  %v1627_v29 = vadd.s32 536870912, %v1626_v49  ;;  %v2834_v3 = vadd.s32 4294967169, %v1824_v43  ;;  %v4091_v62 = vand.u32 3, %v1442_v63 }
 0x127   :  { %v1438_v18 = vsel %vm1355_vm15, %v1437_v34, %v1436_v4  ;;  %v1827_v15 = vand.u32 8388607, %v1820_v40  ;;  %v2039_v8 = vand.u32 2139095040, %v4083_v21  ;;  %v4095_v31 = vand.u32 3, %v1446_v53 }
 0x128   :  { %v1349_v17 = vmul.f32 %v1348_v9, %v3959_v2  ;;  %v1441_v44 = vsel %vm4030_vm0, %v3681_v10, %v1438_v18  ;;  %v1628_v57 = vshrl.u32 %v1627_v29, 30  ;;  %v1830_v50 = vadd.s32 1, %v2834_v3 }
 0x129   :  { %2968 = vcosq.f32 %v1441_v44  ;;  %v4101_v61 = vmul.f32 0.091708444, %v3282_v16  ;;  %v1828_v60 = vor.u32 8388608, %v1827_v15  ;;  %v4105_v52 = vmul.f32 0.071092434, %v3282_v16 }
 0x12a   :  { %v1350_v0 = vmul.f32 11.016308, %v1349_v17  ;;  %2970 = vsinq.f32 %v1441_v44  ;;  %v1629_v23 = vshll.u32 %v1628_v57, 30  ;;  %vm1831_vm4 = vcmp.gt.s32.totalorder %v1830_v50, 0 }
 0x12b   :  { %v1832_v48 = vsel %vm1831_vm4, %v1830_v50, 0  ;;  %vm1568_vm8 = vcmp.lt.s32.totalorder %v3805_v7, 0  ;;  %v1652_v46 = vsub.s32 4, %v1628_v57  ;;  %vm1552_vm5 = vcmp.eq.s32.totalorder %v4091_v62, 0 }
 0x12c   :  { %v1785_v2 = vmul.f32 %v3956_v56, %v1350_v0  ;;  %v4097_v38 = vsub.s32 %v1626_v49, %v1629_v23  ;;  %v1797_v36 = vmul.f32 %v3968_v27, %v1350_v0  ;;  %v1809_v26 = vmul.f32 %v3992_v20, %v1350_v0 }
 0x12d   :  { %vm1555_vm6 = vcmp.eq.s32.totalorder %v4091_v62, 2  ;;  %v1834_v19 = vand.u32 31, %v1832_v48  ;;  %v2040_v55 = vshrl.u32 %v2039_v8, 23  ;;  %vm1448_vm7 = vcmp.lt.s32.totalorder %v4095_v31, 2 }
 0x12e   :  { %1787 = vst [vmem:[#allocation8 + $0x28] sm:$0xff] %v1785_v2  ;;  %v1632_v28 = vsub.s32 0, %v4097_v38  ;;  %1799 = vst [vmem:[#allocation8 + $0x48] sm:$0xff] %v1797_v36  ;;  %vm1449_vm9 = vcmp.eq.s32.totalorder %v4095_v31, 0  ;;  %vm1452_vm10 = vcmp.eq.s32.totalorder %v4095_v31, 2  ;;  %vm1551_vm11 = vcmp.lt.s32.totalorder %v4091_v62, 2 }
 0x12f   :  { %1811 = vst [vmem:[#allocation8 + $0x68] sm:$0xff] %v1809_v26  ;;  %v1622_v59 = vadd.s32 %v4043_v41, %v4049_v45  ;;  %vm1445_vm12 = vweird.f32 %v3681_v10  ;;  %v1835_v24 = vsub.s32 32, %v1834_v19  ;;  %v1837_v22 = vshll.u32 %v3083_v30, %v1834_v19 }
 0x130   :  { %v2827_v13 = vmin.u32 %v1632_v28, %v4097_v38  ;;  %v4120_v25 = vshll.u32 %v1828_v60, 8  ;;  %v2036_v51 = vand.u32 2147483647, %v4083_v21  ;;  %v4125_v11 = vsel %vm1568_vm8, %v1652_v46, %v1628_v57 }
 0x131   :  { %v4127_v4 = vshrl.u32 %v1832_v48, 5  ;;  %v1840_v41 = vshll.u32 %v3084_v32, %v1834_v19  ;;  %v1838_v45 = vshrl.u32 %v3084_v32, %v1835_v24  ;;  %v1841_v12 = vshrl.u32 %v3085_v35, %v1835_v24 }
 0x132   :  { %v1634_v5 = vclz %v2827_v13  ;;  %v1843_v6 = vshll.u32 %v3085_v35, %v1834_v19  ;;  %v2842_v63 = vadd.s32 4294967169, %v2040_v55  ;;  %v1844_v43 = vshrl.u32 %v3086_v37, %v1835_v24 }
 0x133   :  { %v1846_v34 = vshll.u32 %v3086_v37, %v1834_v19  ;;  %v1847_v9 = vshrl.u32 %v3087_v39, %v1835_v24  ;;  %v1836_v29 = vshrl.u32 %v3083_v30, %v1835_v24  ;;  %v1839_v3 = vor.u32 %v1838_v45, %v1837_v22 }
 0x134   :  { %v2828_v49 = vadd.s32 4294967294, %v1634_v5  ;;  %v1849_v18 = vshll.u32 %v3087_v39, %v1834_v19  ;;  %v1850_v53 = vshrl.u32 %v3088_v47, %v1835_v24  ;;  %v1842_v44 = vor.u32 %v1841_v12, %v1840_v41 }
 0x135   :  { %v1845_v57 = vor.u32 %v1844_v43, %v1843_v6  ;;  %v1848_v50 = vor.u32 %v1847_v9, %v1846_v34  ;;  %vm1852_vm15 = vcmp.lt.s32.totalorder %v4127_v4, 1  ;;  %vm1853_vm0 = vcmp.lt.s32.totalorder %v4127_v4, 2 }
 0x136   :  { %v2969_v17 = vpop.eup %2968  ;;  %vm2829_vm14 = vcmp.lt.s32.totalorder %v2828_v49, 0  ;;  %v1851_v8 = vor.u32 %v1850_v53, %v1849_v18  ;;  %vm1855_vm1 = vcmp.lt.s32.totalorder %v4127_v4, 4  ;;  %vm1854_vm2 = vcmp.lt.s32.totalorder %v4127_v4, 3 }
 0x137   :  { %v2971_v15 = vpop.eup %2970  ;;  %v1453_v0 = vxor.u32 2147483648, %v2969_v17  ;;  %v1637_v23 = vsel %vm2829_vm14, 0, %v2828_v49  ;;  %v1857_v22 = vsel %vm1855_vm1, %v1845_v57, 2102212464  ;;  %v1856_v31 = vsel %vm1852_vm15, %v1836_v29, %v1839_v3 }
 0x138   :  { %v1450_v2 = vxor.u32 2147483648, %v2971_v15  ;;  %v1638_v36 = vsub.s32 32, %v1637_v23  ;;  %v1639_v26 = vshll.u32 %v4097_v38, %v1637_v23  ;;  %v1642_v60 = vsub.s32 4294967266, %v1637_v23 }
 0x139   :  { %v1454_v48 = vsel %vm1452_vm10, %v1453_v0, %v2971_v15  ;;  %v1557_v28 = vsel %vm1555_vm6, %v1453_v0, %v2971_v15  ;;  %v1860_v62 = vsel %vm1852_vm15, %v1839_v3, %v1842_v44  ;;  %v1861_v6 = vsel %vm1855_vm1, %v1848_v50, 920167782 }
 0x13a   :  { %v1451_v46 = vsel %vm1449_vm9, %v2969_v17, %v1450_v2  ;;  %v1554_v19 = vsel %vm1552_vm5, %v2969_v17, %v1450_v2  ;;  %v1640_v55 = vshrl.u32 %v1622_v59, %v1638_v36  ;;  %v1643_v13 = vadd.s32 127, %v1642_v60 }
 0x13b   :  { %v1455_v38 = vsel %vm1448_vm7, %v1451_v46, %v1454_v48  ;;  %v1558_v24 = vsel %vm1551_vm11, %v1554_v19, %v1557_v28  ;;  %v1858_v34 = vsel %vm1854_vm2, %v1842_v44, %v1857_v22  ;;  %v1862_v10 = vsel %vm1854_vm2, %v1845_v57, %v1861_v6 }
 0x13c   :  { %v1456_v5 = vsel %vm1445_vm12, nan, %v1455_v38  ;;  %v1559_v41 = vsel %vm1445_vm12, nan, %v1558_v24  ;;  %v1641_v45 = vor.u32 %v1640_v55, %v1639_v26  ;;  %v1644_v59 = vshll.u32 %v1643_v13, 23 }
 0x13d   :  { %v1560_v12 = vmul.f32 %v1456_v5, %v4101_v61  ;;  %v1863_v18 = vsel %vm1853_vm0, %v1860_v62, %v1862_v10  ;;  %v1864_v29 = vsel %vm1852_vm15, %v1842_v44, %v1845_v57  ;;  %v1865_v3 = vsel %vm1855_vm1, %v1851_v8, 1326507024 }
 0x13e   :  { %v1645_v49 = vor.u32 4788187, %v1644_v59  ;;  %v1648_v43 = vcvt.s32.f32 %v1641_v45  ;;  %v1866_v17 = vsel %vm1854_vm2, %v1848_v50, %v1865_v3  ;;  %v1859_v2 = vsel %vm1853_vm0, %v1856_v31, %v1858_v34 }
 0x13f   :  { %v1561_v9 = vsub.f32 %v1560_v12, %v1559_v41  ;;  %v4182_v15 = vmul.u32.u64.low %v4120_v25, %v1863_v18  ;;  %v4183_v0 = vmul.u32.u64.high %v4120_v25, %v1863_v18, %v4182_v15  ;;  %v1867_v44 = vsel %vm1853_vm0, %v1864_v29, %v1866_v17 }
 0x140   :  { %v1646_v53 = vand.u32 2147483647, %v1645_v49  ;;  %v2046_v57 = vadd.s32 1, %v2842_v63  ;;  %vm4193_vm3 = vcmp.le.f32.partialorder %v1566_v42, 0.7853982  ;;  %v1875_v42 = vmul.u32 %v4120_v25, %v1859_v2 }
 0x141   :  { %v1562_v23 = vmul.f32 %v1561_v9, %v4101_v61  ;;  %v4198_v36 = vmul.u32.u64.low %v4120_v25, %v1867_v44  ;;  %v4199_v26 = vmul.u32.u64.high %v4120_v25, %v1867_v44, %v4198_v36  ;;  %v1655_v61 = vsel %vm4193_vm3, 0, %v4125_v11 }
 0x142   :  { %v1649_v50 = vmul.f32 %v1648_v43, %v1646_v53  ;;  %v2043_v4 = vand.u32 8388607, %v2036_v51  ;;  %vm2047_vm13 = vcmp.gt.s32.totalorder %v2046_v57, 0  ;;  %v1878_v48 = vadd.s32 1, %v4183_v0 }
 0x143   :  { %v1563_v60 = vmul.f32 15.485469, %v1562_v23  ;;  %v2048_v28 = vsel %vm2047_vm13, %v2046_v57, 0  ;;  %v1659_v38 = vadd.s32 3, %v1655_v61  ;;  %vm1877_vm4 = vc.u32 %v4199_v26, %v4182_v15 }
 0x144   :  { %v1650_v63 = vxor.u32 2147483648, %v1649_v50  ;;  %v4211_v13 = vshrl.u32 %v2048_v28, 5  ;;  %v2050_v24 = vand.u32 31, %v2048_v28  ;;  %v1879_v22 = vsel %vm1877_vm4, %v1878_v48, %v4183_v0 }
 0x145   :  { %v1788_v46 = vmul.f32 %v3956_v56, %v1563_v60  ;;  %v1800_v19 = vmul.f32 %v3968_v27, %v1563_v60  ;;  %v1812_v55 = vmul.f32 %v3992_v20, %v1563_v60  ;;  %v2044_v5 = vor.u32 8388608, %v2043_v4 }
 0x146   :  { %v1651_v11 = vsel %vm1568_vm8, %v1650_v63, %v1649_v50  ;;  %vm2068_vm5 = vcmp.lt.s32.totalorder %v4211_v13, 1  ;;  %v1880_v41 = vadd.s32 %v1879_v22, %v1875_v42  ;;  %v2051_v45 = vsub.s32 32, %v2050_v24 }
 0x147   :  { %1790 = vst [vmem:[#allocation8 + $0x30] sm:$0xff] %v1788_v46  ;;  %v1654_v25 = vsel %vm4193_vm3, %v3805_v7, %v1651_v11  ;;  %1802 = vst [vmem:[#allocation8 + $0x50] sm:$0xff] %v1800_v19  ;;  %v2053_v59 = vshll.u32 %v3083_v30, %v2050_v24  ;;  %v2056_v12 = vshll.u32 %v3084_v32, %v2050_v24  ;;  %vm2070_vm8 = vcmp.lt.s32.totalorder %v4211_v13, 3 }
 0x148   :  { %1814 = vst [vmem:[#allocation8 + $0x70] sm:$0xff] %v1812_v55  ;;  %2972 = vcosq.f32 %v1654_v25  ;;  %v2059_v31 = vshll.u32 %v3085_v35, %v2050_v24  ;;  %v2062_v62 = vshll.u32 %v3086_v37, %v2050_v24  ;;  %v1881_v6 = vadd.s32 536870912, %v1880_v41 }
 0x149   :  { %2974 = vsinq.f32 %v1654_v25  ;;  %v2052_v49 = vshrl.u32 %v3083_v30, %v2051_v45  ;;  %v2054_v43 = vshrl.u32 %v3084_v32, %v2051_v45  ;;  %v2057_v34 = vshrl.u32 %v3085_v35, %v2051_v45 }
 0x14a   :  { %v2060_v10 = vshrl.u32 %v3086_v37, %v2051_v45  ;;  %v2063_v9 = vshrl.u32 %v3087_v39, %v2051_v45  ;;  %v2065_v18 = vshll.u32 %v3087_v39, %v2050_v24  ;;  %v2066_v29 = vshrl.u32 %v3088_v47, %v2051_v45 }
 0x14b   :  { %v4233_v3 = vshrl.u32 %v1881_v6, 30  ;;  %v2055_v53 = vor.u32 %v2054_v43, %v2053_v59  ;;  %v2058_v17 = vor.u32 %v2057_v34, %v2056_v12  ;;  %vm2071_vm6 = vcmp.lt.s32.totalorder %v4211_v13, 4 }
 0x14c   :  { %v2061_v0 = vor.u32 %v2060_v10, %v2059_v31  ;;  %v2064_v23 = vor.u32 %v2063_v9, %v2062_v62  ;;  %v2067_v2 = vor.u32 %v2066_v29, %v2065_v18  ;;  %vm2069_vm7 = vcmp.lt.s32.totalorder %v4211_v13, 2 }
 0x14d   :  { %v1883_v44 = vshll.u32 %v4233_v3, 30  ;;  %v2076_v57 = vsel %vm2068_vm5, %v2055_v53, %v2058_v17  ;;  %v2084_v8 = vshll.u32 %v2044_v5, 8  ;;  %v1660_v63 = vand.u32 3, %v1659_v38 }
 0x14e   :  { %v2073_v50 = vsel %vm2071_vm6, %v2061_v0, 2102212464  ;;  %v2077_v36 = vsel %vm2071_vm6, %v2064_v23, 920167782  ;;  %v2080_v60 = vsel %vm2068_vm5, %v2058_v17, %v2061_v0  ;;  %v2081_v4 = vsel %vm2071_vm6, %v2067_v2, 1326507024 }
 0x14f   :  { %v1763_v42 = vand.u32 3, %v1655_v61  ;;  %v4243_v48 = vsub.s32 %v1880_v41, %v1883_v44  ;;  %v2078_v28 = vsel %vm2070_vm8, %v2061_v0, %v2077_v36  ;;  %v2072_v46 = vsel %vm2068_vm5, %v2052_v49, %v2055_v53 }
 0x150   :  { %v2074_v19 = vsel %vm2070_vm8, %v2058_v17, %v2073_v50  ;;  %v2079_v55 = vsel %vm2069_vm7, %v2076_v57, %v2078_v28  ;;  %v2082_v11 = vsel %vm2070_vm8, %v2064_v23, %v2081_v4  ;;  %vm1658_vm9 = vweird.f32 %v3805_v7 }
 0x151   :  { %v4257_v61 = vmul.f32 3.0, %v3949_v58  ;;  %v1886_v38 = vsub.s32 0, %v4243_v48  ;;  %v2083_v24 = vsel %vm2069_vm7, %v2080_v60, %v2082_v11  ;;  %vm1764_vm10 = vcmp.lt.s32.totalorder %v1763_v42, 2 }
 0x152   :  { %v4262_v25 = vmul.u32.u64.low %v2084_v8, %v2083_v24  ;;  %v4263_v22 = vmul.u32.u64.high %v2084_v8, %v2083_v24, %v4262_v25  ;;  %v4265_v5 = vmul.u32.u64.low %v2084_v8, %v2079_v55  ;;  %v4266_v41 = vmul.u32.u64.high %v2084_v8, %v2079_v55, %v4265_v5 }
 0x153   :  { %vm1822_vm11 = vcmp.lt.s32.totalorder %v4054_v33, 0  ;;  %v2835_v45 = vmin.u32 %v1886_v38, %v4243_v48  ;;  %v2075_v59 = vsel %vm2069_vm7, %v2072_v46, %v2074_v19  ;;  %v4274_v12 = vmul.f32 12.322941, %v3121_v1 }
 0x154   :  { %vm1661_vm12 = vcmp.lt.s32.totalorder %v1660_v63, 2  ;;  %vm1665_vm14 = vcmp.eq.s32.totalorder %v1660_v63, 2  ;;  %vm1765_vm15 = vcmp.eq.s32.totalorder %v1763_v42, 0  ;;  %vm1768_vm0 = vcmp.eq.s32.totalorder %v1763_v42, 2 }
 0x155   :  { %v2973_v31 = vpop.eup %2972  ;;  %vm1662_vm1 = vcmp.eq.s32.totalorder %v1660_v63, 0  ;;  %v1888_v49 = vclz %v2835_v45  ;;  %v2252_v43 = vand.u32 2147483647, %v4274_v12  ;;  %v1876_v10 = vadd.s32 %v4182_v15, %v4199_v26 }
 0x156   :  { %v2975_v62 = vpop.eup %2974  ;;  %v1666_v6 = vxor.u32 2147483648, %v2973_v31  ;;  %v2091_v13 = vmul.u32 %v2084_v8, %v2075_v59  ;;  %vm2093_vm2 = vc.u32 %v4263_v22, %v4265_v5  ;;  %v2094_v53 = vadd.s32 1, %v4266_v41 }
 0x157   :  { %v1663_v34 = vxor.u32 2147483648, %v2975_v62  ;;  %v2836_v29 = vadd.s32 4294967294, %v1888_v49  ;;  %v1906_v23 = vsub.s32 4, %v4233_v3  ;;  %v2255_v2 = vand.u32 2139095040, %v4274_v12 }
 0x158   :  { %v1667_v9 = vsel %vm1665_vm14, %v1666_v6, %v2975_v62  ;;  %v1770_v18 = vsel %vm1768_vm0, %v1666_v6, %v2975_v62  ;;  %v2095_v26 = vsel %vm2093_vm2, %v2094_v53, %v4266_v41  ;;  %v473_v42 = vmul.f32 %v4257_v61, %v3949_v58 }
 0x159   :  { %v1664_v17 = vsel %vm1662_vm1, %v2973_v31, %v1663_v34  ;;  %v1767_v0 = vsel %vm1765_vm15, %v2973_v31, %v1663_v34  ;;  %vm2837_vm3 = vcmp.lt.s32.totalorder %v2836_v29, 0  ;;  %v2096_v36 = vadd.s32 %v2095_v26, %v2091_v13 }
 0x15a   :  { %v1668_v44 = vsel %vm1661_vm12, %v1664_v17, %v1667_v9  ;;  %v1771_v15 = vsel %vm1764_vm10, %v1767_v0, %v1770_v18  ;;  %v1891_v50 = vsel %vm2837_vm3, 0, %v2836_v29  ;;  %v1907_v46 = vsel %vm1822_vm11, %v1906_v23, %v4233_v3 }
 0x15b   :  { %v1669_v57 = vsel %vm1658_vm9, nan, %v1668_v44  ;;  %v1772_v8 = vsel %vm1658_vm9, nan, %v1771_v15  ;;  %v1892_v4 = vsub.s32 32, %v1891_v50  ;;  %v1893_v28 = vshll.u32 %v4243_v48, %v1891_v50 }
 0x15c   :  { %v1773_v60 = vmul.f32 %v1669_v57, %v4105_v52  ;;  %v1896_v63 = vsub.s32 4294967266, %v1891_v50  ;;  %v2097_v19 = vadd.s32 536870912, %v2096_v36  ;;  %v2256_v55 = vshrl.u32 %v2255_v2, 23 }
 0x15d   :  { %v1894_v7 = vshrl.u32 %v1876_v10, %v1892_v4  ;;  %vm4301_vm13 = vcmp.le.f32.partialorder %v1820_v40, 0.7853982  ;;  %v2259_v58 = vand.u32 8388607, %v2252_v43  ;;  %v2785_v31 = vadd.f32 -1.0, %v473_v42 }
 0x15e   :  { %v1774_v11 = vsub.f32 %v1773_v60, %v1772_v8  ;;  %v1897_v38 = vadd.s32 127, %v1896_v63  ;;  %v2098_v48 = vshrl.u32 %v2097_v19, 30  ;;  %v2850_v25 = vadd.s32 4294967169, %v2256_v55 }
 0x15f   :  { %v1895_v45 = vor.u32 %v1894_v7, %v1893_v28  ;;  %v1909_v59 = vsel %vm4301_vm13, 0, %v1907_v46  ;;  %v4311_v10 = vmul.f32 15.514603, %v3121_v1  ;;  %v2260_v18 = vor.u32 8388608, %v2259_v58 }
 0x160   :  { %v1775_v41 = vmul.f32 %v1774_v11, %v4105_v52  ;;  %v1898_v3 = vshll.u32 %v1897_v38, 23  ;;  %v2099_v62 = vshll.u32 %v2098_v48, 30  ;;  %v2262_v6 = vadd.s32 1, %v2850_v25 }
 0x161   :  { %v1902_v34 = vcvt.s32.f32 %v1895_v45  ;;  %v1913_v13 = vadd.s32 3, %v1909_v59  ;;  %v4318_v0 = vmul.f32 0.5, %v2785_v31  ;;  %v4322_v1 = vmul.f32 0.17350692, %v3282_v16 }
 0x162   :  { %v1776_v49 = vmul.f32 19.942808, %v1775_v41  ;;  %v1899_v40 = vor.u32 4788187, %v1898_v3  ;;  %v4313_v9 = vsub.s32 %v2096_v36, %v2099_v62  ;;  %vm2263_vm4 = vcmp.gt.s32.totalorder %v2262_v6, 0 }
 0x163   :  { %v2264_v2 = vsel %vm2263_vm4, %v2262_v6, 0  ;;  %v2122_v15 = vsub.s32 4, %v2098_v48  ;;  %v4325_v26 = vand.u32 3, %v1909_v59  ;;  %vm2038_vm5 = vcmp.lt.s32.totalorder %v4083_v21, 0 }
 0x164   :  { %v1791_v52 = vmul.f32 %v3956_v56, %v1776_v49  ;;  %v1803_v29 = vmul.f32 %v3968_v27, %v1776_v49  ;;  %v1815_v53 = vmul.f32 %v3992_v20, %v1776_v49  ;;  %v1900_v17 = vand.u32 2147483647, %v1899_v40 }
 0x165   :  { %v2102_v23 = vsub.s32 0, %v4313_v9  ;;  %v2471_v56 = vand.u32 2139095040, %v4311_v10  ;;  %v2266_v20 = vand.u32 31, %v2264_v2  ;;  %v4329_v8 = vand.u32 3, %v1913_v13 }
 0x166   :  { %1793 = vst [vmem:[#allocation8 + $0x38] sm:$0xff] %v1791_v52  ;;  %1805 = vst [vmem:[#allocation8 + $0x58] sm:$0xff] %v1803_v29  ;;  %v1903_v44 = vmul.f32 %v1902_v34, %v1900_v17  ;;  %v2092_v50 = vadd.s32 %v4265_v5, %v4263_v22  ;;  %v4333_v36 = vshll.u32 %v2260_v18, 8  ;;  %v2468_v63 = vand.u32 2147483647, %v4311_v10 }
 0x167   :  { %1817 = vst [vmem:[#allocation8 + $0x78] sm:$0xff] %v1815_v53  ;;  %v2843_v27 = vmin.u32 %v2102_v23, %v4313_v9  ;;  %v2267_v4 = vsub.s32 32, %v2266_v20  ;;  %v2269_v28 = vshll.u32 %v3083_v30, %v2266_v20  ;;  %v2123_v46 = vsel %vm2038_vm5, %v2122_v15, %v2098_v48 }
 0x168   :  { %v1904_v57 = vxor.u32 2147483648, %v1903_v44  ;;  %v2265_v19 = vshrl.u32 %v2264_v2, 5  ;;  %v2472_v55 = vshrl.u32 %v2471_v56, 23  ;;  %vm4348_vm8 = vcmp.le.f32.partialorder %v2036_v51, 0.7853982 }
 0x169   :  { %v2104_v60 = vclz %v2843_v27  ;;  %v2268_v11 = vshrl.u32 %v3083_v30, %v2267_v4  ;;  %v2270_v7 = vshrl.u32 %v3084_v32, %v2267_v4  ;;  %v2272_v48 = vshll.u32 %v3084_v32, %v2266_v20 }
 0x16a   :  { %v1905_v42 = vsel %vm1822_vm11, %v1904_v57, %v1903_v44  ;;  %v2273_v25 = vshrl.u32 %v3085_v35, %v2267_v4  ;;  %v2275_v58 = vshll.u32 %v3085_v35, %v2266_v20  ;;  %v2276_v41 = vshrl.u32 %v3086_v37, %v2267_v4 }
 0x16b   :  { %v1908_v22 = vsel %vm4301_vm13, %v4054_v33, %v1905_v42  ;;  %v2844_v5 = vadd.s32 4294967294, %v2104_v60  ;;  %v2271_v24 = vor.u32 %v2270_v7, %v2269_v28  ;;  %v2278_v59 = vshll.u32 %v3086_v37, %v2266_v20 }
 0x16c   :  { %2976 = vcosq.f32 %v1908_v22  ;;  %v2274_v3 = vor.u32 %v2273_v25, %v2272_v48  ;;  %v2279_v51 = vshrl.u32 %v3087_v39, %v2267_v4  ;;  %v2277_v49 = vor.u32 %v2276_v41, %v2275_v58 }
 0x16d   :  { %2978 = vsinq.f32 %v1908_v22  ;;  %vm2845_vm6 = vcmp.lt.s32.totalorder %v2844_v5, 0  ;;  %v2281_v34 = vshll.u32 %v3087_v39, %v2266_v20  ;;  %v2282_v13 = vshrl.u32 %v3088_v47, %v2267_v4 }
 0x16e   :  { %v2107_v45 = vsel %vm2845_vm6, 0, %v2844_v5  ;;  %v2280_v40 = vor.u32 %v2279_v51, %v2278_v59  ;;  %vm2284_vm7 = vcmp.lt.s32.totalorder %v2265_v19, 1  ;;  %vm2285_vm9 = vcmp.lt.s32.totalorder %v2265_v19, 2 }
 0x16f   :  { %v2108_v31 = vsub.s32 32, %v2107_v45  ;;  %v2109_v62 = vshll.u32 %v4313_v9, %v2107_v45  ;;  %v2112_v6 = vsub.s32 4294967266, %v2107_v45  ;;  %vm2286_vm10 = vcmp.lt.s32.totalorder %v2265_v19, 3 }
 0x170   :  { %vm2020_vm11 = vcmp.eq.s32.totalorder %v4325_v26, 0  ;;  %v2283_v29 = vor.u32 %v2282_v13, %v2281_v34  ;;  %vm2287_vm12 = vcmp.lt.s32.totalorder %v2265_v19, 4  ;;  %v2288_v53 = vsel %vm2284_vm7, %v2268_v11, %v2271_v24 }
 0x171   :  { %v2110_v18 = vshrl.u32 %v2092_v50, %v2108_v31  ;;  %v2113_v52 = vadd.s32 127, %v2112_v6  ;;  %v2292_v9 = vsel %vm2284_vm7, %v2271_v24, %v2274_v3  ;;  %vm2019_vm14 = vcmp.lt.s32.totalorder %v4325_v26, 2 }
 0x172   :  { %v2289_v2 = vsel %vm2287_vm12, %v2277_v49, 2102212464  ;;  %v2293_v44 = vsel %vm2287_vm12, %v2280_v40, 920167782  ;;  %vm1912_vm15 = vweird.f32 %v4054_v33  ;;  %v2296_v27 = vsel %vm2284_vm7, %v2274_v3, %v2277_v49 }
 0x173   :  { %v2111_v17 = vor.u32 %v2110_v18, %v2109_v62  ;;  %v2114_v23 = vshll.u32 %v2113_v52, 23  ;;  %v2290_v15 = vsel %vm2286_vm10, %v2274_v3, %v2289_v2  ;;  %v2294_v56 = vsel %vm2286_vm10, %v2277_v49, %v2293_v44 }
 0x174   :  { %v2297_v20 = vsel %vm2287_vm12, %v2283_v29, 1326507024  ;;  %v2125_v60 = vsel %vm4348_vm8, 0, %v2123_v46  ;;  %v2295_v4 = vsel %vm2285_vm9, %v2292_v9, %v2294_v56  ;;  %v2475_v5 = vand.u32 8388607, %v2468_v63 }
 0x175   :  { %v2115_v57 = vor.u32 4788187, %v2114_v23  ;;  %v2118_v50 = vcvt.s32.f32 %v2111_v17  ;;  %v2298_v28 = vsel %vm2286_vm10, %v2280_v40, %v2297_v20  ;;  %v2291_v7 = vsel %vm2285_vm9, %v2288_v53, %v2290_v15 }
 0x176   :  { %v4374_v42 = vmul.u32.u64.low %v4333_v36, %v2295_v4  ;;  %v4375_v22 = vmul.u32.u64.high %v4333_v36, %v2295_v4, %v4374_v42  ;;  %v2299_v48 = vsel %vm2285_vm9, %v2296_v27, %v2298_v28  ;;  %v2858_v25 = vadd.s32 4294967169, %v2472_v55 }
 0x177   :  { %v2116_v11 = vand.u32 2147483647, %v2115_v57  ;;  %vm1915_vm0 = vcmp.lt.s32.totalorder %v4329_v8, 2  ;;  %vm2023_vm1 = vcmp.eq.s32.totalorder %v4325_v26, 2  ;;  %vm1916_vm2 = vcmp.eq.s32.totalorder %v4329_v8, 0 }
 0x178   :  { %v4385_v46 = vmul.u32.u64.low %v4333_v36, %v2299_v48  ;;  %v4386_v58 = vmul.u32.u64.high %v4333_v36, %v2299_v48, %v4385_v46  ;;  %vm1919_vm3 = vcmp.eq.s32.totalorder %v4329_v8, 2  ;;  %v2478_v45 = vadd.s32 1, %v2858_v25 }
 0x179   :  { %v2977_v24 = vpop.eup %2976  ;;  %v2119_v41 = vmul.f32 %v2118_v50, %v2116_v11  ;;  %v2129_v19 = vadd.s32 3, %v2125_v60  ;;  %v2307_v55 = vmul.u32 %v4333_v36, %v2291_v7  ;;  %v2310_v51 = vadd.s32 1, %v4375_v22 }
 0x17a   :  { %v2979_v3 = vpop.eup %2978  ;;  %v1920_v59 = vxor.u32 2147483648, %v2977_v24  ;;  %v4392_v6 = vand.u32 3, %v2125_v60  ;;  %v2476_v49 = vor.u32 8388608, %v2475_v5  ;;  %vm2309_vm13 = vc.u32 %v4386_v58, %v4374_v42 }
 0x17b   :  { %v1917_v31 = vxor.u32 2147483648, %v2979_v3  ;;  %v2120_v62 = vxor.u32 2147483648, %v2119_v41  ;;  %vm2479_vm4 = vcmp.gt.s32.totalorder %v2478_v45, 0  ;;  %v2311_v52 = vsel %vm2309_vm13, %v2310_v51, %v4375_v22 }
 0x17c   :  { %v1921_v40 = vsel %vm1919_vm3, %v1920_v59, %v2979_v3  ;;  %v2025_v34 = vsel %vm2023_vm1, %v1920_v59, %v2979_v3  ;;  %v2312_v17 = vadd.s32 %v2311_v52, %v2307_v55  ;;  %v2480_v44 = vsel %vm2479_vm4, %v2478_v45, 0 }
 0x17d   :  { %v1918_v13 = vsel %vm1916_vm2, %v2977_v24, %v1917_v31  ;;  %v2022_v36 = vsel %vm2020_vm11, %v2977_v24, %v1917_v31  ;;  %v2121_v18 = vsel %vm2038_vm5, %v2120_v62, %v2119_v41  ;;  %v4417_v8 = vand.u32 3, %v2129_v19 }
 0x17e   :  { %v1922_v29 = vsel %vm1915_vm0, %v1918_v13, %v1921_v40  ;;  %v2026_v53 = vsel %vm2019_vm14, %v2022_v36, %v2025_v34  ;;  %v2124_v9 = vsel %vm4348_vm8, %v4083_v21, %v2121_v18  ;;  %v2313_v26 = vadd.s32 536870912, %v2312_v17 }
 0x17f   :  { %v1923_v23 = vsel %vm1912_vm15, nan, %v1922_v29  ;;  %v2027_v2 = vsel %vm1912_vm15, nan, %v2026_v53  ;;  %2980 = vcosq.f32 %v2124_v9  ;;  %v4420_v56 = vmul.f32 0.109950386, %v3282_v16 }
 0x180   :  { %v1924_v15 = vmul.f32 %v1923_v23, %v4322_v1  ;;  %2982 = vsinq.f32 %v2124_v9  ;;  %v2482_v38 = vand.u32 31, %v2480_v44  ;;  %v2030_v20 = vmul.f32 3.0, %v4322_v1 }
 0x181   :  { %v4424_v57 = vmul.f32 0.63078314, %v4318_v0  ;;  %v4426_v33 = vshrl.u32 %v2313_v26, 30  ;;  %v4429_v50 = vmul.f32 3.0, %v4420_v56  ;;  %v4431_v4 = vshll.u32 %v2476_v49, 8 }
 0x182   :  { %v2028_v27 = vsub.f32 %v1924_v15, %v2027_v2  ;;  %v2483_v60 = vsub.s32 32, %v2482_v38  ;;  %v4434_v28 = vmul.f32 -1.0, %v4257_v61  ;;  %vm2135_vm5 = vcmp.eq.s32.totalorder %v4417_v8, 2 }
 0x183   :  { %vm2239_vm8 = vcmp.eq.s32.totalorder %v4392_v6, 2  ;;  %v2315_v0 = vshll.u32 %v4426_v33, 30  ;;  %v2683_v5 = vmul.f32 0.3641828, %v3920_v14  ;;  %v4443_v11 = vmul.f32 %v3920_v14, %v3920_v14 }
 0x184   :  { %v2029_v22 = vmul.f32 %v2028_v27, %v4322_v1  ;;  %vm2132_vm6 = vcmp.eq.s32.totalorder %v4417_v8, 0  ;;  %vm2236_vm7 = vcmp.eq.s32.totalorder %v4392_v6, 0  ;;  %v4447_v61 = vshrl.u32 %v2480_v44, 5 }
 0x185   :  { %v2485_v1 = vshll.u32 %v3083_v30, %v2482_v38  ;;  %v2488_v7 = vshll.u32 %v3084_v32, %v2482_v38  ;;  %v4453_v48 = vmul.f32 %v3953_v54, %v3953_v54  ;;  %vm2131_vm9 = vcmp.lt.s32.totalorder %v4417_v8, 2 }
 0x186   :  { %v2031_v25 = vmul.f32 %v2030_v20, %v2029_v22  ;;  %vm2235_vm10 = vcmp.lt.s32.totalorder %v4392_v6, 2  ;;  %v4457_v46 = vsub.s32 %v2312_v17, %v2315_v0  ;;  %v2486_v24 = vshrl.u32 %v3084_v32, %v2483_v60 }
 0x187   :  { %v2489_v41 = vshrl.u32 %v3085_v35, %v2483_v60  ;;  %vm2128_vm11 = vweird.f32 %v4083_v21  ;;  %v2491_v45 = vshll.u32 %v3085_v35, %v2482_v38  ;;  %v2492_v3 = vshrl.u32 %v3086_v37, %v2483_v60 }
 0x188   :  { %v2494_v59 = vshll.u32 %v3086_v37, %v2482_v38  ;;  %v2495_v19 = vshrl.u32 %v3087_v39, %v2483_v60  ;;  %v2032_v55 = vsub.f32 %v2031_v25, %v1924_v15  ;;  %v2308_v51 = vadd.s32 %v4374_v42, %v4386_v58 }
 0x189   :  { %v2318_v31 = vsub.s32 0, %v4457_v46  ;;  %v4470_v32 = vmul.f32 %v2683_v5, %v4434_v28  ;;  %v2484_v62 = vshrl.u32 %v3083_v30, %v2483_v60  ;;  %v2497_v49 = vshll.u32 %v3087_v39, %v2482_v38 }
 0x18a   :  { %v2498_v35 = vshrl.u32 %v3088_v47, %v2483_v60  ;;  %v481_v37 = vsub.f32 %v4443_v11, %v4453_v48  ;;  %v4477_v40 = vmul.f32 8.542646, %v2032_v55  ;;  %v2487_v13 = vor.u32 %v2486_v24, %v2485_v1 }
 0x18b   :  { %v2851_v34 = vmin.u32 %v2318_v31, %v4457_v46  ;;  %v2490_v42 = vor.u32 %v2489_v41, %v2488_v7  ;;  %v2493_v58 = vor.u32 %v2492_v3, %v2491_v45  ;;  %v2496_v36 = vor.u32 %v2495_v19, %v2494_v59 }
 0x18c   :  { %vm2500_vm12 = vcmp.lt.s32.totalorder %v4447_v61, 1  ;;  %v477_v30 = vmul.f32 %v3953_v54, %v3920_v14  ;;  %v2981_v18 = vpop.eup %2980  ;;  %v2691_v39 = vmul.f32 %v4424_v57, %v4477_v40  ;;  %vm2501_vm14 = vcmp.lt.s32.totalorder %v4447_v61, 2 }
 0x18d   :  { %v2320_v47 = vclz %v2851_v34  ;;  %vm2503_vm15 = vcmp.lt.s32.totalorder %v4447_v61, 4  ;;  %v2983_v52 = vpop.eup %2982  ;;  %v2136_v29 = vxor.u32 2147483648, %v2981_v18  ;;  %v2499_v53 = vor.u32 %v2498_v35, %v2497_v49 }
 0x18e   :  { %vm2502_vm0 = vcmp.lt.s32.totalorder %v4447_v61, 3  ;;  %v2505_v9 = vsel %vm2503_vm15, %v2493_v58, 2102212464  ;;  %2693 = vst [vmem:[#allocation8 + $0x80] sm:$0xff] %v2691_v39  ;;  %v2133_v17 = vxor.u32 2147483648, %v2983_v52  ;;  %v2504_v23 = vsel %vm2500_vm12, %v2484_v62, %v2487_v13 }
 0x18f   :  { %v2852_v14 = vadd.s32 4294967294, %v2320_v47  ;;  %v2508_v2 = vsel %vm2500_vm12, %v2487_v13, %v2490_v42  ;;  %v2137_v44 = vsel %vm2135_vm5, %v2136_v29, %v2983_v52  ;;  %v2241_v15 = vsel %vm2239_vm8, %v2136_v29, %v2983_v52 }
 0x190   :  { %v2506_v26 = vsel %vm2502_vm0, %v2490_v42, %v2505_v9  ;;  %v2509_v38 = vsel %vm2503_vm15, %v2496_v36, 920167782  ;;  %v2134_v27 = vsel %vm2132_vm6, %v2981_v18, %v2133_v17  ;;  %v2238_v20 = vsel %vm2236_vm7, %v2981_v18, %v2133_v17 }
 0x191   :  { %vm2853_vm1 = vcmp.lt.s32.totalorder %v2852_v14, 0  ;;  %v2510_v60 = vsel %vm2502_vm0, %v2493_v58, %v2509_v38  ;;  %v2138_v22 = vsel %vm2131_vm9, %v2134_v27, %v2137_v44  ;;  %v2242_v0 = vsel %vm2235_vm10, %v2238_v20, %v2241_v15 }
 0x192   :  { %v2323_v5 = vsel %vm2853_vm1, 0, %v2852_v14  ;;  %v2511_v11 = vsel %vm2501_vm14, %v2508_v2, %v2510_v60  ;;  %v2139_v1 = vsel %vm2128_vm11, nan, %v2138_v22  ;;  %v2243_v7 = vsel %vm2128_vm11, nan, %v2242_v0 }
 0x193   :  { %v2324_v48 = vsub.s32 32, %v2323_v5  ;;  %v2325_v25 = vshll.u32 %v4457_v46, %v2323_v5  ;;  %v2140_v24 = vmul.f32 %v2139_v1, %v4420_v56  ;;  %v2328_v8 = vsub.s32 4294967266, %v2323_v5 }
 0x194   :  { %v2512_v6 = vsel %vm2500_vm12, %v2490_v42, %v2493_v58  ;;  %v2513_v41 = vsel %vm2503_vm15, %v2499_v53, 1326507024  ;;  %v4527_v59 = vmul.u32.u64.low %v4431_v4, %v2511_v11  ;;  %v4528_v21 = vmul.u32.u64.high %v4431_v4, %v2511_v11, %v4527_v59 }
 0x195   :  { %v2326_v45 = vshrl.u32 %v2308_v51, %v2324_v48  ;;  %v2514_v3 = vsel %vm2502_vm0, %v2496_v36, %v2513_v41  ;;  %v2244_v19 = vsub.f32 %v2140_v24, %v2243_v7  ;;  %v2329_v46 = vadd.s32 127, %v2328_v8 }
 0x196   :  { %v2507_v55 = vsel %vm2501_vm14, %v2504_v23, %v2506_v26  ;;  %v2515_v31 = vsel %vm2501_vm14, %v2512_v6, %v2514_v3  ;;  %v2703_v35 = vmul.f32 %v4470_v32, %v4477_v40  ;;  %v2687_v42 = vmul.f32 0.1820914, %v481_v37 }
 0x197   :  { %v2327_v62 = vor.u32 %v2326_v45, %v2325_v25  ;;  %v4536_v49 = vmul.u32.u64.low %v4431_v4, %v2515_v31  ;;  %v4537_v51 = vmul.u32.u64.high %v4431_v4, %v2515_v31, %v4536_v49  ;;  %v2245_v34 = vmul.f32 %v2244_v19, %v4420_v56 }
 0x198   :  { %v2330_v13 = vshll.u32 %v2329_v46, 23  ;;  %v478_v58 = vadd.f32 %v477_v30, %v477_v30  ;;  %v2523_v18 = vmul.u32 %v4431_v4, %v2507_v55  ;;  %v2526_v39 = vadd.s32 1, %v4528_v21  ;;  %2705 = vst [vmem:[#allocation8 + $0xa0] sm:$0xff] %v2703_v35 }
 0x199   :  { %v2334_v36 = vcvt.s32.f32 %v2327_v62  ;;  %v2685_v61 = vmul.f32 0.3641828, %v3953_v54  ;;  %v2247_v47 = vmul.f32 %v4429_v50, %v2245_v34  ;;  %v4546_v29 = vmul.f32 3.0, %v2687_v42 }
 0x19a   :  { %v2331_v52 = vor.u32 4788187, %v2330_v13  ;;  %v2689_v53 = vmul.f32 0.1820914, %v478_v58  ;;  %vm2525_vm2 = vc.u32 %v4537_v51, %v4527_v59  ;;  %vm4562_vm3 = vcmp.le.f32.partialorder %v2252_v43, 0.7853982 }
 0x19b   :  { %v4551_v56 = vmul.f32 %v2685_v61, %v4434_v28  ;;  %v2248_v37 = vsub.f32 %v2247_v47, %v2140_v24  ;;  %v2527_v4 = vsel %vm2525_vm2, %v2526_v39, %v4528_v21  ;;  %v2715_v9 = vmul.f32 %v4546_v29, %v4477_v40 }
 0x19c   :  { %v2332_v30 = vand.u32 2147483647, %v2331_v52  ;;  %v2528_v54 = vadd.s32 %v2527_v4, %v2523_v18  ;;  %v4556_v17 = vmul.f32 3.0, %v2689_v53  ;;  %vm2254_vm13 = vcmp.lt.s32.totalorder %v4274_v12, 0 }
 0x19d   :  { %v2739_v50 = vmul.f32 %v4551_v56, %v4477_v40  ;;  %v2249_v14 = vmul.f32 13.101758, %v2248_v37  ;;  %2717 = vst [vmem:[#allocation8 + $0xc0] sm:$0xff] %v2715_v9  ;;  %v2338_v2 = vsub.s32 4, %v4426_v33  ;;  %v2524_v45 = vadd.s32 %v4527_v59, %v4537_v51 }
 0x19e   :  { %v2335_v28 = vmul.f32 %v2334_v36, %v2332_v30  ;;  %v2529_v44 = vadd.s32 536870912, %v2528_v54  ;;  %v2727_v15 = vmul.f32 %v4556_v17, %v4477_v40  ;;  %v2251_v13 = vmul.f32 0.08114946, %v3282_v16 }
 0x19f   :  { %2741 = vst [vmem:[#allocation8 + $0x100] sm:$0xff] %v2739_v50  ;;  %v2694_v26 = vmul.f32 %v4424_v57, %v2249_v14  ;;  %v2706_v27 = vmul.f32 %v4470_v32, %v2249_v14  ;;  %v2718_v43 = vmul.f32 %v4546_v29, %v2249_v14  ;;  %v2730_v60 = vmul.f32 %v4556_v17, %v2249_v14 }
 0x1a0   :  { %v2336_v38 = vxor.u32 2147483648, %v2335_v28  ;;  %v4573_v20 = vshrl.u32 %v2529_v44, 30  ;;  %2729 = vst [vmem:[#allocation8 + $0xe0] sm:$0xff] %v2727_v15  ;;  %v2742_v22 = vmul.f32 %v4551_v56, %v2249_v14  ;;  %v2339_v40 = vsel %vm2254_vm13, %v2338_v2, %v4426_v33 }
 0x1a1   :  { %2696 = vst [vmem:[#allocation8 + $0x88] sm:$0xff] %v2694_v26  ;;  %2708 = vst [vmem:[#allocation8 + $0xa8] sm:$0xff] %v2706_v27  ;;  %v2341_v7 = vsel %vm4562_vm3, 0, %v2339_v40  ;;  %vm2344_vm11 = vweird.f32 %v4274_v12  ;;  %vm2470_vm12 = vcmp.lt.s32.totalorder %v4311_v10, 0  ;;  %vm2469_vm14 = vcmp.le.f32.partialorder %v2468_v63, 0.7853982 }
 0x1a2   :  { %v2337_v0 = vsel %vm2254_vm13, %v2336_v38, %v2335_v28  ;;  %2720 = vst [vmem:[#allocation8 + $0xc8] sm:$0xff] %v2718_v43  ;;  %v2531_v11 = vshll.u32 %v4573_v20, 30  ;;  %2732 = vst [vmem:[#allocation8 + $0xe8] sm:$0xff] %v2730_v60  ;;  %v2345_v25 = vadd.s32 3, %v2341_v7  ;;  %v2450_v6 = vand.u32 3, %v2341_v7 }
 0x1a3   :  { %v2340_v5 = vsel %vm4562_vm3, %v4274_v12, %v2337_v0  ;;  %2744 = vst [vmem:[#allocation8 + $0x108] sm:$0xff] %v2742_v22  ;;  %v2554_v12 = vsub.s32 4, %v4573_v20 }
 0x1a4   :  { %2984 = vcosq.f32 %v2340_v5  ;;  %v2532_v1 = vsub.s32 %v2528_v54, %v2531_v11  ;;  %v2346_v33 = vand.u32 3, %v2345_v25  ;;  %vm2455_vm5 = vcmp.eq.s32.totalorder %v2450_v6, 2 }
 0x1a5   :  { %2986 = vsinq.f32 %v2340_v5  ;;  %vm2451_vm7 = vcmp.lt.s32.totalorder %v2450_v6, 2  ;;  %vm2452_vm9 = vcmp.eq.s32.totalorder %v2450_v6, 0  ;;  %v2462_v54 = vmul.f32 3.0, %v2251_v13 }
 0x1a6   :  { %v2534_v48 = vsub.s32 0, %v2532_v1  ;;  %vm2351_vm8 = vcmp.eq.s32.totalorder %v2346_v33, 2  ;;  %vm2348_vm6 = vcmp.eq.s32.totalorder %v2346_v33, 0  ;;  %vm2347_vm10 = vcmp.lt.s32.totalorder %v2346_v33, 2 }
 0x1a7   :  { %v2555_v15 = vsel %vm2470_vm12, %v2554_v12, %v4573_v20  ;;  %v2467_v25 = vmul.f32 0.064455405, %v3282_v16 }
 0x1a8   :  { %v2859_v24 = vmin.u32 %v2534_v48, %v2532_v1  ;;  %v2557_v27 = vsel %vm2469_vm14, 0, %v2555_v15 }
 0x1a9   :  { %v2561_v40 = vadd.s32 3, %v2557_v27  ;;  %v2666_v5 = vand.u32 3, %v2557_v27 }
 0x1aa   :  { %v2536_v8 = vclz %v2859_v24 }
 0x1ab   :  { %v2562_v20 = vand.u32 3, %v2561_v40  ;;  %vm2671_vm0 = vcmp.eq.s32.totalorder %v2666_v5, 2  ;;  %vm2668_vm2 = vcmp.eq.s32.totalorder %v2666_v5, 0  ;;  %vm2667_vm13 = vcmp.lt.s32.totalorder %v2666_v5, 2 }
 0x1ac   :  { %v2860_v41 = vadd.s32 4294967294, %v2536_v8 }
 0x1ad   :  { %vm2567_vm15 = vcmp.eq.s32.totalorder %v2562_v20, 2  ;;  %vm2564_vm1 = vcmp.eq.s32.totalorder %v2562_v20, 0  ;;  %vm2563_vm3 = vcmp.lt.s32.totalorder %v2562_v20, 2 }
 0x1ae   :  { %vm2861_vm4 = vcmp.lt.s32.totalorder %v2860_v41, 0 }
 0x1af   :  { %v2539_v3 = vsel %vm2861_vm4, 0, %v2860_v41  ;;  %vm2560_vm4 = vweird.f32 %v4311_v10 }
 0x1b0   :  { %v2540_v19 = vsub.s32 32, %v2539_v3  ;;  %v2541_v46 = vshll.u32 %v2532_v1, %v2539_v3  ;;  %v2544_v55 = vsub.s32 4294967266, %v2539_v3 }
 0x1b1   :  { %v2985_v21 = vpop.eup %2984 }
 0x1b2   :  { %v2987_v31 = vpop.eup %2986  ;;  %v2352_v62 = vxor.u32 2147483648, %v2985_v21  ;;  %v2542_v35 = vshrl.u32 %v2524_v45, %v2540_v19  ;;  %v2545_v34 = vadd.s32 127, %v2544_v55  ;;  %v2678_v55 = vmul.f32 3.0, %v2467_v25 }
 0x1b3   :  { %v2349_v49 = vxor.u32 2147483648, %v2987_v31 }
 0x1b4   :  { %v2353_v59 = vsel %vm2351_vm8, %v2352_v62, %v2987_v31  ;;  %v2457_v51 = vsel %vm2455_vm5, %v2352_v62, %v2987_v31  ;;  %v2543_v36 = vor.u32 %v2542_v35, %v2541_v46  ;;  %v2546_v18 = vshll.u32 %v2545_v34, 23 }
 0x1b5   :  { %v2350_v42 = vsel %vm2348_vm6, %v2985_v21, %v2349_v49  ;;  %v2454_v58 = vsel %vm2452_vm9, %v2985_v21, %v2349_v49 }
 0x1b6   :  { %v2354_v39 = vsel %vm2347_vm10, %v2350_v42, %v2353_v59  ;;  %v2458_v61 = vsel %vm2451_vm7, %v2454_v58, %v2457_v51  ;;  %v2547_v53 = vor.u32 4788187, %v2546_v18  ;;  %v2550_v37 = vcvt.s32.f32 %v2543_v36 }
 0x1b7   :  { %v2355_v47 = vsel %vm2344_vm11, nan, %v2354_v39  ;;  %v2459_v52 = vsel %vm2344_vm11, nan, %v2458_v61 }
 0x1b8   :  { %v2356_v30 = vmul.f32 %v2355_v47, %v2251_v13  ;;  %v2548_v4 = vand.u32 2147483647, %v2547_v53 }
 0x1ba   :  { %v2460_v9 = vsub.f32 %v2356_v30, %v2459_v52  ;;  %v2551_v50 = vmul.f32 %v2550_v37, %v2548_v4 }
 0x1bc   :  { %v2461_v14 = vmul.f32 %v2460_v9, %v2251_v13  ;;  %v2552_v23 = vxor.u32 2147483648, %v2551_v50 }
 0x1be   :  { %v2463_v28 = vmul.f32 %v2462_v54, %v2461_v14  ;;  %v2553_v2 = vsel %vm2470_vm12, %v2552_v23, %v2551_v50 }
 0x1bf   :  { %v2556_v26 = vsel %vm2469_vm14, %v4311_v10, %v2553_v2 }
 0x1c0   :  { %v2464_v44 = vsub.f32 %v2463_v28, %v2356_v30  ;;  %2988 = vcosq.f32 %v2556_v26 }
 0x1c1   :  { %2990 = vsinq.f32 %v2556_v26 }
 0x1c2   :  { %v2465_v38 = vmul.f32 17.60194, %v2464_v44 }
 0x1c4   :  { %v2697_v43 = vmul.f32 %v4424_v57, %v2465_v38  ;;  %v2709_v60 = vmul.f32 %v4470_v32, %v2465_v38  ;;  %v2721_v22 = vmul.f32 %v4546_v29, %v2465_v38  ;;  %v2733_v63 = vmul.f32 %v4556_v17, %v2465_v38 }
 0x1c5   :  { %v2745_v0 = vmul.f32 %v4551_v56, %v2465_v38 }
 0x1c6   :  { %2699 = vst [vmem:[#allocation8 + $0x90] sm:$0xff] %v2697_v43  ;;  %2711 = vst [vmem:[#allocation8 + $0xb0] sm:$0xff] %v2709_v60 }
 0x1c7   :  { %2723 = vst [vmem:[#allocation8 + $0xd0] sm:$0xff] %v2721_v22  ;;  %2735 = vst [vmem:[#allocation8 + $0xf0] sm:$0xff] %v2733_v63 }
 0x1c8   :  { %2747 = vst [vmem:[#allocation8 + $0x110] sm:$0xff] %v2745_v0 }
 0x1cd   :  { %v2989_v11 = vpop.eup %2988 }
 0x1ce   :  { %v2991_v1 = vpop.eup %2990  ;;  %v2568_v7 = vxor.u32 2147483648, %v2989_v11 }
 0x1cf   :  { %v2565_v48 = vxor.u32 2147483648, %v2991_v1 }
 0x1d0   :  { %v2569_v24 = vsel %vm2567_vm15, %v2568_v7, %v2991_v1  ;;  %v2673_v8 = vsel %vm2671_vm0, %v2568_v7, %v2991_v1 }
 0x1d1   :  { %v2566_v6 = vsel %vm2564_vm1, %v2989_v11, %v2565_v48  ;;  %v2670_v33 = vsel %vm2668_vm2, %v2989_v11, %v2565_v48 }
 0x1d2   :  { %v2570_v41 = vsel %vm2563_vm3, %v2566_v6, %v2569_v24  ;;  %v2674_v45 = vsel %vm2667_vm13, %v2670_v33, %v2673_v8 }
 0x1d3   :  { %v2571_v3 = vsel %vm2560_vm4, nan, %v2570_v41  ;;  %v2675_v21 = vsel %vm2560_vm4, nan, %v2674_v45 }
 0x1d4   :  { %v2572_v19 = vmul.f32 %v2571_v3, %v2467_v25 }
 0x1d6   :  { %v2676_v46 = vsub.f32 %v2572_v19, %v2675_v21 }
 0x1d8   :  { %v2677_v31 = vmul.f32 %v2676_v46, %v2467_v25 }
 0x1da   :  { %v2679_v62 = vmul.f32 %v2678_v55, %v2677_v31 }
 0x1dc   :  { %v2680_v49 = vsub.f32 %v2679_v62, %v2572_v19 }
 0x1de   :  { %v2681_v35 = vmul.f32 22.078962, %v2680_v49 }
 0x1e0   :  { %v2700_v16 = vmul.f32 %v4424_v57, %v2681_v35  ;;  %v2712_v10 = vmul.f32 %v4470_v32, %v2681_v35  ;;  %v2724_v34 = vmul.f32 %v4546_v29, %v2681_v35  ;;  %v2736_v13 = vmul.f32 %v4556_v17, %v2681_v35 }
 0x1e1   :  { %v2748_v59 = vmul.f32 %v4551_v56, %v2681_v35 }
 0x1e2   :  { %2702 = vst [vmem:[#allocation8 + $0x98] sm:$0xff] %v2700_v16  ;;  %2714 = vst [vmem:[#allocation8 + $0xb8] sm:$0xff] %v2712_v10 }
 0x1e3   :  { %2726 = vst [vmem:[#allocation8 + $0xd8] sm:$0xff] %v2724_v34  ;;  %2738 = vst [vmem:[#allocation8 + $0xf8] sm:$0xff] %v2736_v13 }
 0x1e4   :  { %2750 = vst [vmem:[#allocation8 + $0x118] sm:$0xff] %v2748_v59 }
 0x1e5   :  { %3065 = shalt.err (!%p3062_p5)
}
 0x1e6   :  { %s3090_s27 = smov 128   ;;  %s3091_s28 = smov 8  }
 0x1e7   :  { %2762 = dma.vmem_to_hbm [thread:$0]  %s2757_s2, 4608, %s4617_s3, [#allocation4], %s3090_s27, %s3090_s27, %s3091_s28  }
 0x1e8   :  { %3078 = dma.done.wait [#allocation4], 4608  }
 0x1e9   :  { %3079 = vsyncadd [#allocation4], 4294962688 }
 0x1ea   :  { %2766 = vsyncpa [#allocation3], 1 }
 0x1eb   :  { %2767 = vsyncpa [#allocation6], 1 }
 0x1ec   :  { %2768 = vsyncpa [#allocation4], 1 }

</bundles_post_ra>
